<compile_context>
chip_gen: v7x
topology: tpu7x:2x2x1
jax: 0.10.0
libtpu: 0.0.40
codegen_flags: <defaults>
</compile_context>

<pallas_src>
import functools

import jax
import jax.numpy as jnp
import numpy as np
from jax import lax
from jax.experimental import pallas as pl
from jax.experimental.pallas import tpu as pltpu


# ----------------------------------------------------------------------------
# Kernel bodies
# ----------------------------------------------------------------------------
def _bilstm_recurrence(x_ref, wihf_ref, wihb_ref, whh_ref, bf_ref, bb_ref,
                       out_ref, ginf_ref, ginb_ref, *, T, TB, H, se_col=None):
    """Bidirectional single-layer LSTM over one batch tile (time-major 3-D blocks).

    x_ref:    (T, TB, E)  bf16
    wih*_ref: (E, 4H)     bf16   columns [i, f, o, g]
    whh_ref:  (2H, 8H)    bf16   block-diagonal: [fwd whh | 0 ; 0 | bwd whh]
    b*_ref:   (1, 4H)     f32    (bias_ih + bias_hh), columns [i, f, o, g]
    out_ref:  (T, TB, 2H) f32    fwd hidden in [..., :H], bwd hidden in [..., H:]
    gin*_ref: (T, TB, 4H) f32    scratch: hoisted input projection (bias folded in)
    se_col:   (TB, 1) int32 sentence-end positions, or None.

    Returns (f_rep, b_rep): fwd hidden at t == se_col (zeros if se_col is None) and
    bwd hidden at t == 0 (== the final backward carry).
    """
    wihf = wihf_ref[...]
    wihb = wihb_ref[...]
    whh = whh_ref[...]
    bf = bf_ref[...]                        # (1, 4H) broadcasts over TB rows
    bb = bb_ref[...]

    # --- input projection, all timesteps, biases folded in (off the serial chain) ---
    def proj(t, carry):
        xt = x_ref[t]                                                   # (TB, E)
        ginf_ref[t] = jnp.dot(xt, wihf, preferred_element_type=jnp.float32) + bf
        ginb_ref[t] = jnp.dot(xt, wihb, preferred_element_type=jnp.float32) + bb
        return carry

    lax.fori_loop(0, T, proj, 0, unroll=True if T <= 16 else 4)

    H3, H4 = 3 * H, 4 * H

    def gates(g):                           # g: (TB, 4H), columns [i | f | o | g]
        sig = jax.nn.sigmoid(g[:, 0:H3])    # single EUP slab for the 3 sigmoid gates
        return sig[:, 0:H], sig[:, H:2 * H], sig[:, 2 * H:H3], jnp.tanh(g[:, H3:H4])

    def step(t, carry):
        h_f, c_f, h_b, c_b, f_rep = carry
        tb = T - 1 - t
        # One merged MXU push for both directions (block-diagonal whh).
        h2 = jnp.concatenate([h_f, h_b], axis=1).astype(whh.dtype)      # (TB, 2H)
        gr = jnp.dot(h2, whh, preferred_element_type=jnp.float32)       # (TB, 8H)
        i_f, f_fg, o_f, g_f = gates(ginf_ref[t] + gr[:, 0:H4])
        i_b, f_bg, o_b, g_b = gates(ginb_ref[tb] + gr[:, H4:2 * H4])
        c_f = f_fg * c_f + i_f * g_f
        h_f = o_f * jnp.tanh(c_f)
        c_b = f_bg * c_b + i_b * g_b
        h_b = o_b * jnp.tanh(c_b)
        out_ref[t, :, 0:H] = h_f
        out_ref[tb, :, H:2 * H] = h_b
        if se_col is not None:
            # In-loop sentence-rep capture (replaces the post-loop per-row gather).
            f_rep = jnp.where(se_col == t, h_f, f_rep)
        return h_f, c_f, h_b, c_b, f_rep

    z = jnp.zeros((TB, H), jnp.float32)
    _, _, h_b, _, f_rep = lax.fori_loop(0, T, step, (z, z, z, z, z),
                                        unroll=True if T <= 16 else 8)
    return f_rep, h_b


def bilstm_kernel(x_ref, wihf_ref, wihb_ref, whh_ref, bf_ref, bb_ref,
                  out_ref, ginf_ref, ginb_ref, *, T, TB, H):
    _bilstm_recurrence(x_ref, wihf_ref, wihb_ref, whh_ref, bf_ref, bb_ref,
                       out_ref, ginf_ref, ginb_ref, T=T, TB=TB, H=H)


def fused_kernel(se_ref, x_ref, wihf_ref, wihb_ref, whh_ref, bf_ref, bb_ref,
                 headw_ref, clab_ref, cm2_ref,
                 out_ref, cons2_ref, cla_ref, ginf_ref, ginb_ref, *, T, TB, H, K):
    """BiLSTM + sentence-rep / attention / softmax / consensus / cla head, one kernel.

    se_ref: (TB, 1) int32; headw: (2H, 2K) columns [attn | cla];
    clab: (1, K); cm2: (K, C*Tg).
    Outputs: lstm (T, TB, 2H), consensus2 (TB, C*Tg), cla logits (TB, K).
    """
    se_col = se_ref[...]                                                # (TB, 1)
    f_rep, b_rep = _bilstm_recurrence(
        x_ref, wihf_ref, wihb_ref, whh_ref, bf_ref, bb_ref,
        out_ref, ginf_ref, ginb_ref, T=T, TB=TB, H=H, se_col=se_col)

    sent_rep = jnp.concatenate([f_rep, b_rep], axis=1)                  # (TB, 2H)
    # attn + cla fused into one small matmul; task_attn itself is never consumed
    # by any forward branch, so it is not written out.
    hd = jnp.dot(sent_rep, headw_ref[...], preferred_element_type=jnp.float32)
    ta = hd[:, 0:K]
    cla_ref[...] = hd[:, K:2 * K] + clab_ref[...]

    # softmax over tasks; approx reciprocal runs on the otherwise-idle EUP slot.
    e = jnp.exp(ta - jnp.max(ta, axis=1, keepdims=True))
    soft = e * pl.reciprocal(jnp.sum(e, axis=1, keepdims=True), approx=True)
    # consensus2[b] = sum_k soft[b, k] * CM2[k]  (CM2 flattened over (C, Tg))
    cons2_ref[...] = jnp.dot(soft, cm2_ref[...], preferred_element_type=jnp.float32)


# ----------------------------------------------------------------------------
# pallas_call wrappers
# ----------------------------------------------------------------------------
def _batch_tile(B):
    # Block sublane dims must be a multiple of 8 or equal the full extent.  A TB of 8
    # gives multiple parallel grid programs (2 TensorCores on v7x) when B allows it;
    # production would tune TB further.
    return 8 if B % 8 == 0 else B


def _rep_spec(arr):
    nd = arr.ndim
    return pl.BlockSpec(arr.shape, lambda b, nd=nd: (0,) * nd)


def run_bilstm(x_tbe, kp, T, B, H):
    TB = _batch_tile(B)
    nb = B // TB
    E = x_tbe.shape[-1]
    grid_spec = pltpu.PrefetchScalarGridSpec(
        num_scalar_prefetch=0,
        grid=(nb,),
        in_specs=[
            pl.BlockSpec((T, TB, E), lambda b: (0, b, 0)),
            _rep_spec(kp["wih_f"]), _rep_spec(kp["wih_b"]), _rep_spec(kp["whh"]),
            _rep_spec(kp["bf"]), _rep_spec(kp["bb"]),
        ],
        out_specs=pl.BlockSpec((T, TB, 2 * H), lambda b: (0, b, 0)),
        scratch_shapes=[pltpu.VMEM((T, TB, 4 * H), jnp.float32),
                        pltpu.VMEM((T, TB, 4 * H), jnp.float32)],
    )
    return pl.pallas_call(
        functools.partial(bilstm_kernel, T=T, TB=TB, H=H),
        out_shape=jax.ShapeDtypeStruct((T, B, 2 * H), jnp.float32),
        grid_spec=grid_spec,
        compiler_params=pltpu.CompilerParams(dimension_semantics=("parallel",)),
    )(x_tbe, kp["wih_f"], kp["wih_b"], kp["whh"], kp["bf"], kp["bb"])


def run_fused(sent_end, x_tbe, kp, hp, T, B, H, K, CT):
    TB = _batch_tile(B)
    nb = B // TB
    E = x_tbe.shape[-1]
    grid_spec = pltpu.PrefetchScalarGridSpec(
        num_scalar_prefetch=0,
        grid=(nb,),
        in_specs=[
            pl.BlockSpec((TB, 1), lambda b: (b, 0)),              # sent_end
            pl.BlockSpec((T, TB, E), lambda b: (0, b, 0)),        # embedded words
            _rep_spec(kp["wih_f"]), _rep_spec(kp["wih_b"]), _rep_spec(kp["whh"]),
            _rep_spec(kp["bf"]), _rep_spec(kp["bb"]),
            _rep_spec(hp["headw"]), _rep_spec(hp["clab"]), _rep_spec(hp["cm2"]),
        ],
        out_specs=(
            pl.BlockSpec((T, TB, 2 * H), lambda b: (0, b, 0)),    # lstm out
            pl.BlockSpec((TB, CT), lambda b: (b, 0)),             # consensus2 (flat)
            pl.BlockSpec((TB, K), lambda b: (b, 0)),              # cla logits
        ),
        scratch_shapes=[pltpu.VMEM((T, TB, 4 * H), jnp.float32),
                        pltpu.VMEM((T, TB, 4 * H), jnp.float32)],
    )
    return pl.pallas_call(
        functools.partial(fused_kernel, T=T, TB=TB, H=H, K=K),
        out_shape=(jax.ShapeDtypeStruct((T, B, 2 * H), jnp.float32),
                   jax.ShapeDtypeStruct((B, CT), jnp.float32),
                   jax.ShapeDtypeStruct((B, K), jnp.float32)),
        grid_spec=grid_spec,
        compiler_params=pltpu.CompilerParams(dimension_semantics=("parallel",)),
    )(sent_end, x_tbe, kp["wih_f"], kp["wih_b"], kp["whh"], kp["bf"], kp["bb"],
      hp["headw"], hp["clab"], hp["cm2"])


# ----------------------------------------------------------------------------
# Model wrapper (parameters + forward branches)
# ----------------------------------------------------------------------------
class ADVFCNv2Pallas:
    def __init__(self, args, word_emb_table, key):
        self.args = args
        H = args["word_rnn_hid"]
        E = word_emb_table.shape[1]
        K = args["num_tasks"]
        Tg = args["tagset_size"]
        C = args["cm_dim"]
        keys = jax.random.split(key, 16)

        self.word_emb = jnp.asarray(word_emb_table, jnp.float32)

        kscale = 1.0 / np.sqrt(H)  # PyTorch LSTM default init range

        def u(k, shape):
            return jax.random.uniform(k, shape, jnp.float32, -kscale, kscale)

        # Canonical LSTM params (PyTorch gate order [i,f,g,o], stored transposed for x @ W).
        self.lstm = {
            "wih_f": u(keys[0], (E, 4 * H)),
            "whh_f": u(keys[1], (H, 4 * H)),
            "bf":    u(keys[2], (1, 4 * H)) + u(keys[3], (1, 4 * H)),
            "wih_b": u(keys[4], (E, 4 * H)),
            "whh_b": u(keys[5], (H, 4 * H)),
            "bb":    u(keys[6], (1, 4 * H)) + u(keys[7], (1, 4 * H)),
        }

        def xavier(k, shape):
            fan_in, fan_out = shape[-2], shape[-1]
            std = np.sqrt(2.0 / (fan_in + fan_out))
            return jax.random.normal(k, shape, jnp.float32) * std

        self.attn = xavier(keys[8], (2 * H, K))                 # (2H, K)
        self.CM1 = xavier(keys[9], (Tg, C))                     # (Tg, C)
        self.CM2 = xavier(keys[10], (K, C, Tg))                 # (K, C, Tg)
        self.cla_w = xavier(keys[11], (K, 2 * H))               # torch Linear weight
        self.cla_b = jax.random.uniform(keys[12], (K,), jnp.float32,
                                        -1.0 / np.sqrt(2 * H), 1.0 / np.sqrt(2 * H))

        # --- kernel-format params (built once) ---
        def perm(w):   # column permutation [i,f,g,o] -> [i,f,o,g]; math-equivalent
            i, f, g, o = jnp.split(w, 4, axis=-1)
            return jnp.concatenate([i, f, o, g], axis=-1)

        p = self.lstm
        # Block-diagonal recurrent weight: one MXU push handles both directions.
        whh_blk = jnp.zeros((2 * H, 8 * H), jnp.float32)
        whh_blk = whh_blk.at[0:H, 0:4 * H].set(perm(p["whh_f"]))
        whh_blk = whh_blk.at[H:2 * H, 4 * H:8 * H].set(perm(p["whh_b"]))
        self.kp = {
            "wih_f": perm(p["wih_f"]).astype(jnp.bfloat16),           # (E, 4H)
            "wih_b": perm(p["wih_b"]).astype(jnp.bfloat16),           # (E, 4H)
            "whh":   whh_blk.astype(jnp.bfloat16),                    # (2H, 8H)
            "bf":    perm(p["bf"]),                                   # (1, 4H) f32
            "bb":    perm(p["bb"]),
        }
        self.hp = {
            "headw": jnp.concatenate([self.attn, self.cla_w.T], axis=1),  # (2H, 2K)
            "clab":  self.cla_b.reshape(1, K),                            # (1, K)
            "cm2":   self.CM2.reshape(K, C * Tg),                         # (K, C*Tg)
        }

    def _embed_time_major(self, words):
        # eval-mode dropout == identity; gather straight into time-major (T, B, E).
        return jnp.take(self.word_emb, jnp.transpose(words), axis=0).astype(jnp.bfloat16)

    def forward(self, data_input, sent_end, task_ids, model_name):
        words = jnp.asarray(data_input[1], jnp.int32)                 # (B, T)
        B, T = words.shape
        H = self.args["word_rnn_hid"]
        K = self.args["num_tasks"]
        Tg, C = self.args["tagset_size"], self.args["cm_dim"]
        x_tbe = self._embed_time_major(words)                         # (T, B, E) bf16

        if model_name == "adv_cn-ext":
            lstm_tbe = run_bilstm(x_tbe, self.kp, T, B, H)
            lstm_out = jnp.transpose(lstm_tbe, (1, 0, 2))
            consensus1 = jnp.broadcast_to(self.CM1[None], (B, Tg, C))
            consensus2 = self.CM2[jnp.asarray(task_ids, jnp.int32)]
            # TODO(synk): crf.FCN_CRF_S not provided; return its inputs instead of crf_out.
            return lstm_out, consensus1, consensus2

        # Clamp sent_end so the in-kernel select always matches a valid timestep.
        se = jnp.clip(jnp.asarray(sent_end, jnp.int32).reshape(B, 1), 0, T - 1)
        lstm_tbe, cons2_2d, cla_out = run_fused(
            se, x_tbe, self.kp, self.hp, T, B, H, K, C * Tg)

        if model_name == "adv_cn-agg":
            lstm_out = jnp.transpose(lstm_tbe, (1, 0, 2))
            consensus1 = jnp.broadcast_to(self.CM1[None], (B, Tg, C))
            consensus2 = cons2_2d.reshape(B, C, Tg)
            # TODO(synk): crf.FCN_CRF_S not provided; return its inputs instead of crf_out.
            return lstm_out, consensus1, consensus2
        # 'adv_cn-adv' / 'adv_cn-train_cla'
        return cla_out


# ----------------------------------------------------------------------------
# Pure-JAX reference (matches kernel numerics: bf16 matmuls, f32 state)
# ----------------------------------------------------------------------------
def ref_bilstm(emb_bte, p):
    H = p["whh_f"].shape[0]

    def make_cell(wih, whh, bias):
        wih16 = wih.astype(jnp.bfloat16)
        whh16 = whh.astype(jnp.bfloat16)

        def f(carry, xt):
            h, c = carry
            g = (jnp.dot(xt.astype(jnp.bfloat16), wih16,
                         preferred_element_type=jnp.float32)
                 + jnp.dot(h.astype(jnp.bfloat16), whh16,
                           preferred_element_type=jnp.float32)
                 + bias)
            i = jax.nn.sigmoid(g[:, :H])
            fo = jax.nn.sigmoid(g[:, H:2 * H])
            gg = jnp.tanh(g[:, 2 * H:3 * H])
            o = jax.nn.sigmoid(g[:, 3 * H:])
            c = fo * c + i * gg
            h = o * jnp.tanh(c)
            return (h, c), h

        return f

    B = emb_bte.shape[0]
    x_tbe = jnp.transpose(emb_bte, (1, 0, 2))
    z = jnp.zeros((B, H), jnp.float32)
    _, hs_f = lax.scan(make_cell(p["wih_f"], p["whh_f"], p["bf"]), (z, z), x_tbe)
    _, hs_b = lax.scan(make_cell(p["wih_b"], p["whh_b"], p["bb"]), (z, z),
                       x_tbe[::-1])
    hs_b = hs_b[::-1]
    return jnp.transpose(jnp.concatenate([hs_f, hs_b], axis=-1), (1, 0, 2))


# ----------------------------------------------------------------------------
if __name__ == "__main__":
    B, T, V, E = 2, 8, 20, 32
    args = {
        "char_rnn": False, "word_rnn": True,
        "fine_tune_char_emb": False, "fine_tune_word_emb": False,
        "word_rnn_hid": 32, "word_rnn_layers": 1,
        "char_rnn_hid": 16, "char_rnn_layers": 1,
        "dropout": 0.0, "pad_word_idx": 0,
        "num_tasks": 4, "tagset_size": 8, "cm_dim": 16,
        "fine_tune": False,
    }

    key = jax.random.PRNGKey(0)
    k_emb, k_model, k_words = jax.random.split(key, 3)
    word_table = jax.random.normal(k_emb, (V, E), jnp.float32)
    model = ADVFCNv2Pallas(args, word_table, k_model)

    words = jax.random.randint(k_words, (B, T), 1, V).astype(jnp.int32)
    data_input = (None, words)
    sent_end = [T - 1, T - 3]
    task_ids = [0, 1]

    # Run all three forward branches through the Pallas kernels.
    lstm_out, cons1, cons2 = model.forward(data_input, sent_end, task_ids,
                                           "adv_cn-agg")
    lstm_out_e, cons1_e, cons2_e = model.forward(data_input, None, task_ids,
                                                 "adv_cn-ext")
    cla_out = model.forward(data_input, sent_end, task_ids, "adv_cn-adv")
    jax.block_until_ready((lstm_out, cons1, cons2,
                           lstm_out_e, cons1_e, cons2_e, cla_out))

    # --- validate against the pure-JAX reference ---
    H, K = args["word_rnn_hid"], args["num_tasks"]
    Tg, C = args["tagset_size"], args["cm_dim"]
    emb = jnp.take(model.word_emb, words, axis=0)                     # (B, T, E) f32
    lstm_ref = ref_bilstm(emb, model.lstm)                            # (B, T, 2H)
    se_np = np.asarray(sent_end)
    f_rep = lstm_ref[np.arange(B), se_np, :H]
    b_rep = lstm_ref[np.arange(B), 0, H:]
    sent_rep = jnp.concatenate([f_rep, b_rep], axis=1)
    ta_ref = sent_rep @ model.attn
    soft = jax.nn.softmax(ta_ref, axis=1)
    cons2_ref = jnp.einsum("bk,kct->bct", soft, model.CM2)
    cla_ref = sent_rep @ model.cla_w.T + model.cla_b[None, :]

    np.testing.assert_allclose(np.asarray(lstm_out), np.asarray(lstm_ref),
                               rtol=1e-3, atol=1e-3)
    np.testing.assert_allclose(np.asarray(lstm_out_e), np.asarray(lstm_ref),
                               rtol=1e-3, atol=1e-3)
    np.testing.assert_allclose(np.asarray(cons2), np.asarray(cons2_ref),
                               rtol=2e-3, atol=2e-3)
    np.testing.assert_allclose(np.asarray(cla_out), np.asarray(cla_ref),
                               rtol=1e-3, atol=1e-3)
    np.testing.assert_allclose(
        np.asarray(cons1),
        np.broadcast_to(np.asarray(model.CM1)[None], (B, Tg, C)),
        rtol=1e-6, atol=1e-6)
    np.testing.assert_allclose(
        np.asarray(cons2_e), np.asarray(model.CM2[np.asarray(task_ids)]),
        rtol=1e-6, atol=1e-6)

    print("KERNEL_OK")
</pallas_src>

<mosaic_0001>
module attributes {stable_mosaic.version = 11 : i64} {
  func.func @fused_kernel(%arg0: i32, %arg1: memref<2x1xi32, #tpu.memory_space<vmem>>, %arg2: memref<8x2x32xbf16, #tpu.memory_space<vmem>>, %arg3: memref<32x128xbf16, #tpu.memory_space<vmem>>, %arg4: memref<32x128xbf16, #tpu.memory_space<vmem>>, %arg5: memref<64x256xbf16, #tpu.memory_space<vmem>>, %arg6: memref<1x128xf32, #tpu.memory_space<vmem>>, %arg7: memref<1x128xf32, #tpu.memory_space<vmem>>, %arg8: memref<64x8xf32, #tpu.memory_space<vmem>>, %arg9: memref<1x4xf32, #tpu.memory_space<vmem>>, %arg10: memref<4x128xf32, #tpu.memory_space<vmem>>, %arg11: memref<8x2x64xf32, #tpu.memory_space<vmem>>, %arg12: memref<2x128xf32, #tpu.memory_space<vmem>>, %arg13: memref<2x4xf32, #tpu.memory_space<vmem>>, %arg14: memref<8x2x128xf32, #tpu.memory_space<vmem>>, %arg15: memref<8x2x128xf32, #tpu.memory_space<vmem>>) attributes {dimension_semantics = [#tpu.dimension_semantics<parallel>], iteration_bounds = array<i64: 1>, scalar_prefetch = 0 : i64, scratch_operands = 2 : i64, tpu.core_type = #tpu.core_type<tc>, window_params = [{transform_indices = @transform_0, window_bounds = array<i64: 2, 1>}, {transform_indices = @transform_1, window_bounds = array<i64: 8, 2, 32>}, {pipeline_mode = #tpu.pipeline_mode<synchronous>, transform_indices = @transform_2, window_bounds = array<i64: 32, 128>}, {pipeline_mode = #tpu.pipeline_mode<synchronous>, transform_indices = @transform_3, window_bounds = array<i64: 32, 128>}, {pipeline_mode = #tpu.pipeline_mode<synchronous>, transform_indices = @transform_4, window_bounds = array<i64: 64, 256>}, {pipeline_mode = #tpu.pipeline_mode<synchronous>, transform_indices = @transform_5, window_bounds = array<i64: 1, 128>}, {pipeline_mode = #tpu.pipeline_mode<synchronous>, transform_indices = @transform_6, window_bounds = array<i64: 1, 128>}, {pipeline_mode = #tpu.pipeline_mode<synchronous>, transform_indices = @transform_7, window_bounds = array<i64: 64, 8>}, {pipeline_mode = #tpu.pipeline_mode<synchronous>, transform_indices = @transform_8, window_bounds = array<i64: 1, 4>}, {pipeline_mode = #tpu.pipeline_mode<synchronous>, transform_indices = @transform_9, window_bounds = array<i64: 4, 128>}, {transform_indices = @transform_10, window_bounds = array<i64: 8, 2, 64>}, {transform_indices = @transform_11, window_bounds = array<i64: 2, 128>}, {transform_indices = @transform_12, window_bounds = array<i64: 2, 4>}]} {
    %c0 = arith.constant 0 : index
    %c0_0 = arith.constant 0 : index
    %0 = vector.load %arg1[%c0, %c0_0] : memref<2x1xi32, #tpu.memory_space<vmem>>, vector<2x1xi32>
    %c0_1 = arith.constant 0 : index
    %c0_2 = arith.constant 0 : index
    %1 = vector.load %arg3[%c0_1, %c0_2] : memref<32x128xbf16, #tpu.memory_space<vmem>>, vector<32x128xbf16>
    %c0_3 = arith.constant 0 : index
    %c0_4 = arith.constant 0 : index
    %2 = vector.load %arg4[%c0_3, %c0_4] : memref<32x128xbf16, #tpu.memory_space<vmem>>, vector<32x128xbf16>
    %c0_5 = arith.constant 0 : index
    %c0_6 = arith.constant 0 : index
    %3 = vector.load %arg5[%c0_5, %c0_6] : memref<64x256xbf16, #tpu.memory_space<vmem>>, vector<64x256xbf16>
    %c0_7 = arith.constant 0 : index
    %c0_8 = arith.constant 0 : index
    %4 = vector.load %arg6[%c0_7, %c0_8] : memref<1x128xf32, #tpu.memory_space<vmem>>, vector<1x128xf32>
    %c0_9 = arith.constant 0 : index
    %c0_10 = arith.constant 0 : index
    %5 = vector.load %arg7[%c0_9, %c0_10] : memref<1x128xf32, #tpu.memory_space<vmem>>, vector<1x128xf32>
    %c0_i32 = arith.constant 0 : i32
    %6 = arith.index_cast %c0_i32 : i32 to index
    %c0_11 = arith.constant 0 : index
    %c0_12 = arith.constant 0 : index
    %7 = vector.load %arg2[%6, %c0_11, %c0_12] : memref<8x2x32xbf16, #tpu.memory_space<vmem>>, vector<1x2x32xbf16>
    %8 = vector.shape_cast %7 : vector<1x2x32xbf16> to vector<2x32xbf16>
    %cst = arith.constant dense<0.000000e+00> : vector<2x128xf32>
    %9 = tpu.matmul %8, %1, %cst {dimension_numbers = #tpu.dot_dimension_numbers<[1], [0], [0], [1], [0, 0, 1, 1], [], []>} : vector<2x32xbf16>, vector<32x128xbf16>, vector<2x128xf32> -> vector<2x128xf32>
    %10 = vector.broadcast %4 : vector<1x128xf32> to vector<2x128xf32>
    %11 = arith.addf %9, %10 : vector<2x128xf32>
    %12 = arith.index_cast %c0_i32 : i32 to index
    %c0_13 = arith.constant 0 : index
    %c0_14 = arith.constant 0 : index
    %13 = vector.load %arg14[%12, %c0_13, %c0_14] : memref<8x2x128xf32, #tpu.memory_space<vmem>>, vector<1x2x128xf32>
    %14 = vector.shape_cast %13 : vector<1x2x128xf32> to vector<2x128xf32>
    %15 = vector.shape_cast %11 : vector<2x128xf32> to vector<1x2x128xf32>
    tpu.vector_store %arg14[%12, %c0_13, %c0_14], %15 {strides = array<i32>} : memref<8x2x128xf32, #tpu.memory_space<vmem>>, vector<1x2x128xf32>,
    %cst_15 = arith.constant dense<0.000000e+00> : vector<2x128xf32>
    %16 = tpu.matmul %8, %2, %cst_15 {dimension_numbers = #tpu.dot_dimension_numbers<[1], [0], [0], [1], [0, 0, 1, 1], [], []>} : vector<2x32xbf16>, vector<32x128xbf16>, vector<2x128xf32> -> vector<2x128xf32>
    %17 = vector.broadcast %5 : vector<1x128xf32> to vector<2x128xf32>
    %18 = arith.addf %16, %17 : vector<2x128xf32>
    %19 = arith.index_cast %c0_i32 : i32 to index
    %c0_16 = arith.constant 0 : index
    %c0_17 = arith.constant 0 : index
    %20 = vector.load %arg15[%19, %c0_16, %c0_17] : memref<8x2x128xf32, #tpu.memory_space<vmem>>, vector<1x2x128xf32>
    %21 = vector.shape_cast %20 : vector<1x2x128xf32> to vector<2x128xf32>
    %22 = vector.shape_cast %18 : vector<2x128xf32> to vector<1x2x128xf32>
    tpu.vector_store %arg15[%19, %c0_16, %c0_17], %22 {strides = array<i32>} : memref<8x2x128xf32, #tpu.memory_space<vmem>>, vector<1x2x128xf32>,
    %c1_i32 = arith.constant 1 : i32
    %23 = arith.index_cast %c1_i32 : i32 to index
    %c0_18 = arith.constant 0 : index
    %c0_19 = arith.constant 0 : index
    %24 = vector.load %arg2[%23, %c0_18, %c0_19] : memref<8x2x32xbf16, #tpu.memory_space<vmem>>, vector<1x2x32xbf16>
    %25 = vector.shape_cast %24 : vector<1x2x32xbf16> to vector<2x32xbf16>
    %cst_20 = arith.constant dense<0.000000e+00> : vector<2x128xf32>
    %26 = tpu.matmul %25, %1, %cst_20 {dimension_numbers = #tpu.dot_dimension_numbers<[1], [0], [0], [1], [0, 0, 1, 1], [], []>} : vector<2x32xbf16>, vector<32x128xbf16>, vector<2x128xf32> -> vector<2x128xf32>
    %27 = vector.broadcast %4 : vector<1x128xf32> to vector<2x128xf32>
    %28 = arith.addf %26, %27 : vector<2x128xf32>
    %29 = arith.index_cast %c1_i32 : i32 to index
    %c0_21 = arith.constant 0 : index
    %c0_22 = arith.constant 0 : index
    %30 = vector.load %arg14[%29, %c0_21, %c0_22] : memref<8x2x128xf32, #tpu.memory_space<vmem>>, vector<1x2x128xf32>
    %31 = vector.shape_cast %30 : vector<1x2x128xf32> to vector<2x128xf32>
    %32 = vector.shape_cast %28 : vector<2x128xf32> to vector<1x2x128xf32>
    tpu.vector_store %arg14[%29, %c0_21, %c0_22], %32 {strides = array<i32>} : memref<8x2x128xf32, #tpu.memory_space<vmem>>, vector<1x2x128xf32>,
    %cst_23 = arith.constant dense<0.000000e+00> : vector<2x128xf32>
    %33 = tpu.matmul %25, %2, %cst_23 {dimension_numbers = #tpu.dot_dimension_numbers<[1], [0], [0], [1], [0, 0, 1, 1], [], []>} : vector<2x32xbf16>, vector<32x128xbf16>, vector<2x128xf32> -> vector<2x128xf32>
    %34 = vector.broadcast %5 : vector<1x128xf32> to vector<2x128xf32>
    %35 = arith.addf %33, %34 : vector<2x128xf32>
    %36 = arith.index_cast %c1_i32 : i32 to index
    %c0_24 = arith.constant 0 : index
    %c0_25 = arith.constant 0 : index
    %37 = vector.load %arg15[%36, %c0_24, %c0_25] : memref<8x2x128xf32, #tpu.memory_space<vmem>>, vector<1x2x128xf32>
    %38 = vector.shape_cast %37 : vector<1x2x128xf32> to vector<2x128xf32>
    %39 = vector.shape_cast %35 : vector<2x128xf32> to vector<1x2x128xf32>
    tpu.vector_store %arg15[%36, %c0_24, %c0_25], %39 {strides = array<i32>} : memref<8x2x128xf32, #tpu.memory_space<vmem>>, vector<1x2x128xf32>,
    %c2_i32 = arith.constant 2 : i32
    %40 = arith.index_cast %c2_i32 : i32 to index
    %c0_26 = arith.constant 0 : index
    %c0_27 = arith.constant 0 : index
    %41 = vector.load %arg2[%40, %c0_26, %c0_27] : memref<8x2x32xbf16, #tpu.memory_space<vmem>>, vector<1x2x32xbf16>
    %42 = vector.shape_cast %41 : vector<1x2x32xbf16> to vector<2x32xbf16>
    %cst_28 = arith.constant dense<0.000000e+00> : vector<2x128xf32>
    %43 = tpu.matmul %42, %1, %cst_28 {dimension_numbers = #tpu.dot_dimension_numbers<[1], [0], [0], [1], [0, 0, 1, 1], [], []>} : vector<2x32xbf16>, vector<32x128xbf16>, vector<2x128xf32> -> vector<2x128xf32>
    %44 = vector.broadcast %4 : vector<1x128xf32> to vector<2x128xf32>
    %45 = arith.addf %43, %44 : vector<2x128xf32>
    %46 = arith.index_cast %c2_i32 : i32 to index
    %c0_29 = arith.constant 0 : index
    %c0_30 = arith.constant 0 : index
    %47 = vector.load %arg14[%46, %c0_29, %c0_30] : memref<8x2x128xf32, #tpu.memory_space<vmem>>, vector<1x2x128xf32>
    %48 = vector.shape_cast %47 : vector<1x2x128xf32> to vector<2x128xf32>
    %49 = vector.shape_cast %45 : vector<2x128xf32> to vector<1x2x128xf32>
    tpu.vector_store %arg14[%46, %c0_29, %c0_30], %49 {strides = array<i32>} : memref<8x2x128xf32, #tpu.memory_space<vmem>>, vector<1x2x128xf32>,
    %cst_31 = arith.constant dense<0.000000e+00> : vector<2x128xf32>
    %50 = tpu.matmul %42, %2, %cst_31 {dimension_numbers = #tpu.dot_dimension_numbers<[1], [0], [0], [1], [0, 0, 1, 1], [], []>} : vector<2x32xbf16>, vector<32x128xbf16>, vector<2x128xf32> -> vector<2x128xf32>
    %51 = vector.broadcast %5 : vector<1x128xf32> to vector<2x128xf32>
    %52 = arith.addf %50, %51 : vector<2x128xf32>
    %53 = arith.index_cast %c2_i32 : i32 to index
    %c0_32 = arith.constant 0 : index
    %c0_33 = arith.constant 0 : index
    %54 = vector.load %arg15[%53, %c0_32, %c0_33] : memref<8x2x128xf32, #tpu.memory_space<vmem>>, vector<1x2x128xf32>
    %55 = vector.shape_cast %54 : vector<1x2x128xf32> to vector<2x128xf32>
    %56 = vector.shape_cast %52 : vector<2x128xf32> to vector<1x2x128xf32>
    tpu.vector_store %arg15[%53, %c0_32, %c0_33], %56 {strides = array<i32>} : memref<8x2x128xf32, #tpu.memory_space<vmem>>, vector<1x2x128xf32>,
    %c3_i32 = arith.constant 3 : i32
    %57 = arith.index_cast %c3_i32 : i32 to index
    %c0_34 = arith.constant 0 : index
    %c0_35 = arith.constant 0 : index
    %58 = vector.load %arg2[%57, %c0_34, %c0_35] : memref<8x2x32xbf16, #tpu.memory_space<vmem>>, vector<1x2x32xbf16>
    %59 = vector.shape_cast %58 : vector<1x2x32xbf16> to vector<2x32xbf16>
    %cst_36 = arith.constant dense<0.000000e+00> : vector<2x128xf32>
    %60 = tpu.matmul %59, %1, %cst_36 {dimension_numbers = #tpu.dot_dimension_numbers<[1], [0], [0], [1], [0, 0, 1, 1], [], []>} : vector<2x32xbf16>, vector<32x128xbf16>, vector<2x128xf32> -> vector<2x128xf32>
    %61 = vector.broadcast %4 : vector<1x128xf32> to vector<2x128xf32>
    %62 = arith.addf %60, %61 : vector<2x128xf32>
    %63 = arith.index_cast %c3_i32 : i32 to index
    %c0_37 = arith.constant 0 : index
    %c0_38 = arith.constant 0 : index
    %64 = vector.load %arg14[%63, %c0_37, %c0_38] : memref<8x2x128xf32, #tpu.memory_space<vmem>>, vector<1x2x128xf32>
    %65 = vector.shape_cast %64 : vector<1x2x128xf32> to vector<2x128xf32>
    %66 = vector.shape_cast %62 : vector<2x128xf32> to vector<1x2x128xf32>
    tpu.vector_store %arg14[%63, %c0_37, %c0_38], %66 {strides = array<i32>} : memref<8x2x128xf32, #tpu.memory_space<vmem>>, vector<1x2x128xf32>,
    %cst_39 = arith.constant dense<0.000000e+00> : vector<2x128xf32>
    %67 = tpu.matmul %59, %2, %cst_39 {dimension_numbers = #tpu.dot_dimension_numbers<[1], [0], [0], [1], [0, 0, 1, 1], [], []>} : vector<2x32xbf16>, vector<32x128xbf16>, vector<2x128xf32> -> vector<2x128xf32>
    %68 = vector.broadcast %5 : vector<1x128xf32> to vector<2x128xf32>
    %69 = arith.addf %67, %68 : vector<2x128xf32>
    %70 = arith.index_cast %c3_i32 : i32 to index
    %c0_40 = arith.constant 0 : index
    %c0_41 = arith.constant 0 : index
    %71 = vector.load %arg15[%70, %c0_40, %c0_41] : memref<8x2x128xf32, #tpu.memory_space<vmem>>, vector<1x2x128xf32>
    %72 = vector.shape_cast %71 : vector<1x2x128xf32> to vector<2x128xf32>
    %73 = vector.shape_cast %69 : vector<2x128xf32> to vector<1x2x128xf32>
    tpu.vector_store %arg15[%70, %c0_40, %c0_41], %73 {strides = array<i32>} : memref<8x2x128xf32, #tpu.memory_space<vmem>>, vector<1x2x128xf32>,
    %c4_i32 = arith.constant 4 : i32
    %74 = arith.index_cast %c4_i32 : i32 to index
    %c0_42 = arith.constant 0 : index
    %c0_43 = arith.constant 0 : index
    %75 = vector.load %arg2[%74, %c0_42, %c0_43] : memref<8x2x32xbf16, #tpu.memory_space<vmem>>, vector<1x2x32xbf16>
    %76 = vector.shape_cast %75 : vector<1x2x32xbf16> to vector<2x32xbf16>
    %cst_44 = arith.constant dense<0.000000e+00> : vector<2x128xf32>
    %77 = tpu.matmul %76, %1, %cst_44 {dimension_numbers = #tpu.dot_dimension_numbers<[1], [0], [0], [1], [0, 0, 1, 1], [], []>} : vector<2x32xbf16>, vector<32x128xbf16>, vector<2x128xf32> -> vector<2x128xf32>
    %78 = vector.broadcast %4 : vector<1x128xf32> to vector<2x128xf32>
    %79 = arith.addf %77, %78 : vector<2x128xf32>
    %80 = arith.index_cast %c4_i32 : i32 to index
    %c0_45 = arith.constant 0 : index
    %c0_46 = arith.constant 0 : index
    %81 = vector.load %arg14[%80, %c0_45, %c0_46] : memref<8x2x128xf32, #tpu.memory_space<vmem>>, vector<1x2x128xf32>
    %82 = vector.shape_cast %81 : vector<1x2x128xf32> to vector<2x128xf32>
    %83 = vector.shape_cast %79 : vector<2x128xf32> to vector<1x2x128xf32>
    tpu.vector_store %arg14[%80, %c0_45, %c0_46], %83 {strides = array<i32>} : memref<8x2x128xf32, #tpu.memory_space<vmem>>, vector<1x2x128xf32>,
    %cst_47 = arith.constant dense<0.000000e+00> : vector<2x128xf32>
    %84 = tpu.matmul %76, %2, %cst_47 {dimension_numbers = #tpu.dot_dimension_numbers<[1], [0], [0], [1], [0, 0, 1, 1], [], []>} : vector<2x32xbf16>, vector<32x128xbf16>, vector<2x128xf32> -> vector<2x128xf32>
    %85 = vector.broadcast %5 : vector<1x128xf32> to vector<2x128xf32>
    %86 = arith.addf %84, %85 : vector<2x128xf32>
    %87 = arith.index_cast %c4_i32 : i32 to index
    %c0_48 = arith.constant 0 : index
    %c0_49 = arith.constant 0 : index
    %88 = vector.load %arg15[%87, %c0_48, %c0_49] : memref<8x2x128xf32, #tpu.memory_space<vmem>>, vector<1x2x128xf32>
    %89 = vector.shape_cast %88 : vector<1x2x128xf32> to vector<2x128xf32>
    %90 = vector.shape_cast %86 : vector<2x128xf32> to vector<1x2x128xf32>
    tpu.vector_store %arg15[%87, %c0_48, %c0_49], %90 {strides = array<i32>} : memref<8x2x128xf32, #tpu.memory_space<vmem>>, vector<1x2x128xf32>,
    %c5_i32 = arith.constant 5 : i32
    %91 = arith.index_cast %c5_i32 : i32 to index
    %c0_50 = arith.constant 0 : index
    %c0_51 = arith.constant 0 : index
    %92 = vector.load %arg2[%91, %c0_50, %c0_51] : memref<8x2x32xbf16, #tpu.memory_space<vmem>>, vector<1x2x32xbf16>
    %93 = vector.shape_cast %92 : vector<1x2x32xbf16> to vector<2x32xbf16>
    %cst_52 = arith.constant dense<0.000000e+00> : vector<2x128xf32>
    %94 = tpu.matmul %93, %1, %cst_52 {dimension_numbers = #tpu.dot_dimension_numbers<[1], [0], [0], [1], [0, 0, 1, 1], [], []>} : vector<2x32xbf16>, vector<32x128xbf16>, vector<2x128xf32> -> vector<2x128xf32>
    %95 = vector.broadcast %4 : vector<1x128xf32> to vector<2x128xf32>
    %96 = arith.addf %94, %95 : vector<2x128xf32>
    %97 = arith.index_cast %c5_i32 : i32 to index
    %c0_53 = arith.constant 0 : index
    %c0_54 = arith.constant 0 : index
    %98 = vector.load %arg14[%97, %c0_53, %c0_54] : memref<8x2x128xf32, #tpu.memory_space<vmem>>, vector<1x2x128xf32>
    %99 = vector.shape_cast %98 : vector<1x2x128xf32> to vector<2x128xf32>
    %100 = vector.shape_cast %96 : vector<2x128xf32> to vector<1x2x128xf32>
    tpu.vector_store %arg14[%97, %c0_53, %c0_54], %100 {strides = array<i32>} : memref<8x2x128xf32, #tpu.memory_space<vmem>>, vector<1x2x128xf32>,
    %cst_55 = arith.constant dense<0.000000e+00> : vector<2x128xf32>
    %101 = tpu.matmul %93, %2, %cst_55 {dimension_numbers = #tpu.dot_dimension_numbers<[1], [0], [0], [1], [0, 0, 1, 1], [], []>} : vector<2x32xbf16>, vector<32x128xbf16>, vector<2x128xf32> -> vector<2x128xf32>
    %102 = vector.broadcast %5 : vector<1x128xf32> to vector<2x128xf32>
    %103 = arith.addf %101, %102 : vector<2x128xf32>
    %104 = arith.index_cast %c5_i32 : i32 to index
    %c0_56 = arith.constant 0 : index
    %c0_57 = arith.constant 0 : index
    %105 = vector.load %arg15[%104, %c0_56, %c0_57] : memref<8x2x128xf32, #tpu.memory_space<vmem>>, vector<1x2x128xf32>
    %106 = vector.shape_cast %105 : vector<1x2x128xf32> to vector<2x128xf32>
    %107 = vector.shape_cast %103 : vector<2x128xf32> to vector<1x2x128xf32>
    tpu.vector_store %arg15[%104, %c0_56, %c0_57], %107 {strides = array<i32>} : memref<8x2x128xf32, #tpu.memory_space<vmem>>, vector<1x2x128xf32>,
    %c6_i32 = arith.constant 6 : i32
    %108 = arith.index_cast %c6_i32 : i32 to index
    %c0_58 = arith.constant 0 : index
    %c0_59 = arith.constant 0 : index
    %109 = vector.load %arg2[%108, %c0_58, %c0_59] : memref<8x2x32xbf16, #tpu.memory_space<vmem>>, vector<1x2x32xbf16>
    %110 = vector.shape_cast %109 : vector<1x2x32xbf16> to vector<2x32xbf16>
    %cst_60 = arith.constant dense<0.000000e+00> : vector<2x128xf32>
    %111 = tpu.matmul %110, %1, %cst_60 {dimension_numbers = #tpu.dot_dimension_numbers<[1], [0], [0], [1], [0, 0, 1, 1], [], []>} : vector<2x32xbf16>, vector<32x128xbf16>, vector<2x128xf32> -> vector<2x128xf32>
    %112 = vector.broadcast %4 : vector<1x128xf32> to vector<2x128xf32>
    %113 = arith.addf %111, %112 : vector<2x128xf32>
    %114 = arith.index_cast %c6_i32 : i32 to index
    %c0_61 = arith.constant 0 : index
    %c0_62 = arith.constant 0 : index
    %115 = vector.load %arg14[%114, %c0_61, %c0_62] : memref<8x2x128xf32, #tpu.memory_space<vmem>>, vector<1x2x128xf32>
    %116 = vector.shape_cast %115 : vector<1x2x128xf32> to vector<2x128xf32>
    %117 = vector.shape_cast %113 : vector<2x128xf32> to vector<1x2x128xf32>
    tpu.vector_store %arg14[%114, %c0_61, %c0_62], %117 {strides = array<i32>} : memref<8x2x128xf32, #tpu.memory_space<vmem>>, vector<1x2x128xf32>,
    %cst_63 = arith.constant dense<0.000000e+00> : vector<2x128xf32>
    %118 = tpu.matmul %110, %2, %cst_63 {dimension_numbers = #tpu.dot_dimension_numbers<[1], [0], [0], [1], [0, 0, 1, 1], [], []>} : vector<2x32xbf16>, vector<32x128xbf16>, vector<2x128xf32> -> vector<2x128xf32>
    %119 = vector.broadcast %5 : vector<1x128xf32> to vector<2x128xf32>
    %120 = arith.addf %118, %119 : vector<2x128xf32>
    %121 = arith.index_cast %c6_i32 : i32 to index
    %c0_64 = arith.constant 0 : index
    %c0_65 = arith.constant 0 : index
    %122 = vector.load %arg15[%121, %c0_64, %c0_65] : memref<8x2x128xf32, #tpu.memory_space<vmem>>, vector<1x2x128xf32>
    %123 = vector.shape_cast %122 : vector<1x2x128xf32> to vector<2x128xf32>
    %124 = vector.shape_cast %120 : vector<2x128xf32> to vector<1x2x128xf32>
    tpu.vector_store %arg15[%121, %c0_64, %c0_65], %124 {strides = array<i32>} : memref<8x2x128xf32, #tpu.memory_space<vmem>>, vector<1x2x128xf32>,
    %c7_i32 = arith.constant 7 : i32
    %125 = arith.index_cast %c7_i32 : i32 to index
    %c0_66 = arith.constant 0 : index
    %c0_67 = arith.constant 0 : index
    %126 = vector.load %arg2[%125, %c0_66, %c0_67] : memref<8x2x32xbf16, #tpu.memory_space<vmem>>, vector<1x2x32xbf16>
    %127 = vector.shape_cast %126 : vector<1x2x32xbf16> to vector<2x32xbf16>
    %cst_68 = arith.constant dense<0.000000e+00> : vector<2x128xf32>
    %128 = tpu.matmul %127, %1, %cst_68 {dimension_numbers = #tpu.dot_dimension_numbers<[1], [0], [0], [1], [0, 0, 1, 1], [], []>} : vector<2x32xbf16>, vector<32x128xbf16>, vector<2x128xf32> -> vector<2x128xf32>
    %129 = vector.broadcast %4 : vector<1x128xf32> to vector<2x128xf32>
    %130 = arith.addf %128, %129 : vector<2x128xf32>
    %131 = arith.index_cast %c7_i32 : i32 to index
    %c0_69 = arith.constant 0 : index
    %c0_70 = arith.constant 0 : index
    %132 = vector.load %arg14[%131, %c0_69, %c0_70] : memref<8x2x128xf32, #tpu.memory_space<vmem>>, vector<1x2x128xf32>
    %133 = vector.shape_cast %132 : vector<1x2x128xf32> to vector<2x128xf32>
    %134 = vector.shape_cast %130 : vector<2x128xf32> to vector<1x2x128xf32>
    tpu.vector_store %arg14[%131, %c0_69, %c0_70], %134 {strides = array<i32>} : memref<8x2x128xf32, #tpu.memory_space<vmem>>, vector<1x2x128xf32>,
    %cst_71 = arith.constant dense<0.000000e+00> : vector<2x128xf32>
    %135 = tpu.matmul %127, %2, %cst_71 {dimension_numbers = #tpu.dot_dimension_numbers<[1], [0], [0], [1], [0, 0, 1, 1], [], []>} : vector<2x32xbf16>, vector<32x128xbf16>, vector<2x128xf32> -> vector<2x128xf32>
    %136 = vector.broadcast %5 : vector<1x128xf32> to vector<2x128xf32>
    %137 = arith.addf %135, %136 : vector<2x128xf32>
    %138 = arith.index_cast %c7_i32 : i32 to index
    %c0_72 = arith.constant 0 : index
    %c0_73 = arith.constant 0 : index
    %139 = vector.load %arg15[%138, %c0_72, %c0_73] : memref<8x2x128xf32, #tpu.memory_space<vmem>>, vector<1x2x128xf32>
    %140 = vector.shape_cast %139 : vector<1x2x128xf32> to vector<2x128xf32>
    %141 = vector.shape_cast %137 : vector<2x128xf32> to vector<1x2x128xf32>
    tpu.vector_store %arg15[%138, %c0_72, %c0_73], %141 {strides = array<i32>} : memref<8x2x128xf32, #tpu.memory_space<vmem>>, vector<1x2x128xf32>,
    %c8_i32 = arith.constant 8 : i32
    %cst_74 = arith.constant 0.000000e+00 : f32
    %142 = vector.broadcast %cst_74 : f32 to vector<2x32xf32>
    %c0_i32_75 = arith.constant 0 : i32
    %c7_i32_76 = arith.constant 7 : i32
    %143 = arith.subi %c7_i32_76, %c0_i32_75 : i32
    %144 = tpu.concatenate %142, %142 in 1 : vector<2x32xf32>, vector<2x32xf32> -> vector<2x64xf32>
    %145 = arith.truncf %144 : vector<2x64xf32> to vector<2x64xbf16>
    %cst_77 = arith.constant dense<0.000000e+00> : vector<2x256xf32>
    %146 = tpu.matmul %145, %3, %cst_77 {dimension_numbers = #tpu.dot_dimension_numbers<[1], [0], [0], [1], [0, 0, 1, 1], [], []>} : vector<2x64xbf16>, vector<64x256xbf16>, vector<2x256xf32> -> vector<2x256xf32>
    %147 = arith.index_cast %c0_i32_75 : i32 to index
    %c0_78 = arith.constant 0 : index
    %c0_79 = arith.constant 0 : index
    %148 = vector.load %arg14[%147, %c0_78, %c0_79] : memref<8x2x128xf32, #tpu.memory_space<vmem>>, vector<1x2x128xf32>
    %149 = vector.shape_cast %148 : vector<1x2x128xf32> to vector<2x128xf32>
    %150 = vector.extract_strided_slice %146 {offsets = [0, 0], sizes = [2, 128], strides = [1, 1]} : vector<2x256xf32> to vector<2x128xf32>
    %151 = arith.addf %149, %150 : vector<2x128xf32>
    %152 = vector.extract_strided_slice %151 {offsets = [0, 0], sizes = [2, 96], strides = [1, 1]} : vector<2x128xf32> to vector<2x96xf32>
    %153 = arith.negf %152 : vector<2x96xf32>
    %154 = math.exp %153 : vector<2x96xf32>
    %cst_80 = arith.constant 1.000000e+00 : f32
    %155 = vector.broadcast %cst_80 : f32 to vector<2x96xf32>
    %156 = arith.addf %155, %154 : vector<2x96xf32>
    %157 = arith.divf %155, %156 : vector<2x96xf32>
    %158 = vector.extract_strided_slice %157 {offsets = [0, 0], sizes = [2, 32], strides = [1, 1]} : vector<2x96xf32> to vector<2x32xf32>
    %159 = vector.extract_strided_slice %157 {offsets = [0, 32], sizes = [2, 32], strides = [1, 1]} : vector<2x96xf32> to vector<2x32xf32>
    %160 = vector.extract_strided_slice %157 {offsets = [0, 64], sizes = [2, 32], strides = [1, 1]} : vector<2x96xf32> to vector<2x32xf32>
    %161 = vector.extract_strided_slice %151 {offsets = [0, 96], sizes = [2, 32], strides = [1, 1]} : vector<2x128xf32> to vector<2x32xf32>
    %162 = math.tanh %161 : vector<2x32xf32>
    %163 = arith.index_cast %143 : i32 to index
    %c0_81 = arith.constant 0 : index
    %c0_82 = arith.constant 0 : index
    %164 = vector.load %arg15[%163, %c0_81, %c0_82] : memref<8x2x128xf32, #tpu.memory_space<vmem>>, vector<1x2x128xf32>
    %165 = vector.shape_cast %164 : vector<1x2x128xf32> to vector<2x128xf32>
    %166 = vector.extract_strided_slice %146 {offsets = [0, 128], sizes = [2, 128], strides = [1, 1]} : vector<2x256xf32> to vector<2x128xf32>
    %167 = arith.addf %165, %166 : vector<2x128xf32>
    %168 = vector.extract_strided_slice %167 {offsets = [0, 0], sizes = [2, 96], strides = [1, 1]} : vector<2x128xf32> to vector<2x96xf32>
    %169 = arith.negf %168 : vector<2x96xf32>
    %170 = math.exp %169 : vector<2x96xf32>
    %cst_83 = arith.constant 1.000000e+00 : f32
    %171 = vector.broadcast %cst_83 : f32 to vector<2x96xf32>
    %172 = arith.addf %171, %170 : vector<2x96xf32>
    %173 = arith.divf %171, %172 : vector<2x96xf32>
    %174 = vector.extract_strided_slice %173 {offsets = [0, 0], sizes = [2, 32], strides = [1, 1]} : vector<2x96xf32> to vector<2x32xf32>
    %175 = vector.extract_strided_slice %173 {offsets = [0, 32], sizes = [2, 32], strides = [1, 1]} : vector<2x96xf32> to vector<2x32xf32>
    %176 = vector.extract_strided_slice %173 {offsets = [0, 64], sizes = [2, 32], strides = [1, 1]} : vector<2x96xf32> to vector<2x32xf32>
    %177 = vector.extract_strided_slice %167 {offsets = [0, 96], sizes = [2, 32], strides = [1, 1]} : vector<2x128xf32> to vector<2x32xf32>
    %178 = math.tanh %177 : vector<2x32xf32>
    %179 = arith.mulf %159, %142 : vector<2x32xf32>
    %180 = arith.mulf %158, %162 : vector<2x32xf32>
    %181 = arith.addf %179, %180 : vector<2x32xf32>
    %182 = math.tanh %181 : vector<2x32xf32>
    %183 = arith.mulf %160, %182 : vector<2x32xf32>
    %184 = arith.mulf %175, %142 : vector<2x32xf32>
    %185 = arith.mulf %174, %178 : vector<2x32xf32>
    %186 = arith.addf %184, %185 : vector<2x32xf32>
    %187 = math.tanh %186 : vector<2x32xf32>
    %188 = arith.mulf %176, %187 : vector<2x32xf32>
    %189 = arith.index_cast %c0_i32_75 : i32 to index
    %c0_84 = arith.constant 0 : index
    %c0_85 = arith.constant 0 : index
    %190 = vector.load %arg11[%189, %c0_84, %c0_85] : memref<8x2x64xf32, #tpu.memory_space<vmem>>, vector<1x2x32xf32>
    %191 = vector.shape_cast %190 : vector<1x2x32xf32> to vector<2x32xf32>
    %192 = vector.shape_cast %183 : vector<2x32xf32> to vector<1x2x32xf32>
    tpu.vector_store %arg11[%189, %c0_84, %c0_85], %192 {strides = array<i32>} : memref<8x2x64xf32, #tpu.memory_space<vmem>>, vector<1x2x32xf32>,
    %193 = arith.index_cast %143 : i32 to index
    %c0_86 = arith.constant 0 : index
    %c32 = arith.constant 32 : index
    %194 = vector.load %arg11[%193, %c0_86, %c32] : memref<8x2x64xf32, #tpu.memory_space<vmem>>, vector<1x2x32xf32>
    %195 = vector.shape_cast %194 : vector<1x2x32xf32> to vector<2x32xf32>
    %196 = vector.shape_cast %188 : vector<2x32xf32> to vector<1x2x32xf32>
    tpu.vector_store %arg11[%193, %c0_86, %c32], %196 {strides = array<i32>} : memref<8x2x64xf32, #tpu.memory_space<vmem>>, vector<1x2x32xf32>,
    %197 = vector.broadcast %c0_i32_75 : i32 to vector<2x1xi32>
    %198 = arith.cmpi eq, %0, %197 : vector<2x1xi32>
    %199 = vector.shape_cast %198 : vector<2x1xi1> to vector<2x1xi1>
    %200 = vector.broadcast %199 : vector<2x1xi1> to vector<2x32xi1>
    %201 = arith.select %200, %183, %142 : vector<2x32xi1>, vector<2x32xf32>
    %c1_i32_87 = arith.constant 1 : i32
    %c7_i32_88 = arith.constant 7 : i32
    %202 = arith.subi %c7_i32_88, %c1_i32_87 : i32
    %203 = tpu.concatenate %183, %188 in 1 : vector<2x32xf32>, vector<2x32xf32> -> vector<2x64xf32>
    %204 = arith.truncf %203 : vector<2x64xf32> to vector<2x64xbf16>
    %cst_89 = arith.constant dense<0.000000e+00> : vector<2x256xf32>
    %205 = tpu.matmul %204, %3, %cst_89 {dimension_numbers = #tpu.dot_dimension_numbers<[1], [0], [0], [1], [0, 0, 1, 1], [], []>} : vector<2x64xbf16>, vector<64x256xbf16>, vector<2x256xf32> -> vector<2x256xf32>
    %206 = arith.index_cast %c1_i32_87 : i32 to index
    %c0_90 = arith.constant 0 : index
    %c0_91 = arith.constant 0 : index
    %207 = vector.load %arg14[%206, %c0_90, %c0_91] : memref<8x2x128xf32, #tpu.memory_space<vmem>>, vector<1x2x128xf32>
    %208 = vector.shape_cast %207 : vector<1x2x128xf32> to vector<2x128xf32>
    %209 = vector.extract_strided_slice %205 {offsets = [0, 0], sizes = [2, 128], strides = [1, 1]} : vector<2x256xf32> to vector<2x128xf32>
    %210 = arith.addf %208, %209 : vector<2x128xf32>
    %211 = vector.extract_strided_slice %210 {offsets = [0, 0], sizes = [2, 96], strides = [1, 1]} : vector<2x128xf32> to vector<2x96xf32>
    %212 = arith.negf %211 : vector<2x96xf32>
    %213 = math.exp %212 : vector<2x96xf32>
    %cst_92 = arith.constant 1.000000e+00 : f32
    %214 = vector.broadcast %cst_92 : f32 to vector<2x96xf32>
    %215 = arith.addf %214, %213 : vector<2x96xf32>
    %216 = arith.divf %214, %215 : vector<2x96xf32>
    %217 = vector.extract_strided_slice %216 {offsets = [0, 0], sizes = [2, 32], strides = [1, 1]} : vector<2x96xf32> to vector<2x32xf32>
    %218 = vector.extract_strided_slice %216 {offsets = [0, 32], sizes = [2, 32], strides = [1, 1]} : vector<2x96xf32> to vector<2x32xf32>
    %219 = vector.extract_strided_slice %216 {offsets = [0, 64], sizes = [2, 32], strides = [1, 1]} : vector<2x96xf32> to vector<2x32xf32>
    %220 = vector.extract_strided_slice %210 {offsets = [0, 96], sizes = [2, 32], strides = [1, 1]} : vector<2x128xf32> to vector<2x32xf32>
    %221 = math.tanh %220 : vector<2x32xf32>
    %222 = arith.index_cast %202 : i32 to index
    %c0_93 = arith.constant 0 : index
    %c0_94 = arith.constant 0 : index
    %223 = vector.load %arg15[%222, %c0_93, %c0_94] : memref<8x2x128xf32, #tpu.memory_space<vmem>>, vector<1x2x128xf32>
    %224 = vector.shape_cast %223 : vector<1x2x128xf32> to vector<2x128xf32>
    %225 = vector.extract_strided_slice %205 {offsets = [0, 128], sizes = [2, 128], strides = [1, 1]} : vector<2x256xf32> to vector<2x128xf32>
    %226 = arith.addf %224, %225 : vector<2x128xf32>
    %227 = vector.extract_strided_slice %226 {offsets = [0, 0], sizes = [2, 96], strides = [1, 1]} : vector<2x128xf32> to vector<2x96xf32>
    %228 = arith.negf %227 : vector<2x96xf32>
    %229 = math.exp %228 : vector<2x96xf32>
    %cst_95 = arith.constant 1.000000e+00 : f32
    %230 = vector.broadcast %cst_95 : f32 to vector<2x96xf32>
    %231 = arith.addf %230, %229 : vector<2x96xf32>
    %232 = arith.divf %230, %231 : vector<2x96xf32>
    %233 = vector.extract_strided_slice %232 {offsets = [0, 0], sizes = [2, 32], strides = [1, 1]} : vector<2x96xf32> to vector<2x32xf32>
    %234 = vector.extract_strided_slice %232 {offsets = [0, 32], sizes = [2, 32], strides = [1, 1]} : vector<2x96xf32> to vector<2x32xf32>
    %235 = vector.extract_strided_slice %232 {offsets = [0, 64], sizes = [2, 32], strides = [1, 1]} : vector<2x96xf32> to vector<2x32xf32>
    %236 = vector.extract_strided_slice %226 {offsets = [0, 96], sizes = [2, 32], strides = [1, 1]} : vector<2x128xf32> to vector<2x32xf32>
    %237 = math.tanh %236 : vector<2x32xf32>
    %238 = arith.mulf %218, %181 : vector<2x32xf32>
    %239 = arith.mulf %217, %221 : vector<2x32xf32>
    %240 = arith.addf %238, %239 : vector<2x32xf32>
    %241 = math.tanh %240 : vector<2x32xf32>
    %242 = arith.mulf %219, %241 : vector<2x32xf32>
    %243 = arith.mulf %234, %186 : vector<2x32xf32>
    %244 = arith.mulf %233, %237 : vector<2x32xf32>
    %245 = arith.addf %243, %244 : vector<2x32xf32>
    %246 = math.tanh %245 : vector<2x32xf32>
    %247 = arith.mulf %235, %246 : vector<2x32xf32>
    %248 = arith.index_cast %c1_i32_87 : i32 to index
    %c0_96 = arith.constant 0 : index
    %c0_97 = arith.constant 0 : index
    %249 = vector.load %arg11[%248, %c0_96, %c0_97] : memref<8x2x64xf32, #tpu.memory_space<vmem>>, vector<1x2x32xf32>
    %250 = vector.shape_cast %249 : vector<1x2x32xf32> to vector<2x32xf32>
    %251 = vector.shape_cast %242 : vector<2x32xf32> to vector<1x2x32xf32>
    tpu.vector_store %arg11[%248, %c0_96, %c0_97], %251 {strides = array<i32>} : memref<8x2x64xf32, #tpu.memory_space<vmem>>, vector<1x2x32xf32>,
    %252 = arith.index_cast %202 : i32 to index
    %c0_98 = arith.constant 0 : index
    %c32_99 = arith.constant 32 : index
    %253 = vector.load %arg11[%252, %c0_98, %c32_99] : memref<8x2x64xf32, #tpu.memory_space<vmem>>, vector<1x2x32xf32>
    %254 = vector.shape_cast %253 : vector<1x2x32xf32> to vector<2x32xf32>
    %255 = vector.shape_cast %247 : vector<2x32xf32> to vector<1x2x32xf32>
    tpu.vector_store %arg11[%252, %c0_98, %c32_99], %255 {strides = array<i32>} : memref<8x2x64xf32, #tpu.memory_space<vmem>>, vector<1x2x32xf32>,
    %256 = vector.broadcast %c1_i32_87 : i32 to vector<2x1xi32>
    %257 = arith.cmpi eq, %0, %256 : vector<2x1xi32>
    %258 = vector.shape_cast %257 : vector<2x1xi1> to vector<2x1xi1>
    %259 = vector.broadcast %258 : vector<2x1xi1> to vector<2x32xi1>
    %260 = arith.select %259, %242, %201 : vector<2x32xi1>, vector<2x32xf32>
    %c2_i32_100 = arith.constant 2 : i32
    %c7_i32_101 = arith.constant 7 : i32
    %261 = arith.subi %c7_i32_101, %c2_i32_100 : i32
    %262 = tpu.concatenate %242, %247 in 1 : vector<2x32xf32>, vector<2x32xf32> -> vector<2x64xf32>
    %263 = arith.truncf %262 : vector<2x64xf32> to vector<2x64xbf16>
    %cst_102 = arith.constant dense<0.000000e+00> : vector<2x256xf32>
    %264 = tpu.matmul %263, %3, %cst_102 {dimension_numbers = #tpu.dot_dimension_numbers<[1], [0], [0], [1], [0, 0, 1, 1], [], []>} : vector<2x64xbf16>, vector<64x256xbf16>, vector<2x256xf32> -> vector<2x256xf32>
    %265 = arith.index_cast %c2_i32_100 : i32 to index
    %c0_103 = arith.constant 0 : index
    %c0_104 = arith.constant 0 : index
    %266 = vector.load %arg14[%265, %c0_103, %c0_104] : memref<8x2x128xf32, #tpu.memory_space<vmem>>, vector<1x2x128xf32>
    %267 = vector.shape_cast %266 : vector<1x2x128xf32> to vector<2x128xf32>
    %268 = vector.extract_strided_slice %264 {offsets = [0, 0], sizes = [2, 128], strides = [1, 1]} : vector<2x256xf32> to vector<2x128xf32>
    %269 = arith.addf %267, %268 : vector<2x128xf32>
    %270 = vector.extract_strided_slice %269 {offsets = [0, 0], sizes = [2, 96], strides = [1, 1]} : vector<2x128xf32> to vector<2x96xf32>
    %271 = arith.negf %270 : vector<2x96xf32>
    %272 = math.exp %271 : vector<2x96xf32>
    %cst_105 = arith.constant 1.000000e+00 : f32
    %273 = vector.broadcast %cst_105 : f32 to vector<2x96xf32>
    %274 = arith.addf %273, %272 : vector<2x96xf32>
    %275 = arith.divf %273, %274 : vector<2x96xf32>
    %276 = vector.extract_strided_slice %275 {offsets = [0, 0], sizes = [2, 32], strides = [1, 1]} : vector<2x96xf32> to vector<2x32xf32>
    %277 = vector.extract_strided_slice %275 {offsets = [0, 32], sizes = [2, 32], strides = [1, 1]} : vector<2x96xf32> to vector<2x32xf32>
    %278 = vector.extract_strided_slice %275 {offsets = [0, 64], sizes = [2, 32], strides = [1, 1]} : vector<2x96xf32> to vector<2x32xf32>
    %279 = vector.extract_strided_slice %269 {offsets = [0, 96], sizes = [2, 32], strides = [1, 1]} : vector<2x128xf32> to vector<2x32xf32>
    %280 = math.tanh %279 : vector<2x32xf32>
    %281 = arith.index_cast %261 : i32 to index
    %c0_106 = arith.constant 0 : index
    %c0_107 = arith.constant 0 : index
    %282 = vector.load %arg15[%281, %c0_106, %c0_107] : memref<8x2x128xf32, #tpu.memory_space<vmem>>, vector<1x2x128xf32>
    %283 = vector.shape_cast %282 : vector<1x2x128xf32> to vector<2x128xf32>
    %284 = vector.extract_strided_slice %264 {offsets = [0, 128], sizes = [2, 128], strides = [1, 1]} : vector<2x256xf32> to vector<2x128xf32>
    %285 = arith.addf %283, %284 : vector<2x128xf32>
    %286 = vector.extract_strided_slice %285 {offsets = [0, 0], sizes = [2, 96], strides = [1, 1]} : vector<2x128xf32> to vector<2x96xf32>
    %287 = arith.negf %286 : vector<2x96xf32>
    %288 = math.exp %287 : vector<2x96xf32>
    %cst_108 = arith.constant 1.000000e+00 : f32
    %289 = vector.broadcast %cst_108 : f32 to vector<2x96xf32>
    %290 = arith.addf %289, %288 : vector<2x96xf32>
    %291 = arith.divf %289, %290 : vector<2x96xf32>
    %292 = vector.extract_strided_slice %291 {offsets = [0, 0], sizes = [2, 32], strides = [1, 1]} : vector<2x96xf32> to vector<2x32xf32>
    %293 = vector.extract_strided_slice %291 {offsets = [0, 32], sizes = [2, 32], strides = [1, 1]} : vector<2x96xf32> to vector<2x32xf32>
    %294 = vector.extract_strided_slice %291 {offsets = [0, 64], sizes = [2, 32], strides = [1, 1]} : vector<2x96xf32> to vector<2x32xf32>
    %295 = vector.extract_strided_slice %285 {offsets = [0, 96], sizes = [2, 32], strides = [1, 1]} : vector<2x128xf32> to vector<2x32xf32>
    %296 = math.tanh %295 : vector<2x32xf32>
    %297 = arith.mulf %277, %240 : vector<2x32xf32>
    %298 = arith.mulf %276, %280 : vector<2x32xf32>
    %299 = arith.addf %297, %298 : vector<2x32xf32>
    %300 = math.tanh %299 : vector<2x32xf32>
    %301 = arith.mulf %278, %300 : vector<2x32xf32>
    %302 = arith.mulf %293, %245 : vector<2x32xf32>
    %303 = arith.mulf %292, %296 : vector<2x32xf32>
    %304 = arith.addf %302, %303 : vector<2x32xf32>
    %305 = math.tanh %304 : vector<2x32xf32>
    %306 = arith.mulf %294, %305 : vector<2x32xf32>
    %307 = arith.index_cast %c2_i32_100 : i32 to index
    %c0_109 = arith.constant 0 : index
    %c0_110 = arith.constant 0 : index
    %308 = vector.load %arg11[%307, %c0_109, %c0_110] : memref<8x2x64xf32, #tpu.memory_space<vmem>>, vector<1x2x32xf32>
    %309 = vector.shape_cast %308 : vector<1x2x32xf32> to vector<2x32xf32>
    %310 = vector.shape_cast %301 : vector<2x32xf32> to vector<1x2x32xf32>
    tpu.vector_store %arg11[%307, %c0_109, %c0_110], %310 {strides = array<i32>} : memref<8x2x64xf32, #tpu.memory_space<vmem>>, vector<1x2x32xf32>,
    %311 = arith.index_cast %261 : i32 to index
    %c0_111 = arith.constant 0 : index
    %c32_112 = arith.constant 32 : index
    %312 = vector.load %arg11[%311, %c0_111, %c32_112] : memref<8x2x64xf32, #tpu.memory_space<vmem>>, vector<1x2x32xf32>
    %313 = vector.shape_cast %312 : vector<1x2x32xf32> to vector<2x32xf32>
    %314 = vector.shape_cast %306 : vector<2x32xf32> to vector<1x2x32xf32>
    tpu.vector_store %arg11[%311, %c0_111, %c32_112], %314 {strides = array<i32>} : memref<8x2x64xf32, #tpu.memory_space<vmem>>, vector<1x2x32xf32>,
    %315 = vector.broadcast %c2_i32_100 : i32 to vector<2x1xi32>
    %316 = arith.cmpi eq, %0, %315 : vector<2x1xi32>
    %317 = vector.shape_cast %316 : vector<2x1xi1> to vector<2x1xi1>
    %318 = vector.broadcast %317 : vector<2x1xi1> to vector<2x32xi1>
    %319 = arith.select %318, %301, %260 : vector<2x32xi1>, vector<2x32xf32>
    %c3_i32_113 = arith.constant 3 : i32
    %c7_i32_114 = arith.constant 7 : i32
    %320 = arith.subi %c7_i32_114, %c3_i32_113 : i32
    %321 = tpu.concatenate %301, %306 in 1 : vector<2x32xf32>, vector<2x32xf32> -> vector<2x64xf32>
    %322 = arith.truncf %321 : vector<2x64xf32> to vector<2x64xbf16>
    %cst_115 = arith.constant dense<0.000000e+00> : vector<2x256xf32>
    %323 = tpu.matmul %322, %3, %cst_115 {dimension_numbers = #tpu.dot_dimension_numbers<[1], [0], [0], [1], [0, 0, 1, 1], [], []>} : vector<2x64xbf16>, vector<64x256xbf16>, vector<2x256xf32> -> vector<2x256xf32>
    %324 = arith.index_cast %c3_i32_113 : i32 to index
    %c0_116 = arith.constant 0 : index
    %c0_117 = arith.constant 0 : index
    %325 = vector.load %arg14[%324, %c0_116, %c0_117] : memref<8x2x128xf32, #tpu.memory_space<vmem>>, vector<1x2x128xf32>
    %326 = vector.shape_cast %325 : vector<1x2x128xf32> to vector<2x128xf32>
    %327 = vector.extract_strided_slice %323 {offsets = [0, 0], sizes = [2, 128], strides = [1, 1]} : vector<2x256xf32> to vector<2x128xf32>
    %328 = arith.addf %326, %327 : vector<2x128xf32>
    %329 = vector.extract_strided_slice %328 {offsets = [0, 0], sizes = [2, 96], strides = [1, 1]} : vector<2x128xf32> to vector<2x96xf32>
    %330 = arith.negf %329 : vector<2x96xf32>
    %331 = math.exp %330 : vector<2x96xf32>
    %cst_118 = arith.constant 1.000000e+00 : f32
    %332 = vector.broadcast %cst_118 : f32 to vector<2x96xf32>
    %333 = arith.addf %332, %331 : vector<2x96xf32>
    %334 = arith.divf %332, %333 : vector<2x96xf32>
    %335 = vector.extract_strided_slice %334 {offsets = [0, 0], sizes = [2, 32], strides = [1, 1]} : vector<2x96xf32> to vector<2x32xf32>
    %336 = vector.extract_strided_slice %334 {offsets = [0, 32], sizes = [2, 32], strides = [1, 1]} : vector<2x96xf32> to vector<2x32xf32>
    %337 = vector.extract_strided_slice %334 {offsets = [0, 64], sizes = [2, 32], strides = [1, 1]} : vector<2x96xf32> to vector<2x32xf32>
    %338 = vector.extract_strided_slice %328 {offsets = [0, 96], sizes = [2, 32], strides = [1, 1]} : vector<2x128xf32> to vector<2x32xf32>
    %339 = math.tanh %338 : vector<2x32xf32>
    %340 = arith.index_cast %320 : i32 to index
    %c0_119 = arith.constant 0 : index
    %c0_120 = arith.constant 0 : index
    %341 = vector.load %arg15[%340, %c0_119, %c0_120] : memref<8x2x128xf32, #tpu.memory_space<vmem>>, vector<1x2x128xf32>
    %342 = vector.shape_cast %341 : vector<1x2x128xf32> to vector<2x128xf32>
    %343 = vector.extract_strided_slice %323 {offsets = [0, 128], sizes = [2, 128], strides = [1, 1]} : vector<2x256xf32> to vector<2x128xf32>
    %344 = arith.addf %342, %343 : vector<2x128xf32>
    %345 = vector.extract_strided_slice %344 {offsets = [0, 0], sizes = [2, 96], strides = [1, 1]} : vector<2x128xf32> to vector<2x96xf32>
    %346 = arith.negf %345 : vector<2x96xf32>
    %347 = math.exp %346 : vector<2x96xf32>
    %cst_121 = arith.constant 1.000000e+00 : f32
    %348 = vector.broadcast %cst_121 : f32 to vector<2x96xf32>
    %349 = arith.addf %348, %347 : vector<2x96xf32>
    %350 = arith.divf %348, %349 : vector<2x96xf32>
    %351 = vector.extract_strided_slice %350 {offsets = [0, 0], sizes = [2, 32], strides = [1, 1]} : vector<2x96xf32> to vector<2x32xf32>
    %352 = vector.extract_strided_slice %350 {offsets = [0, 32], sizes = [2, 32], strides = [1, 1]} : vector<2x96xf32> to vector<2x32xf32>
    %353 = vector.extract_strided_slice %350 {offsets = [0, 64], sizes = [2, 32], strides = [1, 1]} : vector<2x96xf32> to vector<2x32xf32>
    %354 = vector.extract_strided_slice %344 {offsets = [0, 96], sizes = [2, 32], strides = [1, 1]} : vector<2x128xf32> to vector<2x32xf32>
    %355 = math.tanh %354 : vector<2x32xf32>
    %356 = arith.mulf %336, %299 : vector<2x32xf32>
    %357 = arith.mulf %335, %339 : vector<2x32xf32>
    %358 = arith.addf %356, %357 : vector<2x32xf32>
    %359 = math.tanh %358 : vector<2x32xf32>
    %360 = arith.mulf %337, %359 : vector<2x32xf32>
    %361 = arith.mulf %352, %304 : vector<2x32xf32>
    %362 = arith.mulf %351, %355 : vector<2x32xf32>
    %363 = arith.addf %361, %362 : vector<2x32xf32>
    %364 = math.tanh %363 : vector<2x32xf32>
    %365 = arith.mulf %353, %364 : vector<2x32xf32>
    %366 = arith.index_cast %c3_i32_113 : i32 to index
    %c0_122 = arith.constant 0 : index
    %c0_123 = arith.constant 0 : index
    %367 = vector.load %arg11[%366, %c0_122, %c0_123] : memref<8x2x64xf32, #tpu.memory_space<vmem>>, vector<1x2x32xf32>
    %368 = vector.shape_cast %367 : vector<1x2x32xf32> to vector<2x32xf32>
    %369 = vector.shape_cast %360 : vector<2x32xf32> to vector<1x2x32xf32>
    tpu.vector_store %arg11[%366, %c0_122, %c0_123], %369 {strides = array<i32>} : memref<8x2x64xf32, #tpu.memory_space<vmem>>, vector<1x2x32xf32>,
    %370 = arith.index_cast %320 : i32 to index
    %c0_124 = arith.constant 0 : index
    %c32_125 = arith.constant 32 : index
    %371 = vector.load %arg11[%370, %c0_124, %c32_125] : memref<8x2x64xf32, #tpu.memory_space<vmem>>, vector<1x2x32xf32>
    %372 = vector.shape_cast %371 : vector<1x2x32xf32> to vector<2x32xf32>
    %373 = vector.shape_cast %365 : vector<2x32xf32> to vector<1x2x32xf32>
    tpu.vector_store %arg11[%370, %c0_124, %c32_125], %373 {strides = array<i32>} : memref<8x2x64xf32, #tpu.memory_space<vmem>>, vector<1x2x32xf32>,
    %374 = vector.broadcast %c3_i32_113 : i32 to vector<2x1xi32>
    %375 = arith.cmpi eq, %0, %374 : vector<2x1xi32>
    %376 = vector.shape_cast %375 : vector<2x1xi1> to vector<2x1xi1>
    %377 = vector.broadcast %376 : vector<2x1xi1> to vector<2x32xi1>
    %378 = arith.select %377, %360, %319 : vector<2x32xi1>, vector<2x32xf32>
    %c4_i32_126 = arith.constant 4 : i32
    %c7_i32_127 = arith.constant 7 : i32
    %379 = arith.subi %c7_i32_127, %c4_i32_126 : i32
    %380 = tpu.concatenate %360, %365 in 1 : vector<2x32xf32>, vector<2x32xf32> -> vector<2x64xf32>
    %381 = arith.truncf %380 : vector<2x64xf32> to vector<2x64xbf16>
    %cst_128 = arith.constant dense<0.000000e+00> : vector<2x256xf32>
    %382 = tpu.matmul %381, %3, %cst_128 {dimension_numbers = #tpu.dot_dimension_numbers<[1], [0], [0], [1], [0, 0, 1, 1], [], []>} : vector<2x64xbf16>, vector<64x256xbf16>, vector<2x256xf32> -> vector<2x256xf32>
    %383 = arith.index_cast %c4_i32_126 : i32 to index
    %c0_129 = arith.constant 0 : index
    %c0_130 = arith.constant 0 : index
    %384 = vector.load %arg14[%383, %c0_129, %c0_130] : memref<8x2x128xf32, #tpu.memory_space<vmem>>, vector<1x2x128xf32>
    %385 = vector.shape_cast %384 : vector<1x2x128xf32> to vector<2x128xf32>
    %386 = vector.extract_strided_slice %382 {offsets = [0, 0], sizes = [2, 128], strides = [1, 1]} : vector<2x256xf32> to vector<2x128xf32>
    %387 = arith.addf %385, %386 : vector<2x128xf32>
    %388 = vector.extract_strided_slice %387 {offsets = [0, 0], sizes = [2, 96], strides = [1, 1]} : vector<2x128xf32> to vector<2x96xf32>
    %389 = arith.negf %388 : vector<2x96xf32>
    %390 = math.exp %389 : vector<2x96xf32>
    %cst_131 = arith.constant 1.000000e+00 : f32
    %391 = vector.broadcast %cst_131 : f32 to vector<2x96xf32>
    %392 = arith.addf %391, %390 : vector<2x96xf32>
    %393 = arith.divf %391, %392 : vector<2x96xf32>
    %394 = vector.extract_strided_slice %393 {offsets = [0, 0], sizes = [2, 32], strides = [1, 1]} : vector<2x96xf32> to vector<2x32xf32>
    %395 = vector.extract_strided_slice %393 {offsets = [0, 32], sizes = [2, 32], strides = [1, 1]} : vector<2x96xf32> to vector<2x32xf32>
    %396 = vector.extract_strided_slice %393 {offsets = [0, 64], sizes = [2, 32], strides = [1, 1]} : vector<2x96xf32> to vector<2x32xf32>
    %397 = vector.extract_strided_slice %387 {offsets = [0, 96], sizes = [2, 32], strides = [1, 1]} : vector<2x128xf32> to vector<2x32xf32>
    %398 = math.tanh %397 : vector<2x32xf32>
    %399 = arith.index_cast %379 : i32 to index
    %c0_132 = arith.constant 0 : index
    %c0_133 = arith.constant 0 : index
    %400 = vector.load %arg15[%399, %c0_132, %c0_133] : memref<8x2x128xf32, #tpu.memory_space<vmem>>, vector<1x2x128xf32>
    %401 = vector.shape_cast %400 : vector<1x2x128xf32> to vector<2x128xf32>
    %402 = vector.extract_strided_slice %382 {offsets = [0, 128], sizes = [2, 128], strides = [1, 1]} : vector<2x256xf32> to vector<2x128xf32>
    %403 = arith.addf %401, %402 : vector<2x128xf32>
    %404 = vector.extract_strided_slice %403 {offsets = [0, 0], sizes = [2, 96], strides = [1, 1]} : vector<2x128xf32> to vector<2x96xf32>
    %405 = arith.negf %404 : vector<2x96xf32>
    %406 = math.exp %405 : vector<2x96xf32>
    %cst_134 = arith.constant 1.000000e+00 : f32
    %407 = vector.broadcast %cst_134 : f32 to vector<2x96xf32>
    %408 = arith.addf %407, %406 : vector<2x96xf32>
    %409 = arith.divf %407, %408 : vector<2x96xf32>
    %410 = vector.extract_strided_slice %409 {offsets = [0, 0], sizes = [2, 32], strides = [1, 1]} : vector<2x96xf32> to vector<2x32xf32>
    %411 = vector.extract_strided_slice %409 {offsets = [0, 32], sizes = [2, 32], strides = [1, 1]} : vector<2x96xf32> to vector<2x32xf32>
    %412 = vector.extract_strided_slice %409 {offsets = [0, 64], sizes = [2, 32], strides = [1, 1]} : vector<2x96xf32> to vector<2x32xf32>
    %413 = vector.extract_strided_slice %403 {offsets = [0, 96], sizes = [2, 32], strides = [1, 1]} : vector<2x128xf32> to vector<2x32xf32>
    %414 = math.tanh %413 : vector<2x32xf32>
    %415 = arith.mulf %395, %358 : vector<2x32xf32>
    %416 = arith.mulf %394, %398 : vector<2x32xf32>
    %417 = arith.addf %415, %416 : vector<2x32xf32>
    %418 = math.tanh %417 : vector<2x32xf32>
    %419 = arith.mulf %396, %418 : vector<2x32xf32>
    %420 = arith.mulf %411, %363 : vector<2x32xf32>
    %421 = arith.mulf %410, %414 : vector<2x32xf32>
    %422 = arith.addf %420, %421 : vector<2x32xf32>
    %423 = math.tanh %422 : vector<2x32xf32>
    %424 = arith.mulf %412, %423 : vector<2x32xf32>
    %425 = arith.index_cast %c4_i32_126 : i32 to index
    %c0_135 = arith.constant 0 : index
    %c0_136 = arith.constant 0 : index
    %426 = vector.load %arg11[%425, %c0_135, %c0_136] : memref<8x2x64xf32, #tpu.memory_space<vmem>>, vector<1x2x32xf32>
    %427 = vector.shape_cast %426 : vector<1x2x32xf32> to vector<2x32xf32>
    %428 = vector.shape_cast %419 : vector<2x32xf32> to vector<1x2x32xf32>
    tpu.vector_store %arg11[%425, %c0_135, %c0_136], %428 {strides = array<i32>} : memref<8x2x64xf32, #tpu.memory_space<vmem>>, vector<1x2x32xf32>,
    %429 = arith.index_cast %379 : i32 to index
    %c0_137 = arith.constant 0 : index
    %c32_138 = arith.constant 32 : index
    %430 = vector.load %arg11[%429, %c0_137, %c32_138] : memref<8x2x64xf32, #tpu.memory_space<vmem>>, vector<1x2x32xf32>
    %431 = vector.shape_cast %430 : vector<1x2x32xf32> to vector<2x32xf32>
    %432 = vector.shape_cast %424 : vector<2x32xf32> to vector<1x2x32xf32>
    tpu.vector_store %arg11[%429, %c0_137, %c32_138], %432 {strides = array<i32>} : memref<8x2x64xf32, #tpu.memory_space<vmem>>, vector<1x2x32xf32>,
    %433 = vector.broadcast %c4_i32_126 : i32 to vector<2x1xi32>
    %434 = arith.cmpi eq, %0, %433 : vector<2x1xi32>
    %435 = vector.shape_cast %434 : vector<2x1xi1> to vector<2x1xi1>
    %436 = vector.broadcast %435 : vector<2x1xi1> to vector<2x32xi1>
    %437 = arith.select %436, %419, %378 : vector<2x32xi1>, vector<2x32xf32>
    %c5_i32_139 = arith.constant 5 : i32
    %c7_i32_140 = arith.constant 7 : i32
    %438 = arith.subi %c7_i32_140, %c5_i32_139 : i32
    %439 = tpu.concatenate %419, %424 in 1 : vector<2x32xf32>, vector<2x32xf32> -> vector<2x64xf32>
    %440 = arith.truncf %439 : vector<2x64xf32> to vector<2x64xbf16>
    %cst_141 = arith.constant dense<0.000000e+00> : vector<2x256xf32>
    %441 = tpu.matmul %440, %3, %cst_141 {dimension_numbers = #tpu.dot_dimension_numbers<[1], [0], [0], [1], [0, 0, 1, 1], [], []>} : vector<2x64xbf16>, vector<64x256xbf16>, vector<2x256xf32> -> vector<2x256xf32>
    %442 = arith.index_cast %c5_i32_139 : i32 to index
    %c0_142 = arith.constant 0 : index
    %c0_143 = arith.constant 0 : index
    %443 = vector.load %arg14[%442, %c0_142, %c0_143] : memref<8x2x128xf32, #tpu.memory_space<vmem>>, vector<1x2x128xf32>
    %444 = vector.shape_cast %443 : vector<1x2x128xf32> to vector<2x128xf32>
    %445 = vector.extract_strided_slice %441 {offsets = [0, 0], sizes = [2, 128], strides = [1, 1]} : vector<2x256xf32> to vector<2x128xf32>
    %446 = arith.addf %444, %445 : vector<2x128xf32>
    %447 = vector.extract_strided_slice %446 {offsets = [0, 0], sizes = [2, 96], strides = [1, 1]} : vector<2x128xf32> to vector<2x96xf32>
    %448 = arith.negf %447 : vector<2x96xf32>
    %449 = math.exp %448 : vector<2x96xf32>
    %cst_144 = arith.constant 1.000000e+00 : f32
    %450 = vector.broadcast %cst_144 : f32 to vector<2x96xf32>
    %451 = arith.addf %450, %449 : vector<2x96xf32>
    %452 = arith.divf %450, %451 : vector<2x96xf32>
    %453 = vector.extract_strided_slice %452 {offsets = [0, 0], sizes = [2, 32], strides = [1, 1]} : vector<2x96xf32> to vector<2x32xf32>
    %454 = vector.extract_strided_slice %452 {offsets = [0, 32], sizes = [2, 32], strides = [1, 1]} : vector<2x96xf32> to vector<2x32xf32>
    %455 = vector.extract_strided_slice %452 {offsets = [0, 64], sizes = [2, 32], strides = [1, 1]} : vector<2x96xf32> to vector<2x32xf32>
    %456 = vector.extract_strided_slice %446 {offsets = [0, 96], sizes = [2, 32], strides = [1, 1]} : vector<2x128xf32> to vector<2x32xf32>
    %457 = math.tanh %456 : vector<2x32xf32>
    %458 = arith.index_cast %438 : i32 to index
    %c0_145 = arith.constant 0 : index
    %c0_146 = arith.constant 0 : index
    %459 = vector.load %arg15[%458, %c0_145, %c0_146] : memref<8x2x128xf32, #tpu.memory_space<vmem>>, vector<1x2x128xf32>
    %460 = vector.shape_cast %459 : vector<1x2x128xf32> to vector<2x128xf32>
    %461 = vector.extract_strided_slice %441 {offsets = [0, 128], sizes = [2, 128], strides = [1, 1]} : vector<2x256xf32> to vector<2x128xf32>
    %462 = arith.addf %460, %461 : vector<2x128xf32>
    %463 = vector.extract_strided_slice %462 {offsets = [0, 0], sizes = [2, 96], strides = [1, 1]} : vector<2x128xf32> to vector<2x96xf32>
    %464 = arith.negf %463 : vector<2x96xf32>
    %465 = math.exp %464 : vector<2x96xf32>
    %cst_147 = arith.constant 1.000000e+00 : f32
    %466 = vector.broadcast %cst_147 : f32 to vector<2x96xf32>
    %467 = arith.addf %466, %465 : vector<2x96xf32>
    %468 = arith.divf %466, %467 : vector<2x96xf32>
    %469 = vector.extract_strided_slice %468 {offsets = [0, 0], sizes = [2, 32], strides = [1, 1]} : vector<2x96xf32> to vector<2x32xf32>
    %470 = vector.extract_strided_slice %468 {offsets = [0, 32], sizes = [2, 32], strides = [1, 1]} : vector<2x96xf32> to vector<2x32xf32>
    %471 = vector.extract_strided_slice %468 {offsets = [0, 64], sizes = [2, 32], strides = [1, 1]} : vector<2x96xf32> to vector<2x32xf32>
    %472 = vector.extract_strided_slice %462 {offsets = [0, 96], sizes = [2, 32], strides = [1, 1]} : vector<2x128xf32> to vector<2x32xf32>
    %473 = math.tanh %472 : vector<2x32xf32>
    %474 = arith.mulf %454, %417 : vector<2x32xf32>
    %475 = arith.mulf %453, %457 : vector<2x32xf32>
    %476 = arith.addf %474, %475 : vector<2x32xf32>
    %477 = math.tanh %476 : vector<2x32xf32>
    %478 = arith.mulf %455, %477 : vector<2x32xf32>
    %479 = arith.mulf %470, %422 : vector<2x32xf32>
    %480 = arith.mulf %469, %473 : vector<2x32xf32>
    %481 = arith.addf %479, %480 : vector<2x32xf32>
    %482 = math.tanh %481 : vector<2x32xf32>
    %483 = arith.mulf %471, %482 : vector<2x32xf32>
    %484 = arith.index_cast %c5_i32_139 : i32 to index
    %c0_148 = arith.constant 0 : index
    %c0_149 = arith.constant 0 : index
    %485 = vector.load %arg11[%484, %c0_148, %c0_149] : memref<8x2x64xf32, #tpu.memory_space<vmem>>, vector<1x2x32xf32>
    %486 = vector.shape_cast %485 : vector<1x2x32xf32> to vector<2x32xf32>
    %487 = vector.shape_cast %478 : vector<2x32xf32> to vector<1x2x32xf32>
    tpu.vector_store %arg11[%484, %c0_148, %c0_149], %487 {strides = array<i32>} : memref<8x2x64xf32, #tpu.memory_space<vmem>>, vector<1x2x32xf32>,
    %488 = arith.index_cast %438 : i32 to index
    %c0_150 = arith.constant 0 : index
    %c32_151 = arith.constant 32 : index
    %489 = vector.load %arg11[%488, %c0_150, %c32_151] : memref<8x2x64xf32, #tpu.memory_space<vmem>>, vector<1x2x32xf32>
    %490 = vector.shape_cast %489 : vector<1x2x32xf32> to vector<2x32xf32>
    %491 = vector.shape_cast %483 : vector<2x32xf32> to vector<1x2x32xf32>
    tpu.vector_store %arg11[%488, %c0_150, %c32_151], %491 {strides = array<i32>} : memref<8x2x64xf32, #tpu.memory_space<vmem>>, vector<1x2x32xf32>,
    %492 = vector.broadcast %c5_i32_139 : i32 to vector<2x1xi32>
    %493 = arith.cmpi eq, %0, %492 : vector<2x1xi32>
    %494 = vector.shape_cast %493 : vector<2x1xi1> to vector<2x1xi1>
    %495 = vector.broadcast %494 : vector<2x1xi1> to vector<2x32xi1>
    %496 = arith.select %495, %478, %437 : vector<2x32xi1>, vector<2x32xf32>
    %c6_i32_152 = arith.constant 6 : i32
    %c7_i32_153 = arith.constant 7 : i32
    %497 = arith.subi %c7_i32_153, %c6_i32_152 : i32
    %498 = tpu.concatenate %478, %483 in 1 : vector<2x32xf32>, vector<2x32xf32> -> vector<2x64xf32>
    %499 = arith.truncf %498 : vector<2x64xf32> to vector<2x64xbf16>
    %cst_154 = arith.constant dense<0.000000e+00> : vector<2x256xf32>
    %500 = tpu.matmul %499, %3, %cst_154 {dimension_numbers = #tpu.dot_dimension_numbers<[1], [0], [0], [1], [0, 0, 1, 1], [], []>} : vector<2x64xbf16>, vector<64x256xbf16>, vector<2x256xf32> -> vector<2x256xf32>
    %501 = arith.index_cast %c6_i32_152 : i32 to index
    %c0_155 = arith.constant 0 : index
    %c0_156 = arith.constant 0 : index
    %502 = vector.load %arg14[%501, %c0_155, %c0_156] : memref<8x2x128xf32, #tpu.memory_space<vmem>>, vector<1x2x128xf32>
    %503 = vector.shape_cast %502 : vector<1x2x128xf32> to vector<2x128xf32>
    %504 = vector.extract_strided_slice %500 {offsets = [0, 0], sizes = [2, 128], strides = [1, 1]} : vector<2x256xf32> to vector<2x128xf32>
    %505 = arith.addf %503, %504 : vector<2x128xf32>
    %506 = vector.extract_strided_slice %505 {offsets = [0, 0], sizes = [2, 96], strides = [1, 1]} : vector<2x128xf32> to vector<2x96xf32>
    %507 = arith.negf %506 : vector<2x96xf32>
    %508 = math.exp %507 : vector<2x96xf32>
    %cst_157 = arith.constant 1.000000e+00 : f32
    %509 = vector.broadcast %cst_157 : f32 to vector<2x96xf32>
    %510 = arith.addf %509, %508 : vector<2x96xf32>
    %511 = arith.divf %509, %510 : vector<2x96xf32>
    %512 = vector.extract_strided_slice %511 {offsets = [0, 0], sizes = [2, 32], strides = [1, 1]} : vector<2x96xf32> to vector<2x32xf32>
    %513 = vector.extract_strided_slice %511 {offsets = [0, 32], sizes = [2, 32], strides = [1, 1]} : vector<2x96xf32> to vector<2x32xf32>
    %514 = vector.extract_strided_slice %511 {offsets = [0, 64], sizes = [2, 32], strides = [1, 1]} : vector<2x96xf32> to vector<2x32xf32>
    %515 = vector.extract_strided_slice %505 {offsets = [0, 96], sizes = [2, 32], strides = [1, 1]} : vector<2x128xf32> to vector<2x32xf32>
    %516 = math.tanh %515 : vector<2x32xf32>
    %517 = arith.index_cast %497 : i32 to index
    %c0_158 = arith.constant 0 : index
    %c0_159 = arith.constant 0 : index
    %518 = vector.load %arg15[%517, %c0_158, %c0_159] : memref<8x2x128xf32, #tpu.memory_space<vmem>>, vector<1x2x128xf32>
    %519 = vector.shape_cast %518 : vector<1x2x128xf32> to vector<2x128xf32>
    %520 = vector.extract_strided_slice %500 {offsets = [0, 128], sizes = [2, 128], strides = [1, 1]} : vector<2x256xf32> to vector<2x128xf32>
    %521 = arith.addf %519, %520 : vector<2x128xf32>
    %522 = vector.extract_strided_slice %521 {offsets = [0, 0], sizes = [2, 96], strides = [1, 1]} : vector<2x128xf32> to vector<2x96xf32>
    %523 = arith.negf %522 : vector<2x96xf32>
    %524 = math.exp %523 : vector<2x96xf32>
    %cst_160 = arith.constant 1.000000e+00 : f32
    %525 = vector.broadcast %cst_160 : f32 to vector<2x96xf32>
    %526 = arith.addf %525, %524 : vector<2x96xf32>
    %527 = arith.divf %525, %526 : vector<2x96xf32>
    %528 = vector.extract_strided_slice %527 {offsets = [0, 0], sizes = [2, 32], strides = [1, 1]} : vector<2x96xf32> to vector<2x32xf32>
    %529 = vector.extract_strided_slice %527 {offsets = [0, 32], sizes = [2, 32], strides = [1, 1]} : vector<2x96xf32> to vector<2x32xf32>
    %530 = vector.extract_strided_slice %527 {offsets = [0, 64], sizes = [2, 32], strides = [1, 1]} : vector<2x96xf32> to vector<2x32xf32>
    %531 = vector.extract_strided_slice %521 {offsets = [0, 96], sizes = [2, 32], strides = [1, 1]} : vector<2x128xf32> to vector<2x32xf32>
    %532 = math.tanh %531 : vector<2x32xf32>
    %533 = arith.mulf %513, %476 : vector<2x32xf32>
    %534 = arith.mulf %512, %516 : vector<2x32xf32>
    %535 = arith.addf %533, %534 : vector<2x32xf32>
    %536 = math.tanh %535 : vector<2x32xf32>
    %537 = arith.mulf %514, %536 : vector<2x32xf32>
    %538 = arith.mulf %529, %481 : vector<2x32xf32>
    %539 = arith.mulf %528, %532 : vector<2x32xf32>
    %540 = arith.addf %538, %539 : vector<2x32xf32>
    %541 = math.tanh %540 : vector<2x32xf32>
    %542 = arith.mulf %530, %541 : vector<2x32xf32>
    %543 = arith.index_cast %c6_i32_152 : i32 to index
    %c0_161 = arith.constant 0 : index
    %c0_162 = arith.constant 0 : index
    %544 = vector.load %arg11[%543, %c0_161, %c0_162] : memref<8x2x64xf32, #tpu.memory_space<vmem>>, vector<1x2x32xf32>
    %545 = vector.shape_cast %544 : vector<1x2x32xf32> to vector<2x32xf32>
    %546 = vector.shape_cast %537 : vector<2x32xf32> to vector<1x2x32xf32>
    tpu.vector_store %arg11[%543, %c0_161, %c0_162], %546 {strides = array<i32>} : memref<8x2x64xf32, #tpu.memory_space<vmem>>, vector<1x2x32xf32>,
    %547 = arith.index_cast %497 : i32 to index
    %c0_163 = arith.constant 0 : index
    %c32_164 = arith.constant 32 : index
    %548 = vector.load %arg11[%547, %c0_163, %c32_164] : memref<8x2x64xf32, #tpu.memory_space<vmem>>, vector<1x2x32xf32>
    %549 = vector.shape_cast %548 : vector<1x2x32xf32> to vector<2x32xf32>
    %550 = vector.shape_cast %542 : vector<2x32xf32> to vector<1x2x32xf32>
    tpu.vector_store %arg11[%547, %c0_163, %c32_164], %550 {strides = array<i32>} : memref<8x2x64xf32, #tpu.memory_space<vmem>>, vector<1x2x32xf32>,
    %551 = vector.broadcast %c6_i32_152 : i32 to vector<2x1xi32>
    %552 = arith.cmpi eq, %0, %551 : vector<2x1xi32>
    %553 = vector.shape_cast %552 : vector<2x1xi1> to vector<2x1xi1>
    %554 = vector.broadcast %553 : vector<2x1xi1> to vector<2x32xi1>
    %555 = arith.select %554, %537, %496 : vector<2x32xi1>, vector<2x32xf32>
    %c7_i32_165 = arith.constant 7 : i32
    %c7_i32_166 = arith.constant 7 : i32
    %556 = arith.subi %c7_i32_166, %c7_i32_165 : i32
    %557 = tpu.concatenate %537, %542 in 1 : vector<2x32xf32>, vector<2x32xf32> -> vector<2x64xf32>
    %558 = arith.truncf %557 : vector<2x64xf32> to vector<2x64xbf16>
    %cst_167 = arith.constant dense<0.000000e+00> : vector<2x256xf32>
    %559 = tpu.matmul %558, %3, %cst_167 {dimension_numbers = #tpu.dot_dimension_numbers<[1], [0], [0], [1], [0, 0, 1, 1], [], []>} : vector<2x64xbf16>, vector<64x256xbf16>, vector<2x256xf32> -> vector<2x256xf32>
    %560 = arith.index_cast %c7_i32_165 : i32 to index
    %c0_168 = arith.constant 0 : index
    %c0_169 = arith.constant 0 : index
    %561 = vector.load %arg14[%560, %c0_168, %c0_169] : memref<8x2x128xf32, #tpu.memory_space<vmem>>, vector<1x2x128xf32>
    %562 = vector.shape_cast %561 : vector<1x2x128xf32> to vector<2x128xf32>
    %563 = vector.extract_strided_slice %559 {offsets = [0, 0], sizes = [2, 128], strides = [1, 1]} : vector<2x256xf32> to vector<2x128xf32>
    %564 = arith.addf %562, %563 : vector<2x128xf32>
    %565 = vector.extract_strided_slice %564 {offsets = [0, 0], sizes = [2, 96], strides = [1, 1]} : vector<2x128xf32> to vector<2x96xf32>
    %566 = arith.negf %565 : vector<2x96xf32>
    %567 = math.exp %566 : vector<2x96xf32>
    %cst_170 = arith.constant 1.000000e+00 : f32
    %568 = vector.broadcast %cst_170 : f32 to vector<2x96xf32>
    %569 = arith.addf %568, %567 : vector<2x96xf32>
    %570 = arith.divf %568, %569 : vector<2x96xf32>
    %571 = vector.extract_strided_slice %570 {offsets = [0, 0], sizes = [2, 32], strides = [1, 1]} : vector<2x96xf32> to vector<2x32xf32>
    %572 = vector.extract_strided_slice %570 {offsets = [0, 32], sizes = [2, 32], strides = [1, 1]} : vector<2x96xf32> to vector<2x32xf32>
    %573 = vector.extract_strided_slice %570 {offsets = [0, 64], sizes = [2, 32], strides = [1, 1]} : vector<2x96xf32> to vector<2x32xf32>
    %574 = vector.extract_strided_slice %564 {offsets = [0, 96], sizes = [2, 32], strides = [1, 1]} : vector<2x128xf32> to vector<2x32xf32>
    %575 = math.tanh %574 : vector<2x32xf32>
    %576 = arith.index_cast %556 : i32 to index
    %c0_171 = arith.constant 0 : index
    %c0_172 = arith.constant 0 : index
    %577 = vector.load %arg15[%576, %c0_171, %c0_172] : memref<8x2x128xf32, #tpu.memory_space<vmem>>, vector<1x2x128xf32>
    %578 = vector.shape_cast %577 : vector<1x2x128xf32> to vector<2x128xf32>
    %579 = vector.extract_strided_slice %559 {offsets = [0, 128], sizes = [2, 128], strides = [1, 1]} : vector<2x256xf32> to vector<2x128xf32>
    %580 = arith.addf %578, %579 : vector<2x128xf32>
    %581 = vector.extract_strided_slice %580 {offsets = [0, 0], sizes = [2, 96], strides = [1, 1]} : vector<2x128xf32> to vector<2x96xf32>
    %582 = arith.negf %581 : vector<2x96xf32>
    %583 = math.exp %582 : vector<2x96xf32>
    %cst_173 = arith.constant 1.000000e+00 : f32
    %584 = vector.broadcast %cst_173 : f32 to vector<2x96xf32>
    %585 = arith.addf %584, %583 : vector<2x96xf32>
    %586 = arith.divf %584, %585 : vector<2x96xf32>
    %587 = vector.extract_strided_slice %586 {offsets = [0, 0], sizes = [2, 32], strides = [1, 1]} : vector<2x96xf32> to vector<2x32xf32>
    %588 = vector.extract_strided_slice %586 {offsets = [0, 32], sizes = [2, 32], strides = [1, 1]} : vector<2x96xf32> to vector<2x32xf32>
    %589 = vector.extract_strided_slice %586 {offsets = [0, 64], sizes = [2, 32], strides = [1, 1]} : vector<2x96xf32> to vector<2x32xf32>
    %590 = vector.extract_strided_slice %580 {offsets = [0, 96], sizes = [2, 32], strides = [1, 1]} : vector<2x128xf32> to vector<2x32xf32>
    %591 = math.tanh %590 : vector<2x32xf32>
    %592 = arith.mulf %572, %535 : vector<2x32xf32>
    %593 = arith.mulf %571, %575 : vector<2x32xf32>
    %594 = arith.addf %592, %593 : vector<2x32xf32>
    %595 = math.tanh %594 : vector<2x32xf32>
    %596 = arith.mulf %573, %595 : vector<2x32xf32>
    %597 = arith.mulf %588, %540 : vector<2x32xf32>
    %598 = arith.mulf %587, %591 : vector<2x32xf32>
    %599 = arith.addf %597, %598 : vector<2x32xf32>
    %600 = math.tanh %599 : vector<2x32xf32>
    %601 = arith.mulf %589, %600 : vector<2x32xf32>
    %602 = arith.index_cast %c7_i32_165 : i32 to index
    %c0_174 = arith.constant 0 : index
    %c0_175 = arith.constant 0 : index
    %603 = vector.load %arg11[%602, %c0_174, %c0_175] : memref<8x2x64xf32, #tpu.memory_space<vmem>>, vector<1x2x32xf32>
    %604 = vector.shape_cast %603 : vector<1x2x32xf32> to vector<2x32xf32>
    %605 = vector.shape_cast %596 : vector<2x32xf32> to vector<1x2x32xf32>
    tpu.vector_store %arg11[%602, %c0_174, %c0_175], %605 {strides = array<i32>} : memref<8x2x64xf32, #tpu.memory_space<vmem>>, vector<1x2x32xf32>,
    %606 = arith.index_cast %556 : i32 to index
    %c0_176 = arith.constant 0 : index
    %c32_177 = arith.constant 32 : index
    %607 = vector.load %arg11[%606, %c0_176, %c32_177] : memref<8x2x64xf32, #tpu.memory_space<vmem>>, vector<1x2x32xf32>
    %608 = vector.shape_cast %607 : vector<1x2x32xf32> to vector<2x32xf32>
    %609 = vector.shape_cast %601 : vector<2x32xf32> to vector<1x2x32xf32>
    tpu.vector_store %arg11[%606, %c0_176, %c32_177], %609 {strides = array<i32>} : memref<8x2x64xf32, #tpu.memory_space<vmem>>, vector<1x2x32xf32>,
    %610 = vector.broadcast %c7_i32_165 : i32 to vector<2x1xi32>
    %611 = arith.cmpi eq, %0, %610 : vector<2x1xi32>
    %612 = vector.shape_cast %611 : vector<2x1xi1> to vector<2x1xi1>
    %613 = vector.broadcast %612 : vector<2x1xi1> to vector<2x32xi1>
    %614 = arith.select %613, %596, %555 : vector<2x32xi1>, vector<2x32xf32>
    %c8_i32_178 = arith.constant 8 : i32
    %615 = tpu.concatenate %614, %601 in 1 : vector<2x32xf32>, vector<2x32xf32> -> vector<2x64xf32>
    %c0_179 = arith.constant 0 : index
    %c0_180 = arith.constant 0 : index
    %616 = vector.load %arg8[%c0_179, %c0_180] : memref<64x8xf32, #tpu.memory_space<vmem>>, vector<64x8xf32>
    %cst_181 = arith.constant dense<0.000000e+00> : vector<2x8xf32>
    %617 = tpu.matmul %615, %616, %cst_181 {dimension_numbers = #tpu.dot_dimension_numbers<[1], [0], [0], [1], [0, 0, 1, 1], [], []>} : vector<2x64xf32>, vector<64x8xf32>, vector<2x8xf32> -> vector<2x8xf32>
    %618 = vector.extract_strided_slice %617 {offsets = [0, 0], sizes = [2, 4], strides = [1, 1]} : vector<2x8xf32> to vector<2x4xf32>
    %619 = vector.extract_strided_slice %617 {offsets = [0, 4], sizes = [2, 4], strides = [1, 1]} : vector<2x8xf32> to vector<2x4xf32>
    %c0_182 = arith.constant 0 : index
    %c0_183 = arith.constant 0 : index
    %620 = vector.load %arg9[%c0_182, %c0_183] : memref<1x4xf32, #tpu.memory_space<vmem>>, vector<1x4xf32>
    %621 = vector.broadcast %620 : vector<1x4xf32> to vector<2x4xf32>
    %622 = arith.addf %619, %621 : vector<2x4xf32>
    %c0_184 = arith.constant 0 : index
    %c0_185 = arith.constant 0 : index
    %623 = vector.load %arg13[%c0_184, %c0_185] : memref<2x4xf32, #tpu.memory_space<vmem>>, vector<2x4xf32>
    tpu.vector_store %arg13[%c0_184, %c0_185], %622 {strides = array<i32>} : memref<2x4xf32, #tpu.memory_space<vmem>>, vector<2x4xf32>,
    %cst_186 = arith.constant dense<0xFF800000> : vector<2xf32>
    %624 = vector.multi_reduction <maximumf>, %618, %cst_186 [1] : vector<2x4xf32> to vector<2xf32>
    %625 = vector.shape_cast %624 : vector<2xf32> to vector<2x1xf32>
    %626 = vector.broadcast %625 : vector<2x1xf32> to vector<2x4xf32>
    %627 = arith.subf %618, %626 : vector<2x4xf32>
    %628 = math.exp %627 : vector<2x4xf32>
    %cst_187 = arith.constant dense<0.000000e+00> : vector<2xf32>
    %629 = vector.multi_reduction <add>, %628, %cst_187 [1] : vector<2x4xf32> to vector<2xf32>
    %630 = vector.shape_cast %629 : vector<2xf32> to vector<2x1xf32>
    %631 = tpu.reciprocal %630 {approx = true} : vector<2x1xf32> -> vector<2x1xf32>
    %632 = vector.broadcast %631 : vector<2x1xf32> to vector<2x4xf32>
    %633 = arith.mulf %628, %632 : vector<2x4xf32>
    %c0_188 = arith.constant 0 : index
    %c0_189 = arith.constant 0 : index
    %634 = vector.load %arg10[%c0_188, %c0_189] : memref<4x128xf32, #tpu.memory_space<vmem>>, vector<4x128xf32>
    %cst_190 = arith.constant dense<0.000000e+00> : vector<2x128xf32>
    %635 = tpu.matmul %633, %634, %cst_190 {dimension_numbers = #tpu.dot_dimension_numbers<[1], [0], [0], [1], [0, 0, 1, 1], [], []>} : vector<2x4xf32>, vector<4x128xf32>, vector<2x128xf32> -> vector<2x128xf32>
    %c0_191 = arith.constant 0 : index
    %c0_192 = arith.constant 0 : index
    %636 = vector.load %arg12[%c0_191, %c0_192] : memref<2x128xf32, #tpu.memory_space<vmem>>, vector<2x128xf32>
    tpu.vector_store %arg12[%c0_191, %c0_192], %635 {strides = array<i32>} : memref<2x128xf32, #tpu.memory_space<vmem>>, vector<2x128xf32>,
    return
  }
  func.func @transform_0(%arg0: i32) -> (i32, i32) {
    %c0_i32 = arith.constant 0 : i32
    %c0_i32_0 = arith.constant 0 : i32
    return %arg0, %c0_i32 : i32, i32
  }
  func.func @transform_1(%arg0: i32) -> (i32, i32, i32) {
    %c0_i32 = arith.constant 0 : i32
    %c0_i32_0 = arith.constant 0 : i32
    %c0_i32_1 = arith.constant 0 : i32
    return %c0_i32, %arg0, %c0_i32_0 : i32, i32, i32
  }
  func.func @transform_2(%arg0: i32) -> (i32, i32) {
    %c0_i32 = arith.constant 0 : i32
    %c0_i32_0 = arith.constant 0 : i32
    %c0_i32_1 = arith.constant 0 : i32
    return %c0_i32, %c0_i32_0 : i32, i32
  }
  func.func @transform_3(%arg0: i32) -> (i32, i32) {
    %c0_i32 = arith.constant 0 : i32
    %c0_i32_0 = arith.constant 0 : i32
    %c0_i32_1 = arith.constant 0 : i32
    return %c0_i32, %c0_i32_0 : i32, i32
  }
  func.func @transform_4(%arg0: i32) -> (i32, i32) {
    %c0_i32 = arith.constant 0 : i32
    %c0_i32_0 = arith.constant 0 : i32
    %c0_i32_1 = arith.constant 0 : i32
    return %c0_i32, %c0_i32_0 : i32, i32
  }
  func.func @transform_5(%arg0: i32) -> (i32, i32) {
    %c0_i32 = arith.constant 0 : i32
    %c0_i32_0 = arith.constant 0 : i32
    %c0_i32_1 = arith.constant 0 : i32
    return %c0_i32, %c0_i32_0 : i32, i32
  }
  func.func @transform_6(%arg0: i32) -> (i32, i32) {
    %c0_i32 = arith.constant 0 : i32
    %c0_i32_0 = arith.constant 0 : i32
    %c0_i32_1 = arith.constant 0 : i32
    return %c0_i32, %c0_i32_0 : i32, i32
  }
  func.func @transform_7(%arg0: i32) -> (i32, i32) {
    %c0_i32 = arith.constant 0 : i32
    %c0_i32_0 = arith.constant 0 : i32
    %c0_i32_1 = arith.constant 0 : i32
    return %c0_i32, %c0_i32_0 : i32, i32
  }
  func.func @transform_8(%arg0: i32) -> (i32, i32) {
    %c0_i32 = arith.constant 0 : i32
    %c0_i32_0 = arith.constant 0 : i32
    %c0_i32_1 = arith.constant 0 : i32
    return %c0_i32, %c0_i32_0 : i32, i32
  }
  func.func @transform_9(%arg0: i32) -> (i32, i32) {
    %c0_i32 = arith.constant 0 : i32
    %c0_i32_0 = arith.constant 0 : i32
    %c0_i32_1 = arith.constant 0 : i32
    return %c0_i32, %c0_i32_0 : i32, i32
  }
  func.func @transform_10(%arg0: i32) -> (i32, i32, i32) {
    %c0_i32 = arith.constant 0 : i32
    %c0_i32_0 = arith.constant 0 : i32
    %c0_i32_1 = arith.constant 0 : i32
    return %c0_i32, %arg0, %c0_i32_0 : i32, i32, i32
  }
  func.func @transform_11(%arg0: i32) -> (i32, i32) {
    %c0_i32 = arith.constant 0 : i32
    %c0_i32_0 = arith.constant 0 : i32
    return %arg0, %c0_i32 : i32, i32
  }
  func.func @transform_12(%arg0: i32) -> (i32, i32) {
    %c0_i32 = arith.constant 0 : i32
    %c0_i32_0 = arith.constant 0 : i32
    return %arg0, %c0_i32 : i32, i32
  }
}

</mosaic_0001>

<bundles_post_ra>
// kernel: tpu_custom_call.1
= control target key start
LH: loop header
LB: loop body
LE: loop exit
PB: predicated region body
PF: predicated region fallthrough
CT: control target
= control target key end

     0   :  { %18 = vsyncpa [#allocation5], 0  ;;  %s3257_s0 = inlined_call_operand.vmem [shape: s32[2,1], index: 0, kind: input, shape index: {}]   ;;  %s3258_s1 = inlined_call_operand.hbm [shape: bf16[8,2,32], index: 1, kind: input, shape index: {}]   ;;  %s3259_s2 = inlined_call_operand.vmem [shape: bf16[32,128], index: 2, kind: input, shape index: {}]   ;;  %s3260_s3 = inlined_call_operand.hbm [shape: bf16[32,128], index: 3, kind: input, shape index: {}]   ;;  %s3261_s4 = inlined_call_operand.vmem [shape: bf16[64,256], index: 4, kind: input, shape index: {}]   ;;  %s3262_s5 = inlined_call_operand.vmem [shape: f32[1,128], index: 5, kind: input, shape index: {}]   ;;  %s3263_s6 = inlined_call_operand.vmem [shape: f32[1,128], index: 6, kind: input, shape index: {}]   ;;  %s3264_s7 = inlined_call_operand.vmem [shape: f32[64,8], index: 7, kind: input, shape index: {}]   ;;  %s3265_s8 = inlined_call_operand.vmem [shape: f32[1,4], index: 8, kind: input, shape index: {}]   ;;  %s3266_s9 = inlined_call_operand.vmem [shape: f32[4,128], index: 9, kind: input, shape index: {}]   ;;  %s3267_s10 = inlined_call_operand.hbm [shape: f32[8,2,64], index: 10, kind: output, shape index: {0}]   ;;  %s3268_s11 = inlined_call_operand.hbm [shape: f32[2,128], index: 11, kind: output, shape index: {1}]   ;;  %s3269_s12 = inlined_call_operand.hbm [shape: f32[2,4], index: 12, kind: output, shape index: {2}]  }
   0x1   :  { %19 = vsyncpa [#allocation8], 0 }
   0x2   :  { %20 = vsyncpa [#allocation6], 0 }
   0x3   :  { %21 = vsyncpa [#allocation11], 0  ;;  %s2606_s21 = smov [#allocation4]   ;;  %s2488_s25 = scalar_lea.hbm %s3258_s1, 128 }
   0x4   :  { %s29_s22 = sshll.u32 %s2606_s21, 4  ;;  %p2489_p0 = scmp.ne.s32.totalorder %s3258_s1, %s2488_s25  ;;  %s30_s22 = int_to_ptr.vmem [resolvable:$true] %s29_s22 }
   0x5   :  { %p2492_p1 = scmp.lt.u32.totalorder %s2488_s25, %s3258_s1 }
   0x7   :  { %p2494_p2 = pnand %p2492_p1, %p2489_p0 }
   0x9   :  { %2497 = shalt.err (!%p2494_p2)
}
   0xa   :  { %s2498_s30 = scalar_lea.vmem %s30_s22, 128  ;;  %p2503_p4 = scmp.lt.s32.totalorder %s30_s22, %s30_s22 }
   0xb   :  { %p2499_p3 = scmp.ne.s32.totalorder %s30_s22, %s2498_s30  ;;  %p2504_p5 = scmp.lt.s32.totalorder %s2498_s30, %s2498_s30 }
   0xd   :  { %p2505_p6 = por %p2504_p5, %p2503_p4 }
   0xf   :  { %p2506_p7 = pnand %p2505_p6, %p2499_p3 }
  0x11   :  { %2509 = shalt.err (!%p2506_p7)
}
  0x12   :  { %s2607_s13 = smov 16   ;;  %s2608_s14 = smov 1  }
  0x13   :  { %35 = dma.hbm_to_vmem [thread:$0]  %s3258_s1, 128, %s30_s22, [#allocation5], %s2607_s13, %s2607_s13, %s2608_s14  }
  0x14   :  { %s2609_s17 = smov [#allocation7]   ;;  %s2510_s21 = scalar_lea.hbm %s3260_s3, 256 }
  0x15   :  { %s43_s18 = sshll.u32 %s2609_s17, 4  ;;  %p2511_p8 = scmp.ne.s32.totalorder %s3260_s3, %s2510_s21  ;;  %s44_s18 = int_to_ptr.vmem [resolvable:$true] %s43_s18 }
  0x16   :  { %p2514_p9 = scmp.lt.u32.totalorder %s2510_s21, %s3260_s3 }
  0x18   :  { %p2516_p10 = pnand %p2514_p9, %p2511_p8 }
  0x1a   :  { %2519 = shalt.err (!%p2516_p10)
}
  0x1b   :  { %s2520_s27 = scalar_lea.vmem %s44_s18, 256  ;;  %p2525_p12 = scmp.lt.s32.totalorder %s44_s18, %s44_s18 }
  0x1c   :  { %p2521_p11 = scmp.ne.s32.totalorder %s44_s18, %s2520_s27  ;;  %p2526_p13 = scmp.lt.s32.totalorder %s2520_s27, %s2520_s27 }
  0x1e   :  { %p2527_p0 = por %p2526_p13, %p2525_p12 }
  0x20   :  { %p2528_p1 = pnand %p2527_p0, %p2521_p11 }
  0x22   :  { %2531 = shalt.err (!%p2528_p1)
}
  0x23   :  { %s2610_s1 = smov 64   ;;  %s2611_s22 = smov 4  }
  0x24   :  { %49 = dma.hbm_to_vmem [thread:$0]  %s3260_s3, 256, %s44_s18, [#allocation8], %s2610_s1, %s2610_s1, %s2611_s22  }
  0x25   :  { %2598 = dma.done.wait [#allocation5], 128  }
  0x26   :  { %2599 = vsyncadd [#allocation5], 4294967168 }
  0x27   :  { %2600 = dma.done.wait [#allocation8], 256  }
  0x28   :  { %2601 = vsyncadd [#allocation8], 4294967040  ;;  %v2612_v0 = vmov 0.0   ;;  %vm2613_vm0 = vmmov 0   ;;  %v2614_v1 = vmov 0   ;;  %v2726_v2 = vld [vmem:[%s3259_s2] sm:$0xff]  }
  0x29   :  { %2157 = vmatprep.subr.bf16.mxu0 %v2612_v0  ;;  %2161 = vmatprep.mubr.msk.bf16.mxu0 %vm2613_vm0, %v2612_v0  ;;  %v2732_v3 = vld [vmem:[%s3259_s2 + $0x8] sm:$0xff]   ;;  %v2735_v4 = vld [vmem:[#allocation7] sm:$0xff]   ;;  %v2738_v5 = vld [vmem:[#allocation7 + $0x8] sm:$0xff]   ;;  %vm107_vm1 = vcmask 261120   ;;  %v2615_v22 = vmov 0.0|0.0   ;;  %vm976_vm2 = vcmask 254976  }
  0x2a   :  { %2165 = vmatprep.subr.bf16.mxu1 %v2612_v0  ;;  %2169 = vmatprep.mubr.msk.bf16.mxu1 %vm2613_vm0, %v2612_v0  ;;  %v88_v6 = vld [vmem:[#allocation4] sm:$0x1]  ;;  %v212_v7 = vld [vmem:[#allocation4 + $0x1] sm:$0x1]  ;;  %v301_v8 = vld [vmem:[#allocation4 + $0x2] sm:$0x1] }
  0x2b   :  { %2338 = vset.pattern.permute.xlu0 %v2614_v1  ;;  %2339 = vset.pattern.permute.xlu1 %v2614_v1  ;;  %v390_v9 = vld [vmem:[#allocation4 + $0x3] sm:$0x1]  ;;  %v479_v10 = vld [vmem:[#allocation4 + $0x4] sm:$0x1]  ;;  %v568_v11 = vld [vmem:[#allocation4 + $0x5] sm:$0x1] }
  0x2c   :  { %2158 = vmatpush3.bf16.msra.mxu0 %v2726_v2  ;;  %2166 = vmatpush3.bf16.msra.mxu1 %v2735_v4  ;;  %v657_v12 = vld [vmem:[#allocation4 + $0x6] sm:$0x1]  ;;  %v2837_v13 = vld [vmem:[%s3261_s4 + $0x4] ss:$8 sps:$4 sm:$0xff]   ;;  %v746_v14 = vld [vmem:[#allocation4 + $0x7] sm:$0x1] }
  0x2d   :  { %2159 = vmatprep.subr.bf16.mxu0 %v2612_v0  ;;  %2167 = vmatprep.subr.bf16.mxu1 %v2612_v0  ;;  %v2847_v15 = vld [vmem:[%s3261_s4] ss:$8 sps:$4 sm:$0xff]   ;;  %v2854_v16 = vld [vmem:[%s3261_s4 + $0x14] ss:$8 sps:$4 sm:$0xff]   ;;  %v2862_v17 = vld [vmem:[%s3261_s4 + $0x10] ss:$8 sps:$4 sm:$0xff]  }
  0x2e   :  { %v2869_v18 = vld [vmem:[%s3261_s4 + $0x24] ss:$8 sps:$4 sm:$0xff]   ;;  %v2879_v19 = vld [vmem:[%s3261_s4 + $0x20] ss:$8 sps:$4 sm:$0xff]   ;;  %v2886_v20 = vld [vmem:[%s3261_s4 + $0x34] ss:$8 sps:$4 sm:$0xff]  }
  0x2f   :  { %v2893_v21 = vld [vmem:[%s3261_s4 + $0x30] ss:$8 sps:$4 sm:$0xff]   ;;  %v2916_v23 = vld [vmem:[%s3262_s5] ss:$0 sm:$0xff]  ;;  %s2616_s5 = smov 32   ;;  %vm983_vm3 = vcmask 517376  }
  0x30   :  { %2160 = vmatpush3.bf16.msra.mxu0 %v2732_v3  ;;  %2168 = vmatpush3.bf16.msra.mxu1 %v2738_v5  ;;  %v2922_v27 = vld [vmem:[%s3263_s6] ss:$0 sm:$0xff]  ;;  %s2617_s6 = smov 96   ;;  %vm875_vm4 = vcmask 523264  }
  0x31   :  { %2173 = vmatprep.subr.bf16.mxu0 %v2612_v0  ;;  %2181 = vmatprep.subr.bf16.mxu1 %v2612_v0 }
  0x33   :  { %2162 = vmatmul.mubr.msk.bf16.vlgmr.msra.gmra.mrb[0].mxu0 %vm107_vm1, %v88_v6  ;;  %2170 = vmatmul.mubr.msk.bf16.vlgmr.msra.gmra.mrb[0].mxu1 %vm107_vm1, %v88_v6 }
  0x34   :  { %2174 = vmatpush3.bf16.msra.mxu0 %v2726_v2  ;;  %2177 = vmatprep.mubr.msk.bf16.mxu0 %vm2613_vm0, %v2612_v0 }
  0x35   :  { %2175 = vmatprep.subr.bf16.mxu0 %v2612_v0  ;;  %2182 = vmatpush3.bf16.msra.mxu1 %v2735_v4 }
  0x36   :  { %2185 = vmatprep.mubr.msk.bf16.mxu1 %vm2613_vm0, %v2612_v0  ;;  %2183 = vmatprep.subr.bf16.mxu1 %v2612_v0 }
  0x38   :  { %2176 = vmatpush3.bf16.msra.mxu0 %v2732_v3 }
  0x39   :  { %2189 = vmatprep.subr.bf16.mxu0 %v2612_v0  ;;  %2184 = vmatpush3.bf16.msra.mxu1 %v2738_v5 }
  0x3a   :  { %2197 = vmatprep.subr.bf16.mxu1 %v2612_v0 }
  0x3b   :  { %2178 = vmatmul.mubr.msk.bf16.vlgmr.msra.gmra.mrb[4].mxu0 %vm107_vm1, %v212_v7 }
  0x3c   :  { %2190 = vmatpush3.bf16.msra.mxu0 %v2726_v2  ;;  %2193 = vmatprep.mubr.msk.bf16.mxu0 %vm2613_vm0, %v2612_v0 }
  0x3d   :  { %2191 = vmatprep.subr.bf16.mxu0 %v2612_v0  ;;  %2186 = vmatmul.mubr.msk.bf16.vlgmr.msra.gmra.mrb[4].mxu1 %vm107_vm1, %v212_v7 }
  0x3e   :  { %2198 = vmatpush3.bf16.msra.mxu1 %v2735_v4  ;;  %2201 = vmatprep.mubr.msk.bf16.mxu1 %vm2613_vm0, %v2612_v0 }
  0x3f   :  { %2199 = vmatprep.subr.bf16.mxu1 %v2612_v0 }
  0x40   :  { %2192 = vmatpush3.bf16.msra.mxu0 %v2732_v3 }
  0x41   :  { %2205 = vmatprep.subr.bf16.mxu0 %v2612_v0 }
  0x42   :  { %2200 = vmatpush3.bf16.msra.mxu1 %v2738_v5 }
  0x43   :  { %2194 = vmatmul.mubr.msk.bf16.vlgmr.msra.gmra.mrb[8].mxu0 %vm107_vm1, %v301_v8  ;;  %2213 = vmatprep.subr.bf16.mxu1 %v2612_v0 }
  0x44   :  { %2206 = vmatpush3.bf16.msra.mxu0 %v2726_v2  ;;  %2209 = vmatprep.mubr.msk.bf16.mxu0 %vm2613_vm0, %v2612_v0 }
  0x45   :  { %2207 = vmatprep.subr.bf16.mxu0 %v2612_v0  ;;  %2202 = vmatmul.mubr.msk.bf16.vlgmr.msra.gmra.mrb[8].mxu1 %vm107_vm1, %v301_v8 }
  0x46   :  { %2214 = vmatpush3.bf16.msra.mxu1 %v2735_v4  ;;  %2217 = vmatprep.mubr.msk.bf16.mxu1 %vm2613_vm0, %v2612_v0 }
  0x47   :  { %2215 = vmatprep.subr.bf16.mxu1 %v2612_v0 }
  0x48   :  { %2208 = vmatpush3.bf16.msra.mxu0 %v2732_v3 }
  0x49   :  { %2221 = vmatprep.subr.bf16.mxu0 %v2612_v0 }
  0x4a   :  { %2216 = vmatpush3.bf16.msra.mxu1 %v2738_v5 }
  0x4b   :  { %2210 = vmatmul.mubr.msk.bf16.vlgmr.msra.gmra.mrb[12].mxu0 %vm107_vm1, %v390_v9  ;;  %2229 = vmatprep.subr.bf16.mxu1 %v2612_v0 }
  0x4c   :  { %2222 = vmatpush3.bf16.msra.mxu0 %v2726_v2  ;;  %2225 = vmatprep.mubr.msk.bf16.mxu0 %vm2613_vm0, %v2612_v0 }
  0x4d   :  { %2223 = vmatprep.subr.bf16.mxu0 %v2612_v0  ;;  %2218 = vmatmul.mubr.msk.bf16.vlgmr.msra.gmra.mrb[12].mxu1 %vm107_vm1, %v390_v9 }
  0x4e   :  { %2230 = vmatpush3.bf16.msra.mxu1 %v2735_v4  ;;  %2233 = vmatprep.mubr.msk.bf16.mxu1 %vm2613_vm0, %v2612_v0 }
  0x4f   :  { %2231 = vmatprep.subr.bf16.mxu1 %v2612_v0 }
  0x50   :  { %2224 = vmatpush3.bf16.msra.mxu0 %v2732_v3 }
  0x51   :  { %2237 = vmatprep.subr.bf16.mxu0 %v2612_v0 }
  0x52   :  { %2232 = vmatpush3.bf16.msra.mxu1 %v2738_v5 }
  0x53   :  { %2226 = vmatmul.mubr.msk.bf16.vlgmr.msra.gmra.mrb[16].mxu0 %vm107_vm1, %v479_v10  ;;  %2245 = vmatprep.subr.bf16.mxu1 %v2612_v0 }
  0x54   :  { %2238 = vmatpush3.bf16.msra.mxu0 %v2726_v2  ;;  %2241 = vmatprep.mubr.msk.bf16.mxu0 %vm2613_vm0, %v2612_v0 }
  0x55   :  { %2239 = vmatprep.subr.bf16.mxu0 %v2612_v0  ;;  %2234 = vmatmul.mubr.msk.bf16.vlgmr.msra.gmra.mrb[16].mxu1 %vm107_vm1, %v479_v10 }
  0x56   :  { %2246 = vmatpush3.bf16.msra.mxu1 %v2735_v4  ;;  %2249 = vmatprep.mubr.msk.bf16.mxu1 %vm2613_vm0, %v2612_v0 }
  0x57   :  { %2247 = vmatprep.subr.bf16.mxu1 %v2612_v0 }
  0x58   :  { %2240 = vmatpush3.bf16.msra.mxu0 %v2732_v3 }
  0x59   :  { %2253 = vmatprep.subr.bf16.mxu0 %v2612_v0 }
  0x5a   :  { %2248 = vmatpush3.bf16.msra.mxu1 %v2738_v5 }
  0x5b   :  { %2242 = vmatmul.mubr.msk.bf16.vlgmr.msra.gmra.mrb[20].mxu0 %vm107_vm1, %v568_v11  ;;  %2261 = vmatprep.subr.bf16.mxu1 %v2612_v0 }
  0x5c   :  { %2254 = vmatpush3.bf16.msra.mxu0 %v2726_v2  ;;  %2257 = vmatprep.mubr.msk.bf16.mxu0 %vm2613_vm0, %v2612_v0 }
  0x5d   :  { %2255 = vmatprep.subr.bf16.mxu0 %v2612_v0  ;;  %2250 = vmatmul.mubr.msk.bf16.vlgmr.msra.gmra.mrb[20].mxu1 %vm107_vm1, %v568_v11 }
  0x5e   :  { %2262 = vmatpush3.bf16.msra.mxu1 %v2735_v4  ;;  %2265 = vmatprep.mubr.msk.bf16.mxu1 %vm2613_vm0, %v2612_v0 }
  0x5f   :  { %2263 = vmatprep.subr.bf16.mxu1 %v2612_v0 }
  0x60   :  { %2256 = vmatpush3.bf16.msra.mxu0 %v2732_v3 }
  0x61   :  { %2269 = vmatprep.subr.bf16.mxu0 %v2612_v0 }
  0x62   :  { %2264 = vmatpush3.bf16.msra.mxu1 %v2738_v5 }
  0x63   :  { %2258 = vmatmul.mubr.msk.bf16.vlgmr.msra.gmra.mrb[24].mxu0 %vm107_vm1, %v657_v12  ;;  %2277 = vmatprep.subr.bf16.mxu1 %v2612_v0 }
  0x64   :  { %2270 = vmatpush3.bf16.msra.mxu0 %v2726_v2  ;;  %2273 = vmatprep.mubr.msk.bf16.mxu0 %vm2613_vm0, %v2612_v0 }
  0x65   :  { %2271 = vmatprep.subr.bf16.mxu0 %v2612_v0  ;;  %2266 = vmatmul.mubr.msk.bf16.vlgmr.msra.gmra.mrb[24].mxu1 %vm107_vm1, %v657_v12 }
  0x66   :  { %2278 = vmatpush3.bf16.msra.mxu1 %v2735_v4  ;;  %2281 = vmatprep.mubr.msk.bf16.mxu1 %vm2613_vm0, %v2612_v0 }
  0x67   :  { %2279 = vmatprep.subr.bf16.mxu1 %v2612_v0 }
  0x68   :  { %2272 = vmatpush3.bf16.msra.mxu0 %v2732_v3 }
  0x69   :  { %879 = vmatprep.subr.bf16.mxu0 %v2837_v13 }
  0x6a   :  { %2280 = vmatpush3.bf16.msra.mxu1 %v2738_v5 }
  0x6b   :  { %2274 = vmatmul.mubr.msk.bf16.vlgmr.msra.gmra.mrb[28].mxu0 %vm107_vm1, %v746_v14  ;;  %997 = vmatprep.subr.bf16.mxu1 %v2837_v13 }
  0x6c   :  { %880 = vmatpush1.bf16.msra.mxu0 %v2847_v15  ;;  %911 = vmatprep.mubr.bf16.mxu0 %v2614_v1 }
  0x6d   :  { %881 = vmatprep.subr.bf16.mxu0 %v2854_v16  ;;  %2282 = vmatmul.mubr.msk.bf16.vlgmr.msra.gmra.mrb[28].mxu1 %vm107_vm1, %v746_v14 }
  0x6e   :  { %998 = vmatpush1.bf16.msra.mxu1 %v2847_v15  ;;  %1029 = vmatprep.mubr.bf16.mxu1 %v2614_v1 }
  0x6f   :  { %999 = vmatprep.subr.bf16.mxu1 %v2854_v16 }
  0x70   :  { %882 = vmatpush1.bf16.msra.mxu0 %v2862_v17 }
  0x71   :  { %883 = vmatprep.subr.bf16.mxu0 %v2869_v18 }
  0x72   :  { %1000 = vmatpush1.bf16.msra.mxu1 %v2862_v17 }
  0x73   :  { %1001 = vmatprep.subr.bf16.mxu1 %v2869_v18 }
  0x74   :  { %884 = vmatpush1.bf16.msra.mxu0 %v2879_v19 }
  0x75   :  { %885 = vmatprep.subr.bf16.mxu0 %v2886_v20 }
  0x76   :  { %1002 = vmatpush1.bf16.msra.mxu1 %v2879_v19 }
  0x77   :  { %1003 = vmatprep.subr.bf16.mxu1 %v2886_v20 }
  0x78   :  { %886 = vmatpush1.bf16.msra.mxu0 %v2893_v21 }
  0x79   :  { %1114 = vmatprep.subr.bf16.mxu0 %v2837_v13 }
  0x7a   :  { %1004 = vmatpush1.bf16.msra.mxu1 %v2893_v21 }
  0x7b   :  { %912 = vmatmul.mubr.bf16.vlgmr.msra.gmra.mrb[32].mxu0 %v2615_v22  ;;  %1231 = vmatprep.subr.bf16.mxu1 %v2837_v13 }
  0x7c   :  { %1115 = vmatpush1.bf16.msra.mxu0 %v2847_v15  ;;  %1146 = vmatprep.mubr.bf16.mxu0 %v2614_v1 }
  0x7d   :  { %1116 = vmatprep.subr.bf16.mxu0 %v2854_v16 }
  0x80   :  { %1117 = vmatpush1.bf16.msra.mxu0 %v2862_v17 }
  0x81   :  { %1118 = vmatprep.subr.bf16.mxu0 %v2869_v18 }
  0x84   :  { %1119 = vmatpush1.bf16.msra.mxu0 %v2879_v19 }
  0x85   :  { %1120 = vmatprep.subr.bf16.mxu0 %v2886_v20 }
  0x88   :  { %1121 = vmatpush1.bf16.msra.mxu0 %v2893_v21 }
  0x89   :  { %1348 = vmatprep.subr.bf16.mxu0 %v2837_v13 }
 0x106   :  { %v145_v24 = vpop.f32.mrb[0].mxu0  ;;  %v204_v30 = vpop.f32.mrb[0].mxu1 }
 0x107   :  { %v146_v25 = vadd.f32 %v2916_v23, %v145_v24  ;;  %v2163_v26 = vpop.f32.mrb[1].mxu0  ;;  %v205_v31 = vadd.f32 %v2922_v27, %v204_v30  ;;  %v2171_v32 = vpop.f32.mrb[1].mxu1 }
 0x108   :  { %v148_v28 = vpop.f32.mrb[2].mxu0  ;;  %v207_v33 = vpop.f32.mrb[2].mxu1 }
 0x109   :  { %151 = vst [vmem:[#allocation2] sm:$0x3] %v146_v25  ;;  %v2164_v29 = vpop.f32.mrb[3].mxu0  ;;  %210 = vst [vmem:[#allocation3] sm:$0x3] %v205_v31  ;;  %v2172_v34 = vpop.f32.mrb[3].mxu1 }
 0x10e   :  { %v250_v35 = vpop.f32.mrb[4].mxu0 }
 0x10f   :  { %v251_v36 = vadd.f32 %v2916_v23, %v250_v35  ;;  %v2179_v37 = vpop.f32.mrb[5].mxu0 }
 0x110   :  { %v253_v38 = vpop.f32.mrb[6].mxu0  ;;  %v292_v40 = vpop.f32.mrb[4].mxu1 }
 0x111   :  { %257 = vst [vmem:[#allocation2 + $0x2] sm:$0x3] %v251_v36  ;;  %v2180_v39 = vpop.f32.mrb[7].mxu0  ;;  %v293_v41 = vadd.f32 %v2922_v27, %v292_v40  ;;  %v2187_v42 = vpop.f32.mrb[5].mxu1 }
 0x112   :  { %v295_v43 = vpop.f32.mrb[6].mxu1 }
 0x113   :  { %299 = vst [vmem:[#allocation3 + $0x2] sm:$0x3] %v293_v41  ;;  %v2188_v44 = vpop.f32.mrb[7].mxu1 }
 0x116   :  { %v339_v45 = vpop.f32.mrb[8].mxu0 }
 0x117   :  { %v340_v46 = vadd.f32 %v2916_v23, %v339_v45  ;;  %v2195_v47 = vpop.f32.mrb[9].mxu0 }
 0x118   :  { %v342_v48 = vpop.f32.mrb[10].mxu0  ;;  %v381_v50 = vpop.f32.mrb[8].mxu1 }
 0x119   :  { %346 = vst [vmem:[#allocation2 + $0x4] sm:$0x3] %v340_v46  ;;  %v2196_v49 = vpop.f32.mrb[11].mxu0  ;;  %v382_v51 = vadd.f32 %v2922_v27, %v381_v50  ;;  %v2203_v52 = vpop.f32.mrb[9].mxu1 }
 0x11a   :  { %v384_v53 = vpop.f32.mrb[10].mxu1 }
 0x11b   :  { %388 = vst [vmem:[#allocation3 + $0x4] sm:$0x3] %v382_v51  ;;  %v2204_v54 = vpop.f32.mrb[11].mxu1 }
 0x11e   :  { %v428_v55 = vpop.f32.mrb[12].mxu0 }
 0x11f   :  { %v429_v56 = vadd.f32 %v2916_v23, %v428_v55  ;;  %v2211_v57 = vpop.f32.mrb[13].mxu0  ;;  %v920_v55 = vld [vmem:[#allocation2] sm:$0x3] }
 0x120   :  { %v431_v58 = vpop.f32.mrb[14].mxu0  ;;  %v470_v60 = vpop.f32.mrb[12].mxu1 }
 0x121   :  { %435 = vst [vmem:[#allocation2 + $0x6] sm:$0x3] %v429_v56  ;;  %v2212_v59 = vpop.f32.mrb[15].mxu0  ;;  %v471_v61 = vadd.f32 %v2922_v27, %v470_v60  ;;  %v2219_v62 = vpop.f32.mrb[13].mxu1 }
 0x122   :  { %v473_v63 = vpop.f32.mrb[14].mxu1 }
 0x123   :  { %477 = vst [vmem:[#allocation3 + $0x6] sm:$0x3] %v471_v61  ;;  %v2220_v2 = vpop.f32.mrb[15].mxu1 }
 0x126   :  { %v517_v3 = vpop.f32.mrb[16].mxu0 }
 0x127   :  { %v518_v4 = vadd.f32 %v2916_v23, %v517_v3  ;;  %v2227_v5 = vpop.f32.mrb[17].mxu0 }
 0x128   :  { %v520_v6 = vpop.f32.mrb[18].mxu0  ;;  %v559_v8 = vpop.f32.mrb[16].mxu1 }
 0x129   :  { %524 = vst [vmem:[#allocation2 + $0x8] sm:$0x3] %v518_v4  ;;  %v2228_v7 = vpop.f32.mrb[19].mxu0  ;;  %v560_v9 = vadd.f32 %v2922_v27, %v559_v8  ;;  %v2235_v10 = vpop.f32.mrb[17].mxu1 }
 0x12a   :  { %v562_v11 = vpop.f32.mrb[18].mxu1 }
 0x12b   :  { %566 = vst [vmem:[#allocation3 + $0x8] sm:$0x3] %v560_v9  ;;  %v2236_v12 = vpop.f32.mrb[19].mxu1 }
 0x12e   :  { %v606_v14 = vpop.f32.mrb[20].mxu0 }
 0x12f   :  { %v607_v24 = vadd.f32 %v2916_v23, %v606_v14  ;;  %v2243_v25 = vpop.f32.mrb[21].mxu0 }
 0x130   :  { %v609_v26 = vpop.f32.mrb[22].mxu0  ;;  %v648_v29 = vpop.f32.mrb[20].mxu1 }
 0x131   :  { %613 = vst [vmem:[#allocation2 + $0xa] sm:$0x3] %v607_v24  ;;  %v2244_v28 = vpop.f32.mrb[23].mxu0  ;;  %v649_v30 = vadd.f32 %v2922_v27, %v648_v29  ;;  %v2251_v31 = vpop.f32.mrb[21].mxu1 }
 0x132   :  { %v651_v32 = vpop.f32.mrb[22].mxu1 }
 0x133   :  { %655 = vst [vmem:[#allocation3 + $0xa] sm:$0x3] %v649_v30  ;;  %v2252_v33 = vpop.f32.mrb[23].mxu1 }
 0x136   :  { %v695_v34 = vpop.f32.mrb[24].mxu0 }
 0x137   :  { %v696_v35 = vadd.f32 %v2916_v23, %v695_v34  ;;  %v2259_v36 = vpop.f32.mrb[25].mxu0 }
 0x138   :  { %v698_v37 = vpop.f32.mrb[26].mxu0  ;;  %v737_v39 = vpop.f32.mrb[24].mxu1 }
 0x139   :  { %702 = vst [vmem:[#allocation2 + $0xc] sm:$0x3] %v696_v35  ;;  %v2260_v38 = vpop.f32.mrb[27].mxu0  ;;  %v738_v40 = vadd.f32 %v2922_v27, %v737_v39  ;;  %v2267_v41 = vpop.f32.mrb[25].mxu1 }
 0x13a   :  { %v740_v42 = vpop.f32.mrb[26].mxu1 }
 0x13b   :  { %744 = vst [vmem:[#allocation3 + $0xc] sm:$0x3] %v738_v40  ;;  %v2268_v43 = vpop.f32.mrb[27].mxu1  ;;  %v1038_v40 = vld [vmem:[#allocation2 + $0x2] sm:$0x3] }
 0x13e   :  { %v784_v44 = vpop.f32.mrb[28].mxu0 }
 0x13f   :  { %v785_v45 = vadd.f32 %v2916_v23, %v784_v44  ;;  %v2275_v46 = vpop.f32.mrb[29].mxu0 }
 0x140   :  { %v787_v47 = vpop.f32.mrb[30].mxu0  ;;  %v826_v49 = vpop.f32.mrb[28].mxu1 }
 0x141   :  { %791 = vst [vmem:[#allocation2 + $0xe] sm:$0x3] %v785_v45  ;;  %v2276_v48 = vpop.f32.mrb[31].mxu0  ;;  %v827_v50 = vadd.f32 %v2922_v27, %v826_v49  ;;  %v2283_v51 = vpop.f32.mrb[29].mxu1 }
 0x142   :  { %v829_v52 = vpop.f32.mrb[30].mxu1  ;;  %v1047_v43 = vld [vmem:[#allocation3 + $0xc] sm:$0x3] }
 0x143   :  { %833 = vst [vmem:[#allocation3 + $0xe] sm:$0x3] %v827_v50  ;;  %v2284_v53 = vpop.f32.mrb[31].mxu1 }
 0x14a   :  { %v929_v56 = vld [vmem:[#allocation3 + $0xe] sm:$0x3] }
 0x14e   :  { %v913_v54 = vpop.f32.mrb[32].mxu0 }
 0x14f   :  { %v921_v57 = vadd.f32 %v920_v55, %v913_v54  ;;  %v915_v58 = vpop.f32.mrb[33].mxu0 }
 0x150   :  { %v917_v59 = vpop.f32.mrb[34].mxu0  ;;  %v930_v60 = vadd.f32 %v929_v56, %v915_v58 }
 0x151   :  { %2356 = vtanh.f32 %v921_v57  ;;  %v918_v23 = vpop.f32.mrb[35].mxu0  ;;  %v2071_v27 = vmul.f32 -1.442695, %v921_v57 }
 0x152   :  { %2358 = vtanh.f32 %v930_v60  ;;  %v2072_v63 = vmul.f32 -1.442695, %v930_v60 }
 0x153   :  { %2360 = vpow2.f32 %v2071_v27 }
 0x154   :  { %2362 = vpow2.f32 %v2072_v63 }
 0x15b   :  { %v2357_v61 = vpop.eup %2356 }
 0x15c   :  { %940 = vrot.lane.b32.xlu0 %v2357_v61, %s2616_s5  ;;  %v2359_v62 = vpop.eup %2358 }
 0x15d   :  { %v2361_v2 = vpop.eup %2360 }
 0x15e   :  { %v925_v3 = vadd.f32 1.0, %v2361_v2  ;;  %v2363_v4 = vpop.eup %2362 }
 0x15f   :  { %v934_v5 = vadd.f32 1.0, %v2363_v4 }
 0x160   :  { %957 = vrot.lane.b32.xlu0 %v2359_v62, %s2616_s5  ;;  %2364 = vrcp.f32 %v925_v3 }
 0x161   :  { %2366 = vrcp.f32 %v934_v5 }
 0x16a   :  { %v2365_v6 = vpop.eup %2364 }
 0x16b   :  { %v2367_v9 = vpop.eup %2366  ;;  %v938_v12 = vmul.f32 0.0, %v2365_v6 }
 0x16c   :  { %v955_v25 = vmul.f32 0.0, %v2367_v9 }
 0x1ce   :  { %v941_v7 = vpop.permute.xlu0 %940 }
 0x1cf   :  { %v943_v8 = vmul.f32 %v2365_v6, %v941_v7 }
 0x1d1   :  { %945 = vrot.lane.b32.xlu1 %v943_v8, %s2616_s5 }
 0x1d2   :  { %v958_v10 = vpop.permute.xlu0 %957 }
 0x1d3   :  { %v960_v11 = vmul.f32 %v2367_v9, %v958_v10 }
 0x1d5   :  { %962 = vrot.lane.b32.xlu1 %v960_v11, %s2616_s5 }
 0x243   :  { %v946_v14 = vpop.permute.xlu1 %945 }
 0x244   :  { %v2943_v24 = vadd.f32 %v946_v14, %v938_v12 }
 0x246   :  { %2368 = vtanh.f32 %v2943_v24 }
 0x247   :  { %v963_v26 = vpop.permute.xlu1 %962 }
 0x248   :  { %v2946_v28 = vadd.f32 %v963_v26, %v955_v25 }
 0x24a   :  { %2370 = vtanh.f32 %v2946_v28 }
 0x250   :  { %v2369_v29 = vpop.eup %2368 }
 0x251   :  { %951 = vrot.lane.b32.xlu0 %v2369_v29, %s2616_s5 }
 0x254   :  { %v2371_v30 = vpop.eup %2370 }
 0x255   :  { %968 = vrot.lane.b32.xlu1 %v2371_v30, %s2616_s5 }
 0x2c3   :  { %v952_v31 = vpop.permute.xlu0 %951 }
 0x2c4   :  { %v2951_v32 = vmul.f32 %v2365_v6, %v952_v31 }
 0x2c6   :  { %973 = vrot.lane.b32.xlu0 %v2951_v32, %s2610_s1 }
 0x2c7   :  { %v969_v33 = vpop.permute.xlu1 %968 }
 0x2c8   :  { %v971_v34 = vmul.f32 %v2367_v9, %v969_v33 }
 0x2ca   :  { %979 = vrot.lane.b32.xlu1 %v971_v34, %s2617_s6 }
 0x338   :  { %v974_v35 = vpop.permute.xlu0 %973 }
 0x339   :  { %977 = vst.msk [vmem:[#allocation9] sm:$0x3] %vm976_vm2, %v974_v35 }
 0x33c   :  { %v980_v36 = vpop.permute.xlu1 %979 }
 0x33d   :  { %984 = vst.msk [vmem:[#allocation9 + $0xe] sm:$0x3] %vm983_vm3, %v980_v36  ;;  %v992_v37 = vsel %vm107_vm1, %v974_v35, %v980_v36 }
 0x33e   :  { %v993_v38 = vpack.c.bf16 %v992_v37, %v992_v37 }
 0x340   :  { %2073 = vmatmul.mubr.msk.bf16.vlgmr.msra.gmra.mrb[32].mxu1 %vm875_vm4, %v993_v38 }
 0x341   :  { %1232 = vmatpush1.bf16.msra.mxu1 %v2847_v15  ;;  %1263 = vmatprep.mubr.bf16.mxu1 %v2614_v1 }
 0x342   :  { %1233 = vmatprep.subr.bf16.mxu1 %v2854_v16 }
 0x345   :  { %1234 = vmatpush1.bf16.msra.mxu1 %v2862_v17 }
 0x346   :  { %1235 = vmatprep.subr.bf16.mxu1 %v2869_v18 }
 0x349   :  { %1236 = vmatpush1.bf16.msra.mxu1 %v2879_v19 }
 0x34a   :  { %1237 = vmatprep.subr.bf16.mxu1 %v2886_v20 }
 0x34d   :  { %1238 = vmatpush1.bf16.msra.mxu1 %v2893_v21 }
 0x34e   :  { %1463 = vmatprep.subr.bf16.mxu1 %v2837_v13 }
 0x413   :  { %v1031_v39 = vpop.f32.mrb[32].mxu1 }
 0x414   :  { %v1039_v41 = vadd.f32 %v1038_v40, %v1031_v39  ;;  %v1033_v42 = vpop.f32.mrb[33].mxu1 }
 0x415   :  { %v1048_v44 = vadd.f32 %v1047_v43, %v1033_v42  ;;  %v1035_v45 = vpop.f32.mrb[34].mxu1 }
 0x416   :  { %2372 = vtanh.f32 %v1039_v41  ;;  %v1036_v46 = vpop.f32.mrb[35].mxu1  ;;  %v2074_v49 = vmul.f32 -1.442695, %v1039_v41 }
 0x417   :  { %2374 = vtanh.f32 %v1048_v44  ;;  %v2075_v50 = vmul.f32 -1.442695, %v1048_v44 }
 0x418   :  { %2376 = vpow2.f32 %v2074_v49 }
 0x419   :  { %2378 = vpow2.f32 %v2075_v50 }
 0x420   :  { %v2373_v47 = vpop.eup %2372 }
 0x421   :  { %v2375_v48 = vpop.eup %2374  ;;  %1058 = vrot.lane.b32.xlu0 %v2373_v47, %s2616_s5 }
 0x422   :  { %1075 = vrot.lane.b32.xlu1 %v2375_v48, %s2616_s5  ;;  %v2377_v51 = vpop.eup %2376 }
 0x423   :  { %v2379_v52 = vpop.eup %2378  ;;  %v1043_v53 = vadd.f32 1.0, %v2377_v51 }
 0x424   :  { %v1052_v54 = vadd.f32 1.0, %v2379_v52 }
 0x425   :  { %2380 = vrcp.f32 %v1043_v53 }
 0x426   :  { %2382 = vrcp.f32 %v1052_v54 }
 0x42f   :  { %v2381_v55 = vpop.eup %2380 }
 0x430   :  { %v2383_v57 = vpop.eup %2382  ;;  %v1056_v23 = vmul.f32 %v2381_v55, %v2943_v24  ;;  %v1155_v24 = vld [vmem:[#allocation2 + $0x4] sm:$0x3] }
 0x431   :  { %v1073_v62 = vmul.f32 %v2383_v57, %v2946_v28  ;;  %v1164_v28 = vld [vmem:[#allocation3 + $0xa] sm:$0x3] }
 0x493   :  { %v1059_v56 = vpop.permute.xlu0 %1058 }
 0x494   :  { %v1061_v58 = vmul.f32 %v2381_v55, %v1059_v56  ;;  %v1076_v59 = vpop.permute.xlu1 %1075 }
 0x495   :  { %v1078_v60 = vmul.f32 %v2383_v57, %v1076_v59 }
 0x496   :  { %1063 = vrot.lane.b32.xlu0 %v1061_v58, %s2616_s5 }
 0x497   :  { %1080 = vrot.lane.b32.xlu1 %v1078_v60, %s2616_s5 }
 0x508   :  { %v1064_v61 = vpop.permute.xlu0 %1063 }
 0x509   :  { %v2975_v27 = vadd.f32 %v1064_v61, %v1056_v23  ;;  %v1081_v63 = vpop.permute.xlu1 %1080 }
 0x50a   :  { %v2977_v2 = vadd.f32 %v1081_v63, %v1073_v62 }
 0x50b   :  { %2384 = vtanh.f32 %v2975_v27 }
 0x50c   :  { %2386 = vtanh.f32 %v2977_v2 }
 0x515   :  { %v2385_v3 = vpop.eup %2384 }
 0x516   :  { %v2387_v4 = vpop.eup %2386  ;;  %1069 = vrot.lane.b32.xlu0 %v2385_v3, %s2616_s5  ;;  %v1281_v3 = vld [vmem:[#allocation3 + $0x8] sm:$0x3] }
 0x517   :  { %1086 = vrot.lane.b32.xlu1 %v2387_v4, %s2616_s5 }
 0x588   :  { %v1070_v5 = vpop.permute.xlu0 %1069 }
 0x589   :  { %v2983_v6 = vmul.f32 %v2381_v55, %v1070_v5  ;;  %v1087_v7 = vpop.permute.xlu1 %1086 }
 0x58a   :  { %v1089_v8 = vmul.f32 %v2383_v57, %v1087_v7 }
 0x58b   :  { %1091 = vrot.lane.b32.xlu0 %v2983_v6, %s2610_s1 }
 0x58c   :  { %1097 = vrot.lane.b32.xlu1 %v1089_v8, %s2617_s6 }
 0x5fd   :  { %v1092_v9 = vpop.permute.xlu0 %1091 }
 0x5fe   :  { %1095 = vst.msk [vmem:[#allocation9 + $0x2] sm:$0x3] %vm976_vm2, %v1092_v9  ;;  %v1098_v10 = vpop.permute.xlu1 %1097 }
 0x5ff   :  { %1101 = vst.msk [vmem:[#allocation9 + $0xc] sm:$0x3] %vm983_vm3, %v1098_v10  ;;  %v1109_v11 = vsel %vm107_vm1, %v1092_v9, %v1098_v10 }
 0x600   :  { %v1110_v12 = vpack.c.bf16 %v1109_v11, %v1109_v11 }
 0x602   :  { %2076 = vmatmul.mubr.msk.bf16.vlgmr.msra.gmra.mrb[36].mxu0 %vm875_vm4, %v1110_v12 }
 0x603   :  { %1349 = vmatpush1.bf16.msra.mxu0 %v2847_v15  ;;  %1380 = vmatprep.mubr.bf16.mxu0 %v2614_v1 }
 0x604   :  { %1350 = vmatprep.subr.bf16.mxu0 %v2854_v16 }
 0x607   :  { %1351 = vmatpush1.bf16.msra.mxu0 %v2862_v17 }
 0x608   :  { %1352 = vmatprep.subr.bf16.mxu0 %v2869_v18 }
 0x60b   :  { %1353 = vmatpush1.bf16.msra.mxu0 %v2879_v19 }
 0x60c   :  { %1354 = vmatprep.subr.bf16.mxu0 %v2886_v20 }
 0x60f   :  { %1355 = vmatpush1.bf16.msra.mxu0 %v2893_v21 }
 0x610   :  { %1578 = vmatprep.subr.bf16.mxu0 %v2837_v13 }
 0x6d5   :  { %v1148_v14 = vpop.f32.mrb[36].mxu0 }
 0x6d6   :  { %v1156_v25 = vadd.f32 %v1155_v24, %v1148_v14  ;;  %v1150_v26 = vpop.f32.mrb[37].mxu0 }
 0x6d7   :  { %v1165_v29 = vadd.f32 %v1164_v28, %v1150_v26  ;;  %v1152_v30 = vpop.f32.mrb[38].mxu0 }
 0x6d8   :  { %2388 = vtanh.f32 %v1156_v25  ;;  %v1153_v31 = vpop.f32.mrb[39].mxu0  ;;  %v2077_v35 = vmul.f32 -1.442695, %v1156_v25 }
 0x6d9   :  { %2390 = vtanh.f32 %v1165_v29  ;;  %v2078_v36 = vmul.f32 -1.442695, %v1165_v29 }
 0x6da   :  { %2392 = vpow2.f32 %v2077_v35 }
 0x6db   :  { %2394 = vpow2.f32 %v2078_v36 }
 0x6e2   :  { %v2389_v33 = vpop.eup %2388 }
 0x6e3   :  { %v2391_v34 = vpop.eup %2390  ;;  %1175 = vrot.lane.b32.xlu0 %v2389_v33, %s2616_s5 }
 0x6e4   :  { %1192 = vrot.lane.b32.xlu1 %v2391_v34, %s2616_s5  ;;  %v2393_v37 = vpop.eup %2392 }
 0x6e5   :  { %v2395_v38 = vpop.eup %2394  ;;  %v1160_v39 = vadd.f32 1.0, %v2393_v37 }
 0x6e6   :  { %v1169_v40 = vadd.f32 1.0, %v2395_v38 }
 0x6e7   :  { %2396 = vrcp.f32 %v1160_v39 }
 0x6e8   :  { %2398 = vrcp.f32 %v1169_v40 }
 0x6f1   :  { %v2397_v41 = vpop.eup %2396 }
 0x6f2   :  { %v2399_v43 = vpop.eup %2398  ;;  %v1173_v47 = vmul.f32 %v2397_v41, %v2975_v27  ;;  %v1272_v27 = vld [vmem:[#allocation2 + $0x6] sm:$0x3] }
 0x6f3   :  { %v1190_v49 = vmul.f32 %v2399_v43, %v2977_v2 }
 0x755   :  { %v1176_v42 = vpop.permute.xlu0 %1175 }
 0x756   :  { %v1178_v44 = vmul.f32 %v2397_v41, %v1176_v42  ;;  %v1193_v45 = vpop.permute.xlu1 %1192 }
 0x757   :  { %v1195_v46 = vmul.f32 %v2399_v43, %v1193_v45 }
 0x758   :  { %1180 = vrot.lane.b32.xlu0 %v1178_v44, %s2616_s5 }
 0x759   :  { %1197 = vrot.lane.b32.xlu1 %v1195_v46, %s2616_s5 }
 0x7ca   :  { %v1181_v48 = vpop.permute.xlu0 %1180 }
 0x7cb   :  { %v3007_v50 = vadd.f32 %v1181_v48, %v1173_v47  ;;  %v1198_v51 = vpop.permute.xlu1 %1197 }
 0x7cc   :  { %v3009_v52 = vadd.f32 %v1198_v51, %v1190_v49 }
 0x7cd   :  { %2400 = vtanh.f32 %v3007_v50 }
 0x7ce   :  { %2402 = vtanh.f32 %v3009_v52 }
 0x7d7   :  { %v2401_v53 = vpop.eup %2400 }
 0x7d8   :  { %v2403_v54 = vpop.eup %2402  ;;  %1186 = vrot.lane.b32.xlu0 %v2401_v53, %s2616_s5  ;;  %v1398_v53 = vld [vmem:[#allocation3 + $0x6] sm:$0x3] }
 0x7d9   :  { %1203 = vrot.lane.b32.xlu1 %v2403_v54, %s2616_s5 }
 0x84a   :  { %v1187_v55 = vpop.permute.xlu0 %1186 }
 0x84b   :  { %v3015_v56 = vmul.f32 %v2397_v41, %v1187_v55  ;;  %v1204_v57 = vpop.permute.xlu1 %1203 }
 0x84c   :  { %v1206_v58 = vmul.f32 %v2399_v43, %v1204_v57 }
 0x84d   :  { %1208 = vrot.lane.b32.xlu0 %v3015_v56, %s2610_s1 }
 0x84e   :  { %1214 = vrot.lane.b32.xlu1 %v1206_v58, %s2617_s6 }
 0x8bf   :  { %v1209_v59 = vpop.permute.xlu0 %1208 }
 0x8c0   :  { %1212 = vst.msk [vmem:[#allocation9 + $0x4] sm:$0x3] %vm976_vm2, %v1209_v59  ;;  %v1215_v60 = vpop.permute.xlu1 %1214 }
 0x8c1   :  { %1218 = vst.msk [vmem:[#allocation9 + $0xa] sm:$0x3] %vm983_vm3, %v1215_v60  ;;  %v1226_v23 = vsel %vm107_vm1, %v1209_v59, %v1215_v60 }
 0x8c2   :  { %v1227_v61 = vpack.c.bf16 %v1226_v23, %v1226_v23 }
 0x8c4   :  { %2079 = vmatmul.mubr.msk.bf16.vlgmr.msra.gmra.mrb[36].mxu1 %vm875_vm4, %v1227_v61 }
 0x8c5   :  { %1464 = vmatpush1.bf16.msra.mxu1 %v2847_v15  ;;  %1495 = vmatprep.mubr.bf16.mxu1 %v2614_v1 }
 0x8c6   :  { %1465 = vmatprep.subr.bf16.mxu1 %v2854_v16 }
 0x8c9   :  { %1466 = vmatpush1.bf16.msra.mxu1 %v2862_v17 }
 0x8ca   :  { %1467 = vmatprep.subr.bf16.mxu1 %v2869_v18 }
 0x8cd   :  { %1468 = vmatpush1.bf16.msra.mxu1 %v2879_v19 }
 0x8ce   :  { %1469 = vmatprep.subr.bf16.mxu1 %v2886_v20 }
 0x8d1   :  { %1470 = vmatpush1.bf16.msra.mxu1 %v2893_v21 }
 0x8d2   :  { %1693 = vmatprep.subr.bf16.mxu1 %v2837_v13 }
 0x997   :  { %v1265_v62 = vpop.f32.mrb[36].mxu1 }
 0x998   :  { %v1273_v63 = vadd.f32 %v1272_v27, %v1265_v62  ;;  %v1267_v2 = vpop.f32.mrb[37].mxu1 }
 0x999   :  { %v1282_v4 = vadd.f32 %v1281_v3, %v1267_v2  ;;  %v1269_v5 = vpop.f32.mrb[38].mxu1 }
 0x99a   :  { %2404 = vtanh.f32 %v1273_v63  ;;  %v1270_v7 = vpop.f32.mrb[39].mxu1  ;;  %v2080_v10 = vmul.f32 -1.442695, %v1273_v63 }
 0x99b   :  { %2406 = vtanh.f32 %v1282_v4  ;;  %v2081_v11 = vmul.f32 -1.442695, %v1282_v4 }
 0x99c   :  { %2408 = vpow2.f32 %v2080_v10 }
 0x99d   :  { %2410 = vpow2.f32 %v2081_v11 }
 0x9a4   :  { %v2405_v8 = vpop.eup %2404 }
 0x9a5   :  { %v2407_v9 = vpop.eup %2406  ;;  %1292 = vrot.lane.b32.xlu0 %v2405_v8, %s2616_s5 }
 0x9a6   :  { %1309 = vrot.lane.b32.xlu1 %v2407_v9, %s2616_s5  ;;  %v2409_v13 = vpop.eup %2408 }
 0x9a7   :  { %v2411_v12 = vpop.eup %2410  ;;  %v1277_v14 = vadd.f32 1.0, %v2409_v13 }
 0x9a8   :  { %v1286_v24 = vadd.f32 1.0, %v2411_v12 }
 0x9a9   :  { %2412 = vrcp.f32 %v1277_v14 }
 0x9aa   :  { %2414 = vrcp.f32 %v1286_v24 }
 0x9b3   :  { %v2413_v25 = vpop.eup %2412 }
 0x9b4   :  { %v2415_v28 = vpop.eup %2414  ;;  %v1290_v33 = vmul.f32 %v2413_v25, %v3007_v50  ;;  %v1389_v50 = vld [vmem:[#allocation2 + $0x8] sm:$0x3] }
 0x9b5   :  { %v1307_v35 = vmul.f32 %v2415_v28, %v3009_v52 }
 0xa17   :  { %v1293_v26 = vpop.permute.xlu0 %1292 }
 0xa18   :  { %v1295_v29 = vmul.f32 %v2413_v25, %v1293_v26  ;;  %v1310_v30 = vpop.permute.xlu1 %1309 }
 0xa19   :  { %v1312_v31 = vmul.f32 %v2415_v28, %v1310_v30 }
 0xa1a   :  { %1297 = vrot.lane.b32.xlu0 %v1295_v29, %s2616_s5 }
 0xa1b   :  { %1314 = vrot.lane.b32.xlu1 %v1312_v31, %s2616_s5 }
 0xa8c   :  { %v1298_v34 = vpop.permute.xlu0 %1297 }
 0xa8d   :  { %v3039_v36 = vadd.f32 %v1298_v34, %v1290_v33  ;;  %v1315_v37 = vpop.permute.xlu1 %1314 }
 0xa8e   :  { %v3041_v38 = vadd.f32 %v1315_v37, %v1307_v35  ;;  %v1504_v37 = vld [vmem:[#allocation2 + $0xa] sm:$0x3] }
 0xa8f   :  { %2416 = vtanh.f32 %v3039_v36 }
 0xa90   :  { %2418 = vtanh.f32 %v3041_v38 }
 0xa99   :  { %v2417_v39 = vpop.eup %2416 }
 0xa9a   :  { %v2419_v40 = vpop.eup %2418  ;;  %1303 = vrot.lane.b32.xlu0 %v2417_v39, %s2616_s5  ;;  %v1513_v39 = vld [vmem:[#allocation3 + $0x4] sm:$0x3] }
 0xa9b   :  { %1320 = vrot.lane.b32.xlu1 %v2419_v40, %s2616_s5 }
 0xb0c   :  { %v1304_v41 = vpop.permute.xlu0 %1303 }
 0xb0d   :  { %v3047_v42 = vmul.f32 %v2413_v25, %v1304_v41  ;;  %v1321_v43 = vpop.permute.xlu1 %1320 }
 0xb0e   :  { %v1323_v44 = vmul.f32 %v2415_v28, %v1321_v43 }
 0xb0f   :  { %1325 = vrot.lane.b32.xlu0 %v3047_v42, %s2610_s1 }
 0xb10   :  { %1331 = vrot.lane.b32.xlu1 %v1323_v44, %s2617_s6 }
 0xb81   :  { %v1326_v45 = vpop.permute.xlu0 %1325 }
 0xb82   :  { %1329 = vst.msk [vmem:[#allocation9 + $0x6] sm:$0x3] %vm976_vm2, %v1326_v45  ;;  %v1332_v46 = vpop.permute.xlu1 %1331 }
 0xb83   :  { %1335 = vst.msk [vmem:[#allocation9 + $0x8] sm:$0x3] %vm983_vm3, %v1332_v46  ;;  %v1343_v47 = vsel %vm107_vm1, %v1326_v45, %v1332_v46 }
 0xb84   :  { %v1344_v48 = vpack.c.bf16 %v1343_v47, %v1343_v47 }
 0xb86   :  { %2082 = vmatmul.mubr.msk.bf16.vlgmr.msra.gmra.mrb[40].mxu0 %vm875_vm4, %v1344_v48 }
 0xb87   :  { %1579 = vmatpush1.bf16.msra.mxu0 %v2847_v15  ;;  %1610 = vmatprep.mubr.bf16.mxu0 %v2614_v1 }
 0xb88   :  { %1580 = vmatprep.subr.bf16.mxu0 %v2854_v16 }
 0xb8b   :  { %1581 = vmatpush1.bf16.msra.mxu0 %v2862_v17 }
 0xb8c   :  { %1582 = vmatprep.subr.bf16.mxu0 %v2869_v18 }
 0xb8f   :  { %1583 = vmatpush1.bf16.msra.mxu0 %v2879_v19 }
 0xb90   :  { %1584 = vmatprep.subr.bf16.mxu0 %v2886_v20 }
 0xb93   :  { %1585 = vmatpush1.bf16.msra.mxu0 %v2893_v21 }
 0xb94   :  { %2309 = vmatprep.subr.bf16.mxu0 %v2615_v22 }
 0xc59   :  { %v1382_v49 = vpop.f32.mrb[40].mxu0 }
 0xc5a   :  { %v1390_v51 = vadd.f32 %v1389_v50, %v1382_v49  ;;  %v1384_v52 = vpop.f32.mrb[41].mxu0 }
 0xc5b   :  { %v1399_v54 = vadd.f32 %v1398_v53, %v1384_v52  ;;  %v1386_v55 = vpop.f32.mrb[42].mxu0 }
 0xc5c   :  { %2420 = vtanh.f32 %v1390_v51  ;;  %v1387_v57 = vpop.f32.mrb[43].mxu0  ;;  %v2083_v60 = vmul.f32 -1.442695, %v1390_v51 }
 0xc5d   :  { %2422 = vtanh.f32 %v1399_v54  ;;  %v2084_v23 = vmul.f32 -1.442695, %v1399_v54 }
 0xc5e   :  { %2424 = vpow2.f32 %v2083_v60 }
 0xc5f   :  { %2426 = vpow2.f32 %v2084_v23 }
 0xc66   :  { %v2421_v58 = vpop.eup %2420 }
 0xc67   :  { %v2423_v59 = vpop.eup %2422  ;;  %1409 = vrot.lane.b32.xlu0 %v2421_v58, %s2616_s5 }
 0xc68   :  { %1426 = vrot.lane.b32.xlu1 %v2423_v59, %s2616_s5  ;;  %v2425_v61 = vpop.eup %2424 }
 0xc69   :  { %v2427_v62 = vpop.eup %2426  ;;  %v1394_v27 = vadd.f32 1.0, %v2425_v61 }
 0xc6a   :  { %v1403_v63 = vadd.f32 1.0, %v2427_v62 }
 0xc6b   :  { %2428 = vrcp.f32 %v1394_v27 }
 0xc6c   :  { %2430 = vrcp.f32 %v1403_v63 }
 0xc75   :  { %v2429_v2 = vpop.eup %2428 }
 0xc76   :  { %v2431_v4 = vpop.eup %2430  ;;  %v1407_v9 = vmul.f32 %v2429_v2, %v3039_v36 }
 0xc77   :  { %v1424_v11 = vmul.f32 %v2431_v4, %v3041_v38 }
 0xcd9   :  { %v1410_v3 = vpop.permute.xlu0 %1409 }
 0xcda   :  { %v1412_v5 = vmul.f32 %v2429_v2, %v1410_v3  ;;  %v1427_v7 = vpop.permute.xlu1 %1426 }
 0xcdb   :  { %v1429_v8 = vmul.f32 %v2431_v4, %v1427_v7  ;;  %v1619_v7 = vld [vmem:[#allocation2 + $0xc] sm:$0x3] }
 0xcdc   :  { %1414 = vrot.lane.b32.xlu0 %v1412_v5, %s2616_s5 }
 0xcdd   :  { %1431 = vrot.lane.b32.xlu1 %v1429_v8, %s2616_s5 }
 0xd4e   :  { %v1415_v10 = vpop.permute.xlu0 %1414 }
 0xd4f   :  { %v3071_v13 = vadd.f32 %v1415_v10, %v1407_v9  ;;  %v1432_v12 = vpop.permute.xlu1 %1431  ;;  %v1628_v10 = vld [vmem:[#allocation3 + $0x2] sm:$0x3] }
 0xd50   :  { %v3073_v14 = vadd.f32 %v1432_v12, %v1424_v11 }
 0xd51   :  { %2432 = vtanh.f32 %v3071_v13 }
 0xd52   :  { %2434 = vtanh.f32 %v3073_v14 }
 0xd5b   :  { %v2433_v24 = vpop.eup %2432 }
 0xd5c   :  { %v2435_v25 = vpop.eup %2434  ;;  %1420 = vrot.lane.b32.xlu0 %v2433_v24, %s2616_s5 }
 0xd5d   :  { %1437 = vrot.lane.b32.xlu1 %v2435_v25, %s2616_s5 }
 0xdce   :  { %v1421_v26 = vpop.permute.xlu0 %1420 }
 0xdcf   :  { %v3079_v28 = vmul.f32 %v2429_v2, %v1421_v26  ;;  %v1438_v29 = vpop.permute.xlu1 %1437 }
 0xdd0   :  { %v1440_v30 = vmul.f32 %v2431_v4, %v1438_v29 }
 0xdd1   :  { %1442 = vrot.lane.b32.xlu0 %v3079_v28, %s2610_s1 }
 0xdd2   :  { %1447 = vrot.lane.b32.xlu1 %v1440_v30, %s2617_s6 }
 0xe43   :  { %v1443_v31 = vpop.permute.xlu0 %1442 }
 0xe44   :  { %1445 = vst.msk [vmem:[#allocation9 + $0x8] sm:$0x3] %vm976_vm2, %v1443_v31  ;;  %v1448_v33 = vpop.permute.xlu1 %1447 }
 0xe45   :  { %1450 = vst.msk [vmem:[#allocation9 + $0x6] sm:$0x3] %vm983_vm3, %v1448_v33  ;;  %v1458_v34 = vsel %vm107_vm1, %v1443_v31, %v1448_v33 }
 0xe46   :  { %v1459_v35 = vpack.c.bf16 %v1458_v34, %v1458_v34 }
 0xe48   :  { %2085 = vmatmul.mubr.msk.bf16.vlgmr.msra.gmra.mrb[40].mxu1 %vm875_vm4, %v1459_v35 }
 0xe49   :  { %1694 = vmatpush1.bf16.msra.mxu1 %v2847_v15  ;;  %1725 = vmatprep.mubr.bf16.mxu1 %v2614_v1 }
 0xe4a   :  { %1695 = vmatprep.subr.bf16.mxu1 %v2854_v16 }
 0xe4d   :  { %1696 = vmatpush1.bf16.msra.mxu1 %v2862_v17 }
 0xe4e   :  { %1697 = vmatprep.subr.bf16.mxu1 %v2869_v18 }
 0xe51   :  { %1698 = vmatpush1.bf16.msra.mxu1 %v2879_v19 }
 0xe52   :  { %1699 = vmatprep.subr.bf16.mxu1 %v2886_v20 }
 0xe55   :  { %1700 = vmatpush1.bf16.msra.mxu1 %v2893_v21 }
 0xe56   :  { %2304 = vmatprep.subr.mxu1 %v2612_v0 }
 0xf1b   :  { %v1497_v36 = vpop.f32.mrb[40].mxu1 }
 0xf1c   :  { %v1505_v38 = vadd.f32 %v1504_v37, %v1497_v36  ;;  %v1499_v15 = vpop.f32.mrb[41].mxu1 }
 0xf1d   :  { %v1514_v40 = vadd.f32 %v1513_v39, %v1499_v15  ;;  %v1501_v41 = vpop.f32.mrb[42].mxu1 }
 0xf1e   :  { %2436 = vtanh.f32 %v1505_v38  ;;  %v1502_v16 = vpop.f32.mrb[43].mxu1  ;;  %v2086_v19 = vmul.f32 -1.442695, %v1505_v38 }
 0xf1f   :  { %2438 = vtanh.f32 %v1514_v40  ;;  %v2087_v20 = vmul.f32 -1.442695, %v1514_v40 }
 0xf20   :  { %2440 = vpow2.f32 %v2086_v19 }
 0xf21   :  { %2442 = vpow2.f32 %v2087_v20 }
 0xf28   :  { %v2437_v17 = vpop.eup %2436 }
 0xf29   :  { %v2439_v18 = vpop.eup %2438  ;;  %1524 = vrot.lane.b32.xlu0 %v2437_v17, %s2616_s5 }
 0xf2a   :  { %1541 = vrot.lane.b32.xlu1 %v2439_v18, %s2616_s5  ;;  %v2441_v21 = vpop.eup %2440 }
 0xf2b   :  { %v2443_v43 = vpop.eup %2442  ;;  %v1509_v44 = vadd.f32 1.0, %v2441_v21 }
 0xf2c   :  { %v1518_v45 = vadd.f32 1.0, %v2443_v43 }
 0xf2d   :  { %2444 = vrcp.f32 %v1509_v44 }
 0xf2e   :  { %2446 = vrcp.f32 %v1518_v45 }
 0xf37   :  { %v2445_v46 = vpop.eup %2444 }
 0xf38   :  { %v2447_v48 = vpop.eup %2446  ;;  %v1522_v52 = vmul.f32 %v2445_v46, %v3071_v13 }
 0xf39   :  { %v1539_v54 = vmul.f32 %v2447_v48, %v3073_v14 }
 0xf9b   :  { %v1525_v47 = vpop.permute.xlu0 %1524 }
 0xf9c   :  { %v1527_v49 = vmul.f32 %v2445_v46, %v1525_v47  ;;  %v1542_v50 = vpop.permute.xlu1 %1541 }
 0xf9d   :  { %v1544_v51 = vmul.f32 %v2447_v48, %v1542_v50 }
 0xf9e   :  { %1529 = vrot.lane.b32.xlu0 %v1527_v49, %s2616_s5 }
 0xf9f   :  { %1546 = vrot.lane.b32.xlu1 %v1544_v51, %s2616_s5  ;;  %v1734_v51 = vld [vmem:[#allocation2 + $0xe] sm:$0x3] }
0x1010   :  { %v1530_v53 = vpop.permute.xlu0 %1529 }
0x1011   :  { %v1532_v55 = vadd.f32 %v1530_v53, %v1522_v52  ;;  %v1547_v57 = vpop.permute.xlu1 %1546 }
0x1012   :  { %v1549_v58 = vadd.f32 %v1547_v57, %v1539_v54  ;;  %v1743_v54 = vld [vmem:[#allocation3] sm:$0x3] }
0x1013   :  { %2448 = vtanh.f32 %v1532_v55 }
0x1014   :  { %2450 = vtanh.f32 %v1549_v58 }
0x101d   :  { %v2449_v59 = vpop.eup %2448 }
0x101e   :  { %v2451_v60 = vpop.eup %2450  ;;  %1535 = vrot.lane.b32.xlu0 %v2449_v59, %s2616_s5 }
0x101f   :  { %1552 = vrot.lane.b32.xlu1 %v2451_v60, %s2616_s5 }
0x1090   :  { %v1536_v23 = vpop.permute.xlu0 %1535 }
0x1091   :  { %v3105_v61 = vmul.f32 %v2445_v46, %v1536_v23  ;;  %v1553_v62 = vpop.permute.xlu1 %1552 }
0x1092   :  { %v1555_v27 = vmul.f32 %v2447_v48, %v1553_v62 }
0x1093   :  { %1557 = vrot.lane.b32.xlu0 %v3105_v61, %s2610_s1 }
0x1094   :  { %1562 = vrot.lane.b32.xlu1 %v1555_v27, %s2617_s6 }
0x1105   :  { %v1558_v63 = vpop.permute.xlu0 %1557 }
0x1106   :  { %1560 = vst.msk [vmem:[#allocation9 + $0xa] sm:$0x3] %vm976_vm2, %v1558_v63  ;;  %v1563_v2 = vpop.permute.xlu1 %1562 }
0x1107   :  { %1565 = vst.msk [vmem:[#allocation9 + $0x4] sm:$0x3] %vm983_vm3, %v1563_v2  ;;  %v1573_v3 = vsel %vm107_vm1, %v1558_v63, %v1563_v2 }
0x1108   :  { %v1574_v4 = vpack.c.bf16 %v1573_v3, %v1573_v3  ;;  %v69_v3 = vld [vmem:[%s3257_s0] sm:$0x3] }
0x1109   :  { %vm985_vm5 = vcmp.eq.s32.totalorder %v69_v3, 0  ;;  %vm1102_vm6 = vcmp.eq.s32.totalorder %v69_v3, 1  ;;  %vm1336_vm7 = vcmp.eq.s32.totalorder %v69_v3, 3  ;;  %vm1219_vm8 = vcmp.eq.s32.totalorder %v69_v3, 2 }
0x110a   :  { %2088 = vmatmul.mubr.msk.bf16.vlgmr.msra.gmra.mrb[44].mxu0 %vm875_vm4, %v1574_v4  ;;  %vm1566_vm9 = vcmp.eq.s32.totalorder %v69_v3, 5  ;;  %vm1451_vm10 = vcmp.eq.s32.totalorder %v69_v3, 4  ;;  %vm1796_vm11 = vcmp.eq.s32.totalorder %v69_v3, 7  ;;  %vm1681_vm12 = vcmp.eq.s32.totalorder %v69_v3, 6 }
0x110b   :  { %2301 = vmatprep.mubr.msk.f32.mxu0 %vm2613_vm0, %v2612_v0 }
0x11dd   :  { %v1612_v5 = vpop.f32.mrb[44].mxu0 }
0x11de   :  { %v1620_v8 = vadd.f32 %v1619_v7, %v1612_v5  ;;  %v1614_v9 = vpop.f32.mrb[45].mxu0 }
0x11df   :  { %v1629_v11 = vadd.f32 %v1628_v10, %v1614_v9  ;;  %v1616_v13 = vpop.f32.mrb[46].mxu0 }
0x11e0   :  { %2452 = vtanh.f32 %v1620_v8  ;;  %v1617_v12 = vpop.f32.mrb[47].mxu0  ;;  %v2089_v25 = vmul.f32 -1.442695, %v1620_v8  ;;  %v1103_v13 = vsel %vm1102_vm6, 1, %v2614_v1 }
0x11e1   :  { %2454 = vtanh.f32 %v1629_v11  ;;  %v2090_v26 = vmul.f32 -1.442695, %v1629_v11  ;;  %v986_v11 = vsel %vm985_vm5, 1, %v2614_v1  ;;  %v1337_v12 = vsel %vm1336_vm7, 1, %v2614_v1 }
0x11e2   :  { %2456 = vpow2.f32 %v2089_v25  ;;  %v1452_v25 = vsel %vm1451_vm10, 1, %v2614_v1 }
0x11e3   :  { %2458 = vpow2.f32 %v2090_v26  ;;  %v1797_v26 = vsel %vm1796_vm11, 1, %v2614_v1 }
0x11ea   :  { %v2453_v14 = vpop.eup %2452 }
0x11eb   :  { %v2455_v24 = vpop.eup %2454  ;;  %1639 = vrot.lane.b32.xlu0 %v2453_v14, %s2616_s5  ;;  %v1220_v14 = vsel %vm1219_vm8, 1, %v2614_v1 }
0x11ec   :  { %1656 = vrot.lane.b32.xlu1 %v2455_v24, %s2616_s5  ;;  %v2457_v29 = vpop.eup %2456  ;;  %v1567_v24 = vsel %vm1566_vm9, 1, %v2614_v1  ;;  %vm1903_vm9 = vcmask 25600  }
0x11ed   :  { %v2459_v30 = vpop.eup %2458  ;;  %v1624_v31 = vadd.f32 1.0, %v2457_v29  ;;  %v1682_v29 = vsel %vm1681_vm12, 1, %v2614_v1  ;;  %v1809_v1 = vld [vmem:[%s3264_s7 + $0x8] sm:$0xff] }
0x11ee   :  { %v1633_v33 = vadd.f32 1.0, %v2459_v30 }
0x11ef   :  { %2460 = vrcp.f32 %v1624_v31 }
0x11f0   :  { %2462 = vrcp.f32 %v1633_v33 }
0x11f9   :  { %v2461_v34 = vpop.eup %2460 }
0x11fa   :  { %v2463_v36 = vpop.eup %2462  ;;  %v1637_v39 = vmul.f32 %v2461_v34, %v1532_v55 }
0x11fb   :  { %v1654_v41 = vmul.f32 %v2463_v36, %v1549_v58 }
0x125d   :  { %v1640_v35 = vpop.permute.xlu0 %1639 }
0x125e   :  { %v1642_v37 = vmul.f32 %v2461_v34, %v1640_v35  ;;  %v1657_v38 = vpop.permute.xlu1 %1656 }
0x125f   :  { %v1659_v15 = vmul.f32 %v2463_v36, %v1657_v38  ;;  %v1810_v38 = vld [vmem:[%s3264_s7 + $0x10] sm:$0xff] }
0x1260   :  { %1644 = vrot.lane.b32.xlu0 %v1642_v37, %s2616_s5  ;;  %v1808_v37 = vld [vmem:[%s3264_s7] sm:$0xff] }
0x1261   :  { %1661 = vrot.lane.b32.xlu1 %v1659_v15, %s2616_s5  ;;  %v2310_v15 = vpack.c.bf16 %v1809_v1, %v1808_v37 }
0x1263   :  { %2311 = vmatpush3.bf16.msra.mxu0 %v2310_v15 }
0x1264   :  { %2312 = vmatprep.subr.bf16.mxu0 %v2615_v22 }
0x12d2   :  { %v1645_v40 = vpop.permute.xlu0 %1644 }
0x12d3   :  { %v3120_v16 = vadd.f32 %v1645_v40, %v1637_v39  ;;  %v1662_v17 = vpop.permute.xlu1 %1661  ;;  %v1811_v39 = vld [vmem:[%s3264_s7 + $0x18] sm:$0xff] }
0x12d4   :  { %v3122_v18 = vadd.f32 %v1662_v17, %v1654_v41  ;;  %v2313_v40 = vpack.c.bf16 %v1811_v39, %v1810_v38  ;;  %v1812_v41 = vld [vmem:[%s3264_s7 + $0x20] sm:$0xff] }
0x12d5   :  { %2464 = vtanh.f32 %v3120_v16 }
0x12d6   :  { %2466 = vtanh.f32 %v3122_v18  ;;  %2314 = vmatpush3.bf16.msra.mxu0 %v2313_v40 }
0x12d7   :  { %2315 = vmatprep.subr.bf16.mxu0 %v2615_v22 }
0x12df   :  { %v2465_v19 = vpop.eup %2464 }
0x12e0   :  { %v2467_v20 = vpop.eup %2466  ;;  %1650 = vrot.lane.b32.xlu0 %v2465_v19, %s2616_s5  ;;  %v1815_v19 = vld [vmem:[%s3264_s7 + $0x38] sm:$0xff] }
0x12e1   :  { %1667 = vrot.lane.b32.xlu1 %v2467_v20, %s2616_s5 }
0x1352   :  { %v1651_v21 = vpop.permute.xlu0 %1650 }
0x1353   :  { %v3128_v43 = vmul.f32 %v2461_v34, %v1651_v21  ;;  %v1668_v44 = vpop.permute.xlu1 %1667 }
0x1354   :  { %v1670_v45 = vmul.f32 %v2463_v36, %v1668_v44 }
0x1355   :  { %1672 = vrot.lane.b32.xlu0 %v3128_v43, %s2610_s1 }
0x1356   :  { %1677 = vrot.lane.b32.xlu1 %v1670_v45, %s2617_s6 }
0x13c7   :  { %v1673_v46 = vpop.permute.xlu0 %1672 }
0x13c8   :  { %1675 = vst.msk [vmem:[#allocation9 + $0xc] sm:$0x3] %vm976_vm2, %v1673_v46  ;;  %v1678_v47 = vpop.permute.xlu1 %1677 }
0x13c9   :  { %1680 = vst.msk [vmem:[#allocation9 + $0x2] sm:$0x3] %vm983_vm3, %v1678_v47  ;;  %v1688_v48 = vsel %vm107_vm1, %v1673_v46, %v1678_v47 }
0x13ca   :  { %v1689_v49 = vpack.c.bf16 %v1688_v48, %v1688_v48 }
0x13cc   :  { %2091 = vmatmul.mubr.msk.bf16.vlgmr.msra.gmra.mrb[44].mxu1 %vm875_vm4, %v1689_v49 }
0x13cd   :  { %2306 = vmatprep.mubr.msk.f32.mxu1 %vm2613_vm0, %v2612_v0 }
0x149f   :  { %v1727_v50 = vpop.f32.mrb[44].mxu1 }
0x14a0   :  { %v1735_v52 = vadd.f32 %v1734_v51, %v1727_v50  ;;  %v1729_v53 = vpop.f32.mrb[45].mxu1 }
0x14a1   :  { %v1744_v55 = vadd.f32 %v1743_v54, %v1729_v53  ;;  %v1731_v57 = vpop.f32.mrb[46].mxu1 }
0x14a2   :  { %2468 = vtanh.f32 %v1735_v52  ;;  %v1732_v58 = vpop.f32.mrb[47].mxu1  ;;  %v2092_v23 = vmul.f32 -1.442695, %v1735_v52 }
0x14a3   :  { %2470 = vtanh.f32 %v1744_v55  ;;  %v2093_v62 = vmul.f32 -1.442695, %v1744_v55 }
0x14a4   :  { %2472 = vpow2.f32 %v2092_v23 }
0x14a5   :  { %2474 = vpow2.f32 %v2093_v62 }
0x14ac   :  { %v2469_v59 = vpop.eup %2468 }
0x14ad   :  { %v2471_v60 = vpop.eup %2470  ;;  %1754 = vrot.lane.b32.xlu0 %v2469_v59, %s2616_s5 }
0x14ae   :  { %1771 = vrot.lane.b32.xlu1 %v2471_v60, %s2616_s5  ;;  %v2473_v0 = vpop.eup %2472 }
0x14af   :  { %v2475_v27 = vpop.eup %2474  ;;  %v1739_v63 = vadd.f32 1.0, %v2473_v0 }
0x14b0   :  { %v1748_v2 = vadd.f32 1.0, %v2475_v27 }
0x14b1   :  { %2476 = vrcp.f32 %v1739_v63 }
0x14b2   :  { %2478 = vrcp.f32 %v1748_v2 }
0x14bb   :  { %v3144_v4 = vpop.eup %2476 }
0x14bc   :  { %v3146_v7 = vpop.eup %2478  ;;  %v1752_v30 = vmul.f32 %v3144_v4, %v3120_v16  ;;  %v1813_v16 = vld [vmem:[%s3264_s7 + $0x28] sm:$0xff] }
0x14bd   :  { %v1769_v33 = vmul.f32 %v3146_v7, %v3122_v18  ;;  %v2316_v17 = vpack.c.bf16 %v1813_v16, %v1812_v41  ;;  %v1814_v18 = vld [vmem:[%s3264_s7 + $0x30] sm:$0xff] }
0x14be   :  { %v2319_v44 = vpack.c.bf16 %v1815_v19, %v1814_v18 }
0x14bf   :  { %2317 = vmatpush3.bf16.msra.mxu0 %v2316_v17 }
0x14c0   :  { %2318 = vmatprep.subr.bf16.mxu0 %v2615_v22 }
0x14c3   :  { %2320 = vmatpush3.bf16.msra.mxu0 %v2319_v44 }
0x151f   :  { %v1755_v5 = vpop.permute.xlu0 %1754 }
0x1520   :  { %v1757_v8 = vmul.f32 %v3144_v4, %v1755_v5  ;;  %v1772_v9 = vpop.permute.xlu1 %1771 }
0x1521   :  { %v1774_v10 = vmul.f32 %v3146_v7, %v1772_v9 }
0x1522   :  { %1759 = vrot.lane.b32.xlu0 %v1757_v8, %s2616_s5  ;;  %v1916_v8 = vld [vmem:[%s3266_s9] sm:$0xf] }
0x1523   :  { %1776 = vrot.lane.b32.xlu1 %v1774_v10, %s2616_s5 }
0x1526   :  { %988 = vperm.xlu0 %2338, %v986_v11  }
0x1527   :  { %1105 = vperm.xlu1 %2339, %v1103_v13  }
0x152a   :  { %1339 = vperm.xlu0 %2338, %v1337_v12  }
0x152b   :  { %1222 = vperm.xlu1 %2339, %v1220_v14  }
0x152e   :  { %1569 = vperm.xlu0 %2338, %v1567_v24  }
0x152f   :  { %1454 = vperm.xlu1 %2339, %v1452_v25  }
0x1532   :  { %1799 = vperm.xlu0 %2338, %v1797_v26  }
0x1533   :  { %1684 = vperm.xlu1 %2339, %v1682_v29  }
0x1594   :  { %v1760_v31 = vpop.permute.xlu0 %1759 }
0x1595   :  { %v1762_v34 = vadd.f32 %v1760_v31, %v1752_v30  ;;  %v1777_v35 = vpop.permute.xlu1 %1776 }
0x1596   :  { %v1779_v36 = vadd.f32 %v1777_v35, %v1769_v33 }
0x1597   :  { %2480 = vtanh.f32 %v1762_v34 }
0x1598   :  { %2482 = vtanh.f32 %v1779_v36 }
0x15a1   :  { %v2481_v20 = vpop.eup %2480 }
0x15a2   :  { %v2483_v21 = vpop.eup %2482  ;;  %1765 = vrot.lane.b32.xlu1 %v2481_v20, %s2616_s5 }
0x15a3   :  { %1782 = vrot.lane.b32.xlu0 %v2483_v21, %s2616_s5 }
0x15a5   :  { %v989_v46 = vpop.permute.xlu0 %988 }
0x15a6   :  { %v1106_v45 = vpop.permute.xlu1 %1105  ;;  %vm990_vm13 = vcmp.eq.s32.totalorder %v989_v46, 1 }
0x15a7   :  { %v991_v49 = vsel %vm990_vm13, %v2951_v32, 0.0  ;;  %vm1107_vm14 = vcmp.eq.s32.totalorder %v1106_v45, 1 }
0x15a8   :  { %v1108_v51 = vsel %vm1107_vm14, %v2983_v6, %v991_v49 }
0x15a9   :  { %v1340_v48 = vpop.permute.xlu0 %1339 }
0x15aa   :  { %v1223_v47 = vpop.permute.xlu1 %1222  ;;  %vm1341_vm0 = vcmp.eq.s32.totalorder %v1340_v48, 1 }
0x15ab   :  { %vm1224_vm15 = vcmp.eq.s32.totalorder %v1223_v47, 1 }
0x15ac   :  { %v1225_v53 = vsel %vm1224_vm15, %v3015_v56, %v1108_v51 }
0x15ad   :  { %v1570_v52 = vpop.permute.xlu0 %1569  ;;  %v1342_v22 = vsel %vm1341_vm0, %v3047_v42, %v1225_v53 }
0x15ae   :  { %v1455_v50 = vpop.permute.xlu1 %1454  ;;  %vm1571_vm6 = vcmp.eq.s32.totalorder %v1570_v52, 1 }
0x15af   :  { %vm1456_vm5 = vcmp.eq.s32.totalorder %v1455_v50, 1 }
0x15b0   :  { %v1457_v57 = vsel %vm1456_vm5, %v3079_v28, %v1342_v22 }
0x15b1   :  { %v1800_v55 = vpop.permute.xlu0 %1799  ;;  %v1572_v32 = vsel %vm1571_vm6, %v3105_v61, %v1457_v57 }
0x15b2   :  { %v1685_v54 = vpop.permute.xlu1 %1684  ;;  %vm1801_vm8 = vcmp.eq.s32.totalorder %v1800_v55, 1 }
0x15b3   :  { %vm1686_vm7 = vcmp.eq.s32.totalorder %v1685_v54, 1 }
0x15b4   :  { %v1687_v56 = vsel %vm1686_vm7, %v3128_v43, %v1572_v32 }
0x1614   :  { %v1766_v58 = vpop.permute.xlu1 %1765 }
0x1615   :  { %v1768_v59 = vmul.f32 %v3144_v4, %v1766_v58  ;;  %v1783_v60 = vpop.permute.xlu0 %1782 }
0x1616   :  { %v1785_v6 = vmul.f32 %v3146_v7, %v1783_v60  ;;  %v2095_v7 = vld [vmem:[%s3265_s8] ss:$0 sm:$0xff] }
0x1617   :  { %v1802_v23 = vsel %vm1801_vm8, %v1768_v59, %v1687_v56 }
0x1618   :  { %1804 = vrot.lane.b32.xlu0 %v1802_v23, %s2610_s1  ;;  %1792 = vrot.lane.b32.xlu1 %v1785_v6, %s2617_s6  ;;  %s2619_s6 = smov [#allocation9]  }
0x1619   :  { %s2001_s8 = sshll.u32 %s2619_s6, 4  ;;  %s2002_s8 = int_to_ptr.vmem [resolvable:$true] %s2001_s8 }
0x161a   :  { %p2537_p3 = scmp.lt.s32.totalorder %s2002_s8, %s2002_s8 }
0x168a   :  { %v1793_v42 = vpop.permute.xlu1 %1792  ;;  %v1805_v28 = vpop.permute.xlu0 %1804 }
0x168b   :  { %1795 = vst.msk [vmem:[#allocation9] sm:$0x3] %vm983_vm3, %v1793_v42  ;;  %v1807_v62 = vsel %vm107_vm1, %v1805_v28, %v1793_v42  ;;  %vm1921_vm1 = vcmask 1043456  }
0x168c   :  { %2302 = vmatmul.mubr.msk.f32.vlgmr.msra.gmra.mrb[48].mxu0 %vm875_vm4, %v1807_v62  ;;  %2305 = vmatpush3.msk.msra.mxu1 %vm1921_vm1, %v1916_v8 }
0x175f   :  { %v1885_v61 = vpop.f32.mrb[48].mxu0 }
0x1760   :  { %v2303_v0 = vpop.f32.mrb[49].mxu0  ;;  %v1905_v27 = vsel %vm1903_vm9, %v1885_v61, -inf }
0x1761   :  { %1906 = vmax.xlane.f32.xlu1 %v1905_v27 }
0x1772   :  { %1787 = vrot.lane.b32.xlu1 %v1768_v59, %s2610_s1  ;;  %s2618_s1 = smov 124  }
0x17ee   :  { %v1907_v43 = vpop.xlane.xlu1 %1906 }
0x17ef   :  { %v1908_v63 = vsub.f32 %v1885_v61, %v1907_v43 }
0x17f1   :  { %v1909_v2 = vmul.f32 1.442695, %v1908_v63 }
0x17f2   :  { %v1788_v3 = vpop.permute.xlu1 %1787 }
0x17f3   :  { %2484 = vpow2.f32 %v1909_v2  ;;  %1790 = vst.msk [vmem:[#allocation9 + $0xe] sm:$0x3] %vm976_vm2, %v1788_v3  ;;  %vm1917_vm2 = vcmask 31744  }
0x17fd   :  { %v2485_v4 = vpop.eup %2484 }
0x17fe   :  { %v1911_v5 = vsel %vm1903_vm9, %v2485_v4, 0.0 }
0x17ff   :  { %1912 = vadd.xlane.f32.xlu0 %v1911_v5 }
0x1815   :  { %1895 = vrot.lane.b32.xlu0 %v2095_v7, %s2611_s22  ;;  %s2532_s22 = scalar_lea.vmem %s2002_s8, 256 }
0x1816   :  { %p2533_p2 = scmp.ne.s32.totalorder %s2002_s8, %s2532_s22  ;;  %p2538_p4 = scmp.lt.s32.totalorder %s2532_s22, %s2532_s22 }
0x1818   :  { %p2539_p5 = por %p2538_p4, %p2537_p3 }
0x181a   :  { %p2540_p6 = pnand %p2539_p5, %p2533_p2 }
0x188c   :  { %v1913_v9 = vpop.xlane.xlu0 %1912 }
0x188d   :  { %2486 = vrcp.f32 %v1913_v9 }
0x1890   :  { %v1896_v10 = vpop.permute.xlu0 %1895 }
0x1891   :  { %v1898_v11 = vadd.f32 %v1896_v10, %v1885_v61 }
0x1893   :  { %1900 = vrot.lane.b32.xlu1 %v1898_v11, %s2618_s1 }
0x1897   :  { %v2487_v13 = vpop.eup %2486 }
0x1898   :  { %v1915_v12 = vmul.f32 %v2487_v13, %v2485_v4 }
0x189a   :  { %2307 = vmatmul.mubr.msk.f32.vlgmr.msra.gmra.mrb[48].mxu1 %vm1917_vm2, %v1915_v12 }
0x189b   :  { %2543 = shalt.err (!%p2540_p6)
}
0x189c   :  { %s2544_s15 = scalar_lea.hbm %s3267_s10, 256 }
0x189d   :  { %p2545_p7 = scmp.ne.s32.totalorder %s3267_s10, %s2544_s15  ;;  %p2548_p8 = scmp.lt.u32.totalorder %s2544_s15, %s3267_s10 }
0x189f   :  { %p2550_p9 = pnand %p2548_p8, %p2545_p7 }
0x18a1   :  { %2553 = shalt.err (!%p2550_p9)
}
0x18a2   :  { %s2620_s19 = smov 2   ;;  %s2621_s23 = smov [#allocation10]  }
0x18a3   :  { %2007 = dma.vmem_to_hbm [thread:$0]  %s2002_s8, 256, %s3267_s10, [#allocation6], %s2616_s5, %s2616_s5, %s2620_s19  }
0x18a4   :  { %s2014_s24 = sshll.u32 %s2621_s23, 4  ;;  %s2622_s25 = smov [#allocation12]   ;;  %s2015_s24 = int_to_ptr.vmem [resolvable:$true] %s2014_s24 }
0x18a5   :  { %s2024_s26 = sshll.u32 %s2622_s25, 4  ;;  %s2554_s27 = scalar_lea.vmem %s2015_s24, 32  ;;  %s2025_s26 = int_to_ptr.vmem [resolvable:$true] %s2024_s26 }
0x18a6   :  { %p2555_p10 = scmp.ne.s32.totalorder %s2015_s24, %s2554_s27  ;;  %p2559_p11 = scmp.lt.s32.totalorder %s2015_s24, %s2015_s24 }
0x18a7   :  { %p2560_p12 = scmp.lt.s32.totalorder %s2554_s27, %s2554_s27 }
0x18a9   :  { %p2561_p13 = por %p2560_p12, %p2559_p11 }
0x18ab   :  { %p2562_p0 = pnand %p2561_p13, %p2555_p10 }
0x1905   :  { %v1901_v14 = vpop.permute.xlu1 %1900 }
0x1906   :  { %1904 = vst.msk [vmem:[#allocation12] sm:$0x3] %vm1903_vm9, %v1901_v14 }
0x196d   :  { %v1991_v24 = vpop.f32.mrb[48].mxu1 }
0x196e   :  { %1995 = vst [vmem:[#allocation10] sm:$0x3] %v1991_v24  ;;  %v2308_v25 = vpop.f32.mrb[49].mxu1 }
0x196f   :  { %2565 = shalt.err (!%p2562_p0)
}
0x1970   :  { %s2566_s28 = scalar_lea.hbm %s3268_s11, 32 }
0x1971   :  { %p2567_p1 = scmp.ne.s32.totalorder %s3268_s11, %s2566_s28  ;;  %p2570_p2 = scmp.lt.u32.totalorder %s2566_s28, %s3268_s11 }
0x1973   :  { %p2572_p3 = pnand %p2570_p2, %p2567_p1 }
0x1975   :  { %2575 = shalt.err (!%p2572_p3)
}
0x1976   :  { %2017 = dma.vmem_to_hbm [thread:$0]  %s2015_s24, 32, %s3268_s11, [#allocation11]  }
0x1977   :  { %s2576_s14 = scalar_lea.vmem %s2025_s26, 32  ;;  %p2581_p5 = scmp.lt.s32.totalorder %s2025_s26, %s2025_s26 }
0x1978   :  { %p2577_p4 = scmp.ne.s32.totalorder %s2025_s26, %s2576_s14  ;;  %p2582_p6 = scmp.lt.s32.totalorder %s2576_s14, %s2576_s14 }
0x197a   :  { %p2583_p7 = por %p2582_p6, %p2581_p5 }
0x197c   :  { %p2584_p8 = pnand %p2583_p7, %p2577_p4 }
0x197e   :  { %2587 = shalt.err (!%p2584_p8)
}
0x197f   :  { %s2588_s8 = scalar_lea.hbm %s3269_s12, 32 }
0x1980   :  { %p2589_p9 = scmp.ne.s32.totalorder %s3269_s12, %s2588_s8  ;;  %p2592_p10 = scmp.lt.u32.totalorder %s2588_s8, %s3269_s12 }
0x1982   :  { %p2594_p11 = pnand %p2592_p10, %p2589_p9 }
0x1984   :  { %2597 = shalt.err (!%p2594_p11)
}
0x1985   :  { %2027 = dma.vmem_to_hbm [thread:$0]  %s2025_s26, 32, %s3269_s12, [#allocation11]  }
0x1986   :  { %2602 = dma.done.wait [#allocation6], 256  }
0x1987   :  { %2603 = vsyncadd [#allocation6], 4294967040 }
0x1988   :  { %2604 = dma.done.wait [#allocation11], 64  }
0x1989   :  { %2605 = vsyncadd [#allocation11], 4294967232 }
0x198a   :  { %2037 = vsyncpa [#allocation5], 1 }
0x198b   :  { %2038 = vsyncpa [#allocation8], 1 }
0x198c   :  { %2039 = vsyncpa [#allocation6], 1 }
0x198d   :  { %2040 = vsyncpa [#allocation11], 1 }

</bundles_post_ra>
